<compile_context>
chip_gen: v7x
topology: tpu7x:2x2x1
jax: 0.10.0
libtpu: 0.0.40
codegen_flags: <defaults>
</compile_context>

<pallas_src>
import functools

import numpy as np
import jax
import jax.numpy as jnp
from jax.experimental import pallas as pl
from jax.experimental.pallas import tpu as pltpu


def _round_up(x, m):
    return (x + m - 1) // m * m


def _pick_tile_m(M, cap=1024):
    """Largest multiple-of-8 divisor of M (<= cap) -> fewest grid steps with
    no M padding.  Falls back to padding M up if no divisor exists."""
    cands = [t for t in range(8, cap + 1, 8) if M % t == 0]
    if not cands:
        return min(cap, _round_up(M, 8))
    return max(cands)


def _pick_tile_k(Kp, cap=1024):
    """Largest multiple-of-128 divisor of Kp (Kp is a multiple of 128)."""
    cands = [t for t in range(128, min(cap, Kp) + 1, 128) if Kp % t == 0]
    return max(cands) if cands else 128


# ----------------------------------------------------------------------------
# Tiled matmul + bias (+ optional ReLU):  y = relu(x @ w + b)
# Two kernel variants: single exact K tile (no scratch, no K axis) and the
# general K-walking variant with an f32 VMEM accumulator.
# ----------------------------------------------------------------------------
def _matmul_1k_kernel(x_ref, w_ref, b_ref, o_ref, *, relu):
    y = jnp.dot(x_ref[...], w_ref[...],
                preferred_element_type=jnp.float32) + b_ref[...]
    if relu:
        y = jnp.maximum(y, 0.0)
    o_ref[...] = y.astype(o_ref.dtype)


def _matmul_acc_kernel(x_ref, w_ref, b_ref, o_ref, acc_ref, *, relu):
    k = pl.program_id(2)

    @pl.when(k == 0)
    def _():
        acc_ref[...] = jnp.zeros_like(acc_ref)

    acc_ref[...] += jnp.dot(x_ref[...], w_ref[...],
                            preferred_element_type=jnp.float32)

    @pl.when(k == pl.num_programs(2) - 1)
    def _():
        y = acc_ref[...] + b_ref[...]
        if relu:
            y = jnp.maximum(y, 0.0)
        o_ref[...] = y.astype(o_ref.dtype)


def matmul_bias(x, w, b, *, relu, out_dtype):
    """x: (M, Kp), w: (Kp, Np), b: (1, Np). Kp, Np already multiples of 128."""
    M, Kp = x.shape
    _, Np = w.shape
    TM = _pick_tile_m(M)
    Mp = _round_up(M, TM)
    if Mp != M:
        x = jnp.pad(x, ((0, Mp - M), (0, 0)))
    TK = _pick_tile_k(Kp)
    TN = 256 if Np % 256 == 0 else 128      # 256-wide MXU on v6e/v7x

    if Kp == TK:
        # Single exact K step: direct epilogue, no accumulator scratch.
        out = pl.pallas_call(
            functools.partial(_matmul_1k_kernel, relu=relu),
            out_shape=jax.ShapeDtypeStruct((Mp, Np), out_dtype),
            grid_spec=pltpu.PrefetchScalarGridSpec(
                num_scalar_prefetch=0,
                grid=(Mp // TM, Np // TN),
                in_specs=[
                    pl.BlockSpec((TM, TK), lambda i, j: (i, 0)),
                    pl.BlockSpec((TK, TN), lambda i, j: (0, j)),
                    pl.BlockSpec((1, TN), lambda i, j: (0, j)),
                ],
                out_specs=pl.BlockSpec((TM, TN), lambda i, j: (i, j)),
            ),
            compiler_params=pltpu.CompilerParams(
                dimension_semantics=("parallel", "parallel")),
        )(x, w, b)
    else:
        out = pl.pallas_call(
            functools.partial(_matmul_acc_kernel, relu=relu),
            out_shape=jax.ShapeDtypeStruct((Mp, Np), out_dtype),
            grid_spec=pltpu.PrefetchScalarGridSpec(
                num_scalar_prefetch=0,
                grid=(Mp // TM, Np // TN, Kp // TK),
                in_specs=[
                    pl.BlockSpec((TM, TK), lambda i, j, k: (i, k)),
                    pl.BlockSpec((TK, TN), lambda i, j, k: (k, j)),
                    pl.BlockSpec((1, TN), lambda i, j, k: (0, j)),
                ],
                out_specs=pl.BlockSpec((TM, TN), lambda i, j, k: (i, j)),
                scratch_shapes=[pltpu.VMEM((TM, TN), jnp.float32)],
            ),
            compiler_params=pltpu.CompilerParams(
                dimension_semantics=("parallel", "parallel", "arbitrary")),
        )(x, w, b)
    return out[:M] if Mp != M else out


# ----------------------------------------------------------------------------
# Fused classifier:  logits = relu(x @ w1 + b1) @ w2 + b2
# The (B, 256) hidden activation never leaves VMEM.  Dropout = identity (eval).
# ----------------------------------------------------------------------------
def _classifier_kernel(x_ref, w1_ref, b1_ref, w2_ref, b2_ref, o_ref, acc_ref):
    k = pl.program_id(0)

    @pl.when(k == 0)
    def _():
        acc_ref[...] = jnp.zeros_like(acc_ref)

    acc_ref[...] += jnp.dot(x_ref[...], w1_ref[...],
                            preferred_element_type=jnp.float32)

    @pl.when(k == pl.num_programs(0) - 1)
    def _():
        h = jnp.maximum(acc_ref[...] + b1_ref[...], 0.0)   # fc1 bias + ReLU
        y = jnp.dot(h.astype(w2_ref.dtype), w2_ref[...],
                    preferred_element_type=jnp.float32) + b2_ref[...]
        o_ref[...] = y.astype(o_ref.dtype)


def classifier_forward(x, w1, b1, w2, b2):
    """x: (B, K1), w1: (K1, H), b1: (1, H), w2: (H, N2p), b2: (1, N2p)."""
    B = x.shape[0]
    K1, H = w1.shape
    N2p = w2.shape[1]
    if x.shape[1] != K1:
        x = jnp.pad(x, ((0, 0), (0, K1 - x.shape[1])))
    Bp = _round_up(B, 8)
    if Bp != B:
        x = jnp.pad(x, ((0, Bp - B), (0, 0)))
    TK = _pick_tile_k(K1)                 # 6272 = 7 * 896 -> 7 exact steps

    out = pl.pallas_call(
        _classifier_kernel,
        out_shape=jax.ShapeDtypeStruct((Bp, N2p), jnp.float32),
        grid_spec=pltpu.PrefetchScalarGridSpec(
            num_scalar_prefetch=0,
            grid=(K1 // TK,),
            in_specs=[
                pl.BlockSpec((Bp, TK), lambda k: (0, k)),
                pl.BlockSpec((TK, H), lambda k: (k, 0)),
                pl.BlockSpec((1, H), lambda k: (0, 0)),
                pl.BlockSpec((H, N2p), lambda k: (0, 0)),
                pl.BlockSpec((1, N2p), lambda k: (0, 0)),
            ],
            out_specs=pl.BlockSpec((Bp, N2p), lambda k: (0, 0)),
            scratch_shapes=[pltpu.VMEM((Bp, H), jnp.float32)],
        ),
        compiler_params=pltpu.CompilerParams(
            dimension_semantics=("arbitrary",)),
    )(x, w1, b1, w2, b2)
    return out[:B]


# ----------------------------------------------------------------------------
# 2x2 stride-2 max-pool: elementwise max of four strided slices (fuses in XLA,
# no HBM transpose / extra kernel launch).
# ----------------------------------------------------------------------------
def maxpool_2x2(x):
    return jnp.maximum(
        jnp.maximum(x[:, ::2, ::2, :], x[:, 1::2, ::2, :]),
        jnp.maximum(x[:, ::2, 1::2, :], x[:, 1::2, 1::2, :]))


# ----------------------------------------------------------------------------
# 3x3 conv, padding=1, + bias + ReLU.  im2col glue (K padding folded into the
# concat), matmul + epilogue on the MXU.
# ----------------------------------------------------------------------------
def conv3x3_relu(x, wmat, bvec, cout):
    """x: (N,H,W,Cin); wmat: (Kp, Np) pre-padded; bvec: (1, Np); cout real."""
    N, H, W, Cin = x.shape
    Kp, Np = wmat.shape
    K = 9 * Cin
    xp = jnp.pad(x, ((0, 0), (1, 1), (1, 1), (0, 0)))
    slabs = [xp[:, dy:dy + H, dx:dx + W, :]
             for dy in range(3) for dx in range(3)]
    if Kp > K:                                   # fold K padding into concat
        slabs.append(jnp.zeros((N, H, W, Kp - K), x.dtype))
    patches = jnp.concatenate(slabs, axis=-1).reshape(N * H * W, Kp)
    y = matmul_bias(patches, wmat, bvec, relu=True, out_dtype=x.dtype)
    y = y.reshape(N, H, W, Np)
    # channel slice fuses into the next stage's pad/concat glue
    return y[..., :cout] if cout != Np else y


# ----------------------------------------------------------------------------
# AdaptiveAvgPool2d((7,7)) — identity when already 7x7; exact PyTorch region
# semantics via pooling matrices otherwise.
# ----------------------------------------------------------------------------
def adaptive_avg_pool(x, out_h, out_w):
    N, H, W, C = x.shape
    if H == out_h and W == out_w:
        return x

    def pool_matrix(in_size, out_size):
        P = np.zeros((out_size, in_size), np.float32)
        for i in range(out_size):
            s = (i * in_size) // out_size
            e = -((-(i + 1) * in_size) // out_size)
            P[i, s:e] = 1.0 / (e - s)
        return jnp.asarray(P, x.dtype)

    return jnp.einsum('oh,nhwc,pw->nopc',
                      pool_matrix(H, out_h), x, pool_matrix(W, out_w))


# ----------------------------------------------------------------------------
# Parameters
# ----------------------------------------------------------------------------
def init_params(key, num_classes):
    ks = jax.random.split(key, 10)

    def conv_w(k, cin, cout):
        return (jax.random.normal(k, (3, 3, cin, cout), jnp.float32)
                * (1.0 / np.sqrt(9 * cin)))

    def lin_w(k, fin, fout):
        return (jax.random.normal(k, (fin, fout), jnp.float32)
                * (1.0 / np.sqrt(fin)))

    return {
        'w1': conv_w(ks[0], 3, 32),   'b1': jnp.zeros((32,), jnp.float32),
        'w2': conv_w(ks[1], 32, 64),  'b2': jnp.zeros((64,), jnp.float32),
        'w3': conv_w(ks[2], 64, 128), 'b3': jnp.zeros((128,), jnp.float32),
        'fc1_w': lin_w(ks[3], 128 * 7 * 7, 256),
        'fc1_b': jnp.zeros((256,), jnp.float32),
        'fc2_w': lin_w(ks[4], 256, num_classes),
        'fc2_b': jnp.zeros((num_classes,), jnp.float32),
    }


def prepare_params(params, compute_dtype=jnp.bfloat16):
    """Reshape/pad/cast weights ONCE (no per-call jnp.pad around pallas_call).
    Matmul inputs go to bf16; biases stay f32 for the f32 VPU epilogue."""
    def prep_conv(w, b):
        cin, cout = w.shape[2], w.shape[3]
        K, Kp, Np = 9 * cin, _round_up(9 * cin, 128), _round_up(cout, 128)
        wm = jnp.pad(w.reshape(K, cout),
                     ((0, Kp - K), (0, Np - cout))).astype(compute_dtype)
        bm = jnp.pad(b, (0, Np - cout)).reshape(1, Np).astype(jnp.float32)
        return wm, bm

    def prep_fc(w, b):
        K, Nn = w.shape
        Kp, Np = _round_up(K, 128), _round_up(Nn, 128)
        wm = jnp.pad(w, ((0, Kp - K), (0, Np - Nn))).astype(compute_dtype)
        bm = jnp.pad(b, (0, Np - Nn)).reshape(1, Np).astype(jnp.float32)
        return wm, bm

    w1, b1 = prep_conv(params['w1'], params['b1'])
    w2, b2 = prep_conv(params['w2'], params['b2'])
    w3, b3 = prep_conv(params['w3'], params['b3'])
    f1w, f1b = prep_fc(params['fc1_w'], params['fc1_b'])
    f2w, f2b = prep_fc(params['fc2_w'], params['fc2_b'])
    return {'w1': w1, 'b1': b1, 'w2': w2, 'b2': b2, 'w3': w3, 'b3': b3,
            'fc1_w': f1w, 'fc1_b': f1b, 'fc2_w': f2w, 'fc2_b': f2b}


# ----------------------------------------------------------------------------
# Full forward pass
# ----------------------------------------------------------------------------
def rotation_classifier_forward(x_nhwc, p, num_classes):
    x = x_nhwc.astype(p['w1'].dtype)              # bf16 activations
    x = conv3x3_relu(x, p['w1'], p['b1'], 32)
    x = maxpool_2x2(x)
    x = conv3x3_relu(x, p['w2'], p['b2'], 64)
    x = maxpool_2x2(x)
    x = conv3x3_relu(x, p['w3'], p['b3'], 128)
    x = maxpool_2x2(x)
    x = adaptive_avg_pool(x, 7, 7)
    x = x.reshape(x.shape[0], -1)                 # flatten (HWC order)
    # fc1 + ReLU + Dropout(identity, eval) + fc2, fused in one pallas_call
    logits = classifier_forward(x, p['fc1_w'], p['fc1_b'],
                                p['fc2_w'], p['fc2_b'])
    return logits[:, :num_classes]


if __name__ == "__main__":
    num_classes = 4            # rotation pretext: {0, 90, 180, 270} degrees
    key = jax.random.PRNGKey(0)
    k_x, k_p = jax.random.split(key)

    # Small input, PyTorch convention (NCHW); 56x56 -> 7x7 after three pools.
    x_nchw = jax.random.normal(k_x, (2, 3, 56, 56), jnp.float32)
    x_nhwc = jnp.transpose(x_nchw, (0, 2, 3, 1))

    params = prepare_params(init_params(k_p, num_classes))

    fwd = jax.jit(lambda x, p: rotation_classifier_forward(x, p, num_classes))
    logits = jax.block_until_ready(fwd(x_nhwc, params))

    assert logits.shape == (2, num_classes), logits.shape
    assert jnp.all(jnp.isfinite(logits))
    print("KERNEL_OK")
</pallas_src>

<mosaic_0001>
module attributes {stable_mosaic.version = 11 : i64} {
  func.func @_matmul_1k_kernel(%arg0: i32, %arg1: i32, %arg2: memref<896x128xbf16, #tpu.memory_space<vmem>>, %arg3: memref<128x128xbf16, #tpu.memory_space<vmem>>, %arg4: memref<1x128xf32, #tpu.memory_space<vmem>>, %arg5: memref<896x128xbf16, #tpu.memory_space<vmem>>) attributes {dimension_semantics = [#tpu.dimension_semantics<parallel>, #tpu.dimension_semantics<parallel>], iteration_bounds = array<i64: 7, 1>, scalar_prefetch = 0 : i64, scratch_operands = 0 : i64, tpu.core_type = #tpu.core_type<tc>, window_params = [{transform_indices = @transform_0, window_bounds = array<i64: 896, 128>}, {transform_indices = @transform_1, window_bounds = array<i64: 128, 128>}, {transform_indices = @transform_2, window_bounds = array<i64: 1, 128>}, {transform_indices = @transform_3, window_bounds = array<i64: 896, 128>}]} {
    %c0 = arith.constant 0 : index
    %c0_0 = arith.constant 0 : index
    %0 = vector.load %arg2[%c0, %c0_0] : memref<896x128xbf16, #tpu.memory_space<vmem>>, vector<896x128xbf16>
    %c0_1 = arith.constant 0 : index
    %c0_2 = arith.constant 0 : index
    %1 = vector.load %arg3[%c0_1, %c0_2] : memref<128x128xbf16, #tpu.memory_space<vmem>>, vector<128x128xbf16>
    %cst = arith.constant dense<0.000000e+00> : vector<896x128xf32>
    %2 = tpu.matmul %0, %1, %cst {dimension_numbers = #tpu.dot_dimension_numbers<[1], [0], [0], [1], [0, 0, 1, 1], [], []>} : vector<896x128xbf16>, vector<128x128xbf16>, vector<896x128xf32> -> vector<896x128xf32>
    %c0_3 = arith.constant 0 : index
    %c0_4 = arith.constant 0 : index
    %3 = vector.load %arg4[%c0_3, %c0_4] : memref<1x128xf32, #tpu.memory_space<vmem>>, vector<1x128xf32>
    %4 = vector.broadcast %3 : vector<1x128xf32> to vector<896x128xf32>
    %5 = arith.addf %2, %4 : vector<896x128xf32>
    %cst_5 = arith.constant 0.000000e+00 : f32
    %6 = vector.broadcast %cst_5 : f32 to vector<896x128xf32>
    %7 = arith.maximumf %5, %6 : vector<896x128xf32>
    %8 = arith.truncf %7 : vector<896x128xf32> to vector<896x128xbf16>
    %c0_6 = arith.constant 0 : index
    %c0_7 = arith.constant 0 : index
    %9 = vector.load %arg5[%c0_6, %c0_7] : memref<896x128xbf16, #tpu.memory_space<vmem>>, vector<896x128xbf16>
    tpu.vector_store %arg5[%c0_6, %c0_7], %8 {strides = array<i32>} : memref<896x128xbf16, #tpu.memory_space<vmem>>, vector<896x128xbf16>,
    return
  }
  func.func @transform_0(%arg0: i32, %arg1: i32) -> (i32, i32) {
    %c0_i32 = arith.constant 0 : i32
    %c0_i32_0 = arith.constant 0 : i32
    return %arg0, %c0_i32 : i32, i32
  }
  func.func @transform_1(%arg0: i32, %arg1: i32) -> (i32, i32) {
    %c0_i32 = arith.constant 0 : i32
    %c0_i32_0 = arith.constant 0 : i32
    return %c0_i32, %arg1 : i32, i32
  }
  func.func @transform_2(%arg0: i32, %arg1: i32) -> (i32, i32) {
    %c0_i32 = arith.constant 0 : i32
    %c0_i32_0 = arith.constant 0 : i32
    return %c0_i32, %arg1 : i32, i32
  }
  func.func @transform_3(%arg0: i32, %arg1: i32) -> (i32, i32) {
    %c0_i32 = arith.constant 0 : i32
    return %arg0, %arg1 : i32, i32
  }
}

module attributes {stable_mosaic.version = 11 : i64} {
  func.func @_matmul_1k_kernel(%arg0: i32, %arg1: i32, %arg2: memref<784x384xbf16, #tpu.memory_space<vmem>>, %arg3: memref<384x128xbf16, #tpu.memory_space<vmem>>, %arg4: memref<1x128xf32, #tpu.memory_space<vmem>>, %arg5: memref<784x128xbf16, #tpu.memory_space<vmem>>) attributes {dimension_semantics = [#tpu.dimension_semantics<parallel>, #tpu.dimension_semantics<parallel>], iteration_bounds = array<i64: 2, 1>, scalar_prefetch = 0 : i64, scratch_operands = 0 : i64, tpu.core_type = #tpu.core_type<tc>, window_params = [{transform_indices = @transform_0, window_bounds = array<i64: 784, 384>}, {transform_indices = @transform_1, window_bounds = array<i64: 384, 128>}, {transform_indices = @transform_2, window_bounds = array<i64: 1, 128>}, {transform_indices = @transform_3, window_bounds = array<i64: 784, 128>}]} {
    %c0 = arith.constant 0 : index
    %c0_0 = arith.constant 0 : index
    %0 = vector.load %arg2[%c0, %c0_0] : memref<784x384xbf16, #tpu.memory_space<vmem>>, vector<784x384xbf16>
    %c0_1 = arith.constant 0 : index
    %c0_2 = arith.constant 0 : index
    %1 = vector.load %arg3[%c0_1, %c0_2] : memref<384x128xbf16, #tpu.memory_space<vmem>>, vector<384x128xbf16>
    %cst = arith.constant dense<0.000000e+00> : vector<784x128xf32>
    %2 = tpu.matmul %0, %1, %cst {dimension_numbers = #tpu.dot_dimension_numbers<[1], [0], [0], [1], [0, 0, 1, 1], [], []>} : vector<784x384xbf16>, vector<384x128xbf16>, vector<784x128xf32> -> vector<784x128xf32>
    %c0_3 = arith.constant 0 : index
    %c0_4 = arith.constant 0 : index
    %3 = vector.load %arg4[%c0_3, %c0_4] : memref<1x128xf32, #tpu.memory_space<vmem>>, vector<1x128xf32>
    %4 = vector.broadcast %3 : vector<1x128xf32> to vector<784x128xf32>
    %5 = arith.addf %2, %4 : vector<784x128xf32>
    %cst_5 = arith.constant 0.000000e+00 : f32
    %6 = vector.broadcast %cst_5 : f32 to vector<784x128xf32>
    %7 = arith.maximumf %5, %6 : vector<784x128xf32>
    %8 = arith.truncf %7 : vector<784x128xf32> to vector<784x128xbf16>
    %c0_6 = arith.constant 0 : index
    %c0_7 = arith.constant 0 : index
    %9 = vector.load %arg5[%c0_6, %c0_7] : memref<784x128xbf16, #tpu.memory_space<vmem>>, vector<784x128xbf16>
    tpu.vector_store %arg5[%c0_6, %c0_7], %8 {strides = array<i32>} : memref<784x128xbf16, #tpu.memory_space<vmem>>, vector<784x128xbf16>,
    return
  }
  func.func @transform_0(%arg0: i32, %arg1: i32) -> (i32, i32) {
    %c0_i32 = arith.constant 0 : i32
    %c0_i32_0 = arith.constant 0 : i32
    return %arg0, %c0_i32 : i32, i32
  }
  func.func @transform_1(%arg0: i32, %arg1: i32) -> (i32, i32) {
    %c0_i32 = arith.constant 0 : i32
    %c0_i32_0 = arith.constant 0 : i32
    return %c0_i32, %arg1 : i32, i32
  }
  func.func @transform_2(%arg0: i32, %arg1: i32) -> (i32, i32) {
    %c0_i32 = arith.constant 0 : i32
    %c0_i32_0 = arith.constant 0 : i32
    return %c0_i32, %arg1 : i32, i32
  }
  func.func @transform_3(%arg0: i32, %arg1: i32) -> (i32, i32) {
    %c0_i32 = arith.constant 0 : i32
    return %arg0, %arg1 : i32, i32
  }
}

module attributes {stable_mosaic.version = 11 : i64} {
  func.func @_matmul_1k_kernel(%arg0: i32, %arg1: i32, %arg2: memref<392x640xbf16, #tpu.memory_space<vmem>>, %arg3: memref<640x128xbf16, #tpu.memory_space<vmem>>, %arg4: memref<1x128xf32, #tpu.memory_space<vmem>>, %arg5: memref<392x128xbf16, #tpu.memory_space<vmem>>) attributes {dimension_semantics = [#tpu.dimension_semantics<parallel>, #tpu.dimension_semantics<parallel>], iteration_bounds = array<i64: 1, 1>, scalar_prefetch = 0 : i64, scratch_operands = 0 : i64, tpu.core_type = #tpu.core_type<tc>, window_params = [{transform_indices = @transform_0, window_bounds = array<i64: 392, 640>}, {transform_indices = @transform_1, window_bounds = array<i64: 640, 128>}, {transform_indices = @transform_2, window_bounds = array<i64: 1, 128>}, {transform_indices = @transform_3, window_bounds = array<i64: 392, 128>}]} {
    %c0 = arith.constant 0 : index
    %c0_0 = arith.constant 0 : index
    %0 = vector.load %arg2[%c0, %c0_0] : memref<392x640xbf16, #tpu.memory_space<vmem>>, vector<392x640xbf16>
    %c0_1 = arith.constant 0 : index
    %c0_2 = arith.constant 0 : index
    %1 = vector.load %arg3[%c0_1, %c0_2] : memref<640x128xbf16, #tpu.memory_space<vmem>>, vector<640x128xbf16>
    %cst = arith.constant dense<0.000000e+00> : vector<392x128xf32>
    %2 = tpu.matmul %0, %1, %cst {dimension_numbers = #tpu.dot_dimension_numbers<[1], [0], [0], [1], [0, 0, 1, 1], [], []>} : vector<392x640xbf16>, vector<640x128xbf16>, vector<392x128xf32> -> vector<392x128xf32>
    %c0_3 = arith.constant 0 : index
    %c0_4 = arith.constant 0 : index
    %3 = vector.load %arg4[%c0_3, %c0_4] : memref<1x128xf32, #tpu.memory_space<vmem>>, vector<1x128xf32>
    %4 = vector.broadcast %3 : vector<1x128xf32> to vector<392x128xf32>
    %5 = arith.addf %2, %4 : vector<392x128xf32>
    %cst_5 = arith.constant 0.000000e+00 : f32
    %6 = vector.broadcast %cst_5 : f32 to vector<392x128xf32>
    %7 = arith.maximumf %5, %6 : vector<392x128xf32>
    %8 = arith.truncf %7 : vector<392x128xf32> to vector<392x128xbf16>
    %c0_6 = arith.constant 0 : index
    %c0_7 = arith.constant 0 : index
    %9 = vector.load %arg5[%c0_6, %c0_7] : memref<392x128xbf16, #tpu.memory_space<vmem>>, vector<392x128xbf16>
    tpu.vector_store %arg5[%c0_6, %c0_7], %8 {strides = array<i32>} : memref<392x128xbf16, #tpu.memory_space<vmem>>, vector<392x128xbf16>,
    return
  }
  func.func @transform_0(%arg0: i32, %arg1: i32) -> (i32, i32) {
    %c0_i32 = arith.constant 0 : i32
    %c0_i32_0 = arith.constant 0 : i32
    return %arg0, %c0_i32 : i32, i32
  }
  func.func @transform_1(%arg0: i32, %arg1: i32) -> (i32, i32) {
    %c0_i32 = arith.constant 0 : i32
    %c0_i32_0 = arith.constant 0 : i32
    return %c0_i32, %arg1 : i32, i32
  }
  func.func @transform_2(%arg0: i32, %arg1: i32) -> (i32, i32) {
    %c0_i32 = arith.constant 0 : i32
    %c0_i32_0 = arith.constant 0 : i32
    return %c0_i32, %arg1 : i32, i32
  }
  func.func @transform_3(%arg0: i32, %arg1: i32) -> (i32, i32) {
    %c0_i32 = arith.constant 0 : i32
    return %arg0, %arg1 : i32, i32
  }
}

module attributes {stable_mosaic.version = 11 : i64} {
  func.func @_classifier_kernel(%arg0: i32, %arg1: memref<8x896xbf16, #tpu.memory_space<vmem>>, %arg2: memref<896x256xbf16, #tpu.memory_space<vmem>>, %arg3: memref<1x256xf32, #tpu.memory_space<vmem>>, %arg4: memref<256x128xbf16, #tpu.memory_space<vmem>>, %arg5: memref<1x128xf32, #tpu.memory_space<vmem>>, %arg6: memref<8x128xf32, #tpu.memory_space<vmem>>, %arg7: memref<8x256xf32, #tpu.memory_space<vmem>>) attributes {dimension_semantics = [#tpu.dimension_semantics<arbitrary>], iteration_bounds = array<i64: 7>, scalar_prefetch = 0 : i64, scratch_operands = 1 : i64, tpu.core_type = #tpu.core_type<tc>, window_params = [{transform_indices = @transform_0, window_bounds = array<i64: 8, 896>}, {transform_indices = @transform_1, window_bounds = array<i64: 896, 256>}, {pipeline_mode = #tpu.pipeline_mode<synchronous>, transform_indices = @transform_2, window_bounds = array<i64: 1, 256>}, {pipeline_mode = #tpu.pipeline_mode<synchronous>, transform_indices = @transform_3, window_bounds = array<i64: 256, 128>}, {pipeline_mode = #tpu.pipeline_mode<synchronous>, transform_indices = @transform_4, window_bounds = array<i64: 1, 128>}, {pipeline_mode = #tpu.pipeline_mode<synchronous>, transform_indices = @transform_5, window_bounds = array<i64: 8, 128>}]} {
    %c0_i32 = arith.constant 0 : i32
    %0 = arith.cmpi eq, %arg0, %c0_i32 : i32
    %1 = arith.extui %0 : i1 to i32
    %c0_i32_0 = arith.constant 0 : i32
    %2 = arith.cmpi ne, %1, %c0_i32_0 : i32
    scf.if %2 {
      %cst_9 = arith.constant 0.000000e+00 : f32
      %12 = vector.broadcast %cst_9 : f32 to vector<8x256xf32>
      %c0_10 = arith.constant 0 : index
      %c0_11 = arith.constant 0 : index
      %13 = vector.load %arg7[%c0_10, %c0_11] : memref<8x256xf32, #tpu.memory_space<vmem>>, vector<8x256xf32>
      tpu.vector_store %arg7[%c0_10, %c0_11], %12 {strides = array<i32>} : memref<8x256xf32, #tpu.memory_space<vmem>>, vector<8x256xf32>,
    } else {
    }
    %c0 = arith.constant 0 : index
    %c0_1 = arith.constant 0 : index
    %3 = vector.load %arg7[%c0, %c0_1] : memref<8x256xf32, #tpu.memory_space<vmem>>, vector<8x256xf32>
    %c0_2 = arith.constant 0 : index
    %c0_3 = arith.constant 0 : index
    %4 = vector.load %arg1[%c0_2, %c0_3] : memref<8x896xbf16, #tpu.memory_space<vmem>>, vector<8x896xbf16>
    %c0_4 = arith.constant 0 : index
    %c0_5 = arith.constant 0 : index
    %5 = vector.load %arg2[%c0_4, %c0_5] : memref<896x256xbf16, #tpu.memory_space<vmem>>, vector<896x256xbf16>
    %cst = arith.constant dense<0.000000e+00> : vector<8x256xf32>
    %6 = tpu.matmul %4, %5, %cst {dimension_numbers = #tpu.dot_dimension_numbers<[1], [0], [0], [1], [0, 0, 1, 1], [], []>} : vector<8x896xbf16>, vector<896x256xbf16>, vector<8x256xf32> -> vector<8x256xf32>
    %7 = arith.addf %3, %6 : vector<8x256xf32>
    %c0_6 = arith.constant 0 : index
    %c0_7 = arith.constant 0 : index
    %8 = vector.load %arg7[%c0_6, %c0_7] : memref<8x256xf32, #tpu.memory_space<vmem>>, vector<8x256xf32>
    tpu.vector_store %arg7[%c0_6, %c0_7], %7 {strides = array<i32>} : memref<8x256xf32, #tpu.memory_space<vmem>>, vector<8x256xf32>,
    %c6_i32 = arith.constant 6 : i32
    %9 = arith.cmpi eq, %arg0, %c6_i32 : i32
    %10 = arith.extui %9 : i1 to i32
    %c0_i32_8 = arith.constant 0 : i32
    %11 = arith.cmpi ne, %10, %c0_i32_8 : i32
    scf.if %11 {
      %c0_9 = arith.constant 0 : index
      %c0_10 = arith.constant 0 : index
      %12 = vector.load %arg7[%c0_9, %c0_10] : memref<8x256xf32, #tpu.memory_space<vmem>>, vector<8x256xf32>
      %c0_11 = arith.constant 0 : index
      %c0_12 = arith.constant 0 : index
      %13 = vector.load %arg3[%c0_11, %c0_12] : memref<1x256xf32, #tpu.memory_space<vmem>>, vector<1x256xf32>
      %14 = vector.broadcast %13 : vector<1x256xf32> to vector<8x256xf32>
      %15 = arith.addf %12, %14 : vector<8x256xf32>
      %cst_13 = arith.constant 0.000000e+00 : f32
      %16 = vector.broadcast %cst_13 : f32 to vector<8x256xf32>
      %17 = arith.maximumf %15, %16 : vector<8x256xf32>
      %18 = arith.truncf %17 : vector<8x256xf32> to vector<8x256xbf16>
      %c0_14 = arith.constant 0 : index
      %c0_15 = arith.constant 0 : index
      %19 = vector.load %arg4[%c0_14, %c0_15] : memref<256x128xbf16, #tpu.memory_space<vmem>>, vector<256x128xbf16>
      %cst_16 = arith.constant dense<0.000000e+00> : vector<8x128xf32>
      %20 = tpu.matmul %18, %19, %cst_16 {dimension_numbers = #tpu.dot_dimension_numbers<[1], [0], [0], [1], [0, 0, 1, 1], [], []>} : vector<8x256xbf16>, vector<256x128xbf16>, vector<8x128xf32> -> vector<8x128xf32>
      %c0_17 = arith.constant 0 : index
      %c0_18 = arith.constant 0 : index
      %21 = vector.load %arg5[%c0_17, %c0_18] : memref<1x128xf32, #tpu.memory_space<vmem>>, vector<1x128xf32>
      %22 = vector.broadcast %21 : vector<1x128xf32> to vector<8x128xf32>
      %23 = arith.addf %20, %22 : vector<8x128xf32>
      %c0_19 = arith.constant 0 : index
      %c0_20 = arith.constant 0 : index
      %24 = vector.load %arg6[%c0_19, %c0_20] : memref<8x128xf32, #tpu.memory_space<vmem>>, vector<8x128xf32>
      tpu.vector_store %arg6[%c0_19, %c0_20], %23 {strides = array<i32>} : memref<8x128xf32, #tpu.memory_space<vmem>>, vector<8x128xf32>,
    } else {
    }
    return
  }
  func.func @transform_0(%arg0: i32) -> (i32, i32) {
    %c0_i32 = arith.constant 0 : i32
    %c0_i32_0 = arith.constant 0 : i32
    return %c0_i32, %arg0 : i32, i32
  }
  func.func @transform_1(%arg0: i32) -> (i32, i32) {
    %c0_i32 = arith.constant 0 : i32
    %c0_i32_0 = arith.constant 0 : i32
    return %arg0, %c0_i32 : i32, i32
  }
  func.func @transform_2(%arg0: i32) -> (i32, i32) {
    %c0_i32 = arith.constant 0 : i32
    %c0_i32_0 = arith.constant 0 : i32
    %c0_i32_1 = arith.constant 0 : i32
    return %c0_i32, %c0_i32_0 : i32, i32
  }
  func.func @transform_3(%arg0: i32) -> (i32, i32) {
    %c0_i32 = arith.constant 0 : i32
    %c0_i32_0 = arith.constant 0 : i32
    %c0_i32_1 = arith.constant 0 : i32
    return %c0_i32, %c0_i32_0 : i32, i32
  }
  func.func @transform_4(%arg0: i32) -> (i32, i32) {
    %c0_i32 = arith.constant 0 : i32
    %c0_i32_0 = arith.constant 0 : i32
    %c0_i32_1 = arith.constant 0 : i32
    return %c0_i32, %c0_i32_0 : i32, i32
  }
  func.func @transform_5(%arg0: i32) -> (i32, i32) {
    %c0_i32 = arith.constant 0 : i32
    %c0_i32_0 = arith.constant 0 : i32
    %c0_i32_1 = arith.constant 0 : i32
    return %c0_i32, %c0_i32_0 : i32, i32
  }
}

</mosaic_0001>

<bundles_post_ra>
// kernel: _lambda_.4
= control target key start
LH: loop header
LB: loop body
LE: loop exit
PB: predicated region body
PF: predicated region fallthrough
CT: control target
= control target key end

     0   :  { %s2975_s12 = smov 0   ;;  %s2977_s13 = smov 0   ;;  %s3272_s0 = inlined_call_operand.vmem [shape: bf16[6272,128], index: 0, kind: input, shape index: {}]   ;;  %s3273_s1 = inlined_call_operand.vmem [shape: bf16[128,128], index: 1, kind: input, shape index: {}]   ;;  %s3274_s2 = inlined_call_operand.vmem [shape: f32[1,128], index: 2, kind: input, shape index: {}]   ;;  %s3275_s3 = inlined_call_operand.vmem [shape: bf16[6272,128], index: 3, kind: output, shape index: {}]  }
   0x1   :  { %s2979_s14 = smov 0  }
   0x2 LB: > { %s25_s15 = sadd.s32 1, %s2949_s13  ;;  %p2006_p0 = scmp.ge.s32.totalorder %s2953_s14, 1  ;;  %s2953_s14 = sphi %s2979_s14, %s13_s14   ;;  %s2949_s13 = sphi %s2977_s13, %s3277_s13   ;;  %s2945_s12 = sphi %s2975_s12, %s3276_s12  }
   0x3   : > { %p27_p1 = scmp.ge.s32.totalorder %s25_s15, 7  ;;  %p169_p2 = scmp.lt.s32.totalorder %s2953_s14, 8 }
   0x5   : > { %s3279_s15 = smov (%p27_p1, %s25_s15), 0  ;;  %p170_p3 = pnand %p2006_p0, %p169_p2 }
   0x6   : > { %v2867_v0 = vld [vmem:[%s3273_s1] sm:$0xff] (!%p170_p3)   ;;  %s203_s18 = smul.u32 (!%p170_p3), 112, %s2945_s12  ;;  %v2868_v1 = vld [vmem:[%s3273_s1 + $0x8] sm:$0xff] (!%p170_p3)   ;;  %v2869_v2 = vld [vmem:[%s3273_s1 + $0x10] sm:$0xff] (!%p170_p3)  }
   0x7   : > { %173 = sbr.rel (%p170_p3) target bundleno = 365 (0x16d), region = 32  ;;  %2699 = vmatprep.subr.bf16.mxu0 (!%p170_p3), %v2867_v0  ;;  %2827 = vmatprep.subr.bf16.mxu1 (!%p170_p3), %v2867_v0  ;;  %v2870_v3 = vld [vmem:[%s3273_s1 + $0x18] sm:$0xff] (!%p170_p3)   ;;  %v2871_v6 = vld [vmem:[%s3273_s1 + $0x20] sm:$0xff] (!%p170_p3)   ;;  %v2872_v7 = vld [vmem:[%s3273_s1 + $0x28] sm:$0xff] (!%p170_p3)  }
   0x8   : > { %p204_p4 = scmp.lt.s32.totalorder (!%p170_p3), %s203_s18, 783  ;;  %2700 = vmatpush3.bf16.msra.mxu0 (!%p170_p3), %v2867_v0  ;;  %2835 = vmatpush3.bf16.msra.mxu1 (!%p170_p3), %v2867_v0  ;;  %v2873_v8 = vld [vmem:[%s3273_s1 + $0x30] sm:$0xff] (!%p170_p3)   ;;  %v2874_v9 = vld [vmem:[%s3273_s1 + $0x38] sm:$0xff] (!%p170_p3)   ;;  %v3086_v0 = vld [vmem:[%s3274_s2] ss:$0 sm:$0xff] (!%p170_p3) }
   0x9   : > { %2701 = vmatprep.subr.bf16.mxu0 (!%p170_p3), %v2868_v1  ;;  %2828 = vmatprep.subr.bf16.mxu1 (!%p170_p3), %v2868_v1 }
   0xc   : > { %2702 = vmatpush3.bf16.msra.mxu0 (!%p170_p3), %v2868_v1  ;;  %2836 = vmatpush3.bf16.msra.mxu1 (!%p170_p3), %v2868_v1 }
   0xd   : > { %2703 = vmatprep.subr.bf16.mxu0 (!%p170_p3), %v2869_v2  ;;  %2829 = vmatprep.subr.bf16.mxu1 (!%p170_p3), %v2869_v2 }
   0xe   : > { %s3281_s18 = smov (!%p204_p4, %s203_s18), 783 }
   0xf   : > { %s2007_s23 = sshll.u32 %s3281_s18, 2 }
  0x10   : > { %s3013_s28 = scalar_lea.vmem %s3272_s0, %s2007_s23  ;;  %2704 = vmatpush3.bf16.msra.mxu0 %v2869_v2  ;;  %2837 = vmatpush3.bf16.msra.mxu1 %v2869_v2  ;;  %s3101_s17 = scalar_lea.vmem %s3275_s3, %s2007_s23 }
  0x11   : > { %v2875_v4 = vld [vmem:[%s3013_s28] sm:$0xff]   ;;  %2705 = vmatprep.subr.bf16.mxu0 %v2870_v3  ;;  %2830 = vmatprep.subr.bf16.mxu1 %v2870_v3  ;;  %v2877_v10 = vld [vmem:[%s3013_s28 + $0x8] sm:$0xff]   ;;  %v2879_v12 = vld [vmem:[%s3013_s28 + $0x10] sm:$0xff]  }
  0x12   : > { %v2876_v5 = vld [vmem:[%s3013_s28 + $0xe0] sm:$0xff]   ;;  %2715 = vmatprep.mubr.bf16.mxu0 %v2875_v4  ;;  %v2878_v11 = vld [vmem:[%s3013_s28 + $0xe8] sm:$0xff]   ;;  %v2880_v13 = vld [vmem:[%s3013_s28 + $0xf0] sm:$0xff]  }
  0x13   : > { %2771 = vmatprep.mubr.bf16.mxu1 %v2876_v5  ;;  %v2881_v14 = vld [vmem:[%s3013_s28 + $0x18] sm:$0xff]   ;;  %v2883_v16 = vld [vmem:[%s3013_s28 + $0x20] sm:$0xff]   ;;  %v2885_v18 = vld [vmem:[%s3013_s28 + $0x28] sm:$0xff]  }
  0x14   : > { %2706 = vmatpush3.bf16.msra.mxu0 %v2870_v3  ;;  %2838 = vmatpush3.bf16.msra.mxu1 %v2870_v3  ;;  %v2882_v15 = vld [vmem:[%s3013_s28 + $0xf8] sm:$0xff]   ;;  %v2884_v17 = vld [vmem:[%s3013_s28 + $0x100] sm:$0xff]   ;;  %v2886_v19 = vld [vmem:[%s3013_s28 + $0x108] sm:$0xff]  }
  0x15   : > { %2707 = vmatprep.subr.bf16.mxu0 %v2871_v6  ;;  %2831 = vmatprep.subr.bf16.mxu1 %v2871_v6  ;;  %v2887_v20 = vld [vmem:[%s3013_s28 + $0x30] sm:$0xff]   ;;  %v2889_v22 = vld [vmem:[%s3013_s28 + $0x38] sm:$0xff]   ;;  %v2891_v24 = vld [vmem:[%s3013_s28 + $0x40] sm:$0xff]  }
  0x16   : > { %v2888_v21 = vld [vmem:[%s3013_s28 + $0x110] sm:$0xff]   ;;  %v2890_v23 = vld [vmem:[%s3013_s28 + $0x118] sm:$0xff]   ;;  %v2892_v25 = vld [vmem:[%s3013_s28 + $0x120] sm:$0xff]  }
  0x17   : > { %v2893_v26 = vld [vmem:[%s3013_s28 + $0x48] sm:$0xff]   ;;  %v2895_v28 = vld [vmem:[%s3013_s28 + $0x50] sm:$0xff]   ;;  %v2897_v30 = vld [vmem:[%s3013_s28 + $0x58] sm:$0xff]  }
  0x18   : > { %2708 = vmatpush3.bf16.msra.mxu0 %v2871_v6  ;;  %2839 = vmatpush3.bf16.msra.mxu1 %v2871_v6  ;;  %v2894_v27 = vld [vmem:[%s3013_s28 + $0x128] sm:$0xff]   ;;  %v2896_v29 = vld [vmem:[%s3013_s28 + $0x130] sm:$0xff]   ;;  %v2898_v31 = vld [vmem:[%s3013_s28 + $0x138] sm:$0xff]  }
  0x19   : > { %2709 = vmatprep.subr.bf16.mxu0 %v2872_v7  ;;  %2832 = vmatprep.subr.bf16.mxu1 %v2872_v7  ;;  %v2899_v32 = vld [vmem:[%s3013_s28 + $0x60] sm:$0xff]   ;;  %v2901_v34 = vld [vmem:[%s3013_s28 + $0x68] sm:$0xff]   ;;  %v2903_v36 = vld [vmem:[%s3013_s28 + $0x70] sm:$0xff]  }
  0x1a   : > { %v2900_v33 = vld [vmem:[%s3013_s28 + $0x140] sm:$0xff]   ;;  %v2902_v35 = vld [vmem:[%s3013_s28 + $0x148] sm:$0xff]   ;;  %v2904_v37 = vld [vmem:[%s3013_s28 + $0x150] sm:$0xff]  }
  0x1b   : > { %v2905_v38 = vld [vmem:[%s3013_s28 + $0x78] sm:$0xff]   ;;  %v2907_v40 = vld [vmem:[%s3013_s28 + $0x80] sm:$0xff]   ;;  %v2909_v42 = vld [vmem:[%s3013_s28 + $0x88] sm:$0xff]  }
  0x1c   : > { %2710 = vmatpush3.bf16.msra.mxu0 %v2872_v7  ;;  %2840 = vmatpush3.bf16.msra.mxu1 %v2872_v7  ;;  %v2906_v39 = vld [vmem:[%s3013_s28 + $0x158] sm:$0xff]   ;;  %v2908_v41 = vld [vmem:[%s3013_s28 + $0x160] sm:$0xff]   ;;  %v2910_v43 = vld [vmem:[%s3013_s28 + $0x168] sm:$0xff]  }
  0x1d   : > { %2711 = vmatprep.subr.bf16.mxu0 %v2873_v8  ;;  %2833 = vmatprep.subr.bf16.mxu1 %v2873_v8  ;;  %v2911_v44 = vld [vmem:[%s3013_s28 + $0x90] sm:$0xff]   ;;  %v2913_v46 = vld [vmem:[%s3013_s28 + $0x98] sm:$0xff]   ;;  %v2915_v48 = vld [vmem:[%s3013_s28 + $0xa0] sm:$0xff]  }
  0x1e   : > { %v2912_v45 = vld [vmem:[%s3013_s28 + $0x170] sm:$0xff]   ;;  %v2914_v47 = vld [vmem:[%s3013_s28 + $0x178] sm:$0xff]   ;;  %v2916_v49 = vld [vmem:[%s3013_s28 + $0x180] sm:$0xff]  }
  0x1f   : > { %v2917_v50 = vld [vmem:[%s3013_s28 + $0xa8] sm:$0xff]   ;;  %v2919_v52 = vld [vmem:[%s3013_s28 + $0xb0] sm:$0xff]   ;;  %v2921_v54 = vld [vmem:[%s3013_s28 + $0xb8] sm:$0xff]  }
  0x20   : > { %2712 = vmatpush3.bf16.msra.mxu0 %v2873_v8  ;;  %2841 = vmatpush3.bf16.msra.mxu1 %v2873_v8  ;;  %v2918_v51 = vld [vmem:[%s3013_s28 + $0x188] sm:$0xff]   ;;  %v2920_v53 = vld [vmem:[%s3013_s28 + $0x190] sm:$0xff]   ;;  %v2922_v55 = vld [vmem:[%s3013_s28 + $0x198] sm:$0xff]  }
  0x21   : > { %2713 = vmatprep.subr.bf16.mxu0 %v2874_v9  ;;  %2834 = vmatprep.subr.bf16.mxu1 %v2874_v9  ;;  %v2923_v56 = vld [vmem:[%s3013_s28 + $0xc0] sm:$0xff]   ;;  %v2925_v58 = vld [vmem:[%s3013_s28 + $0xc8] sm:$0xff]   ;;  %v2927_v60 = vld [vmem:[%s3013_s28 + $0xd0] sm:$0xff]  }
  0x22   : > { %v2924_v57 = vld [vmem:[%s3013_s28 + $0x1a0] sm:$0xff]   ;;  %v2926_v59 = vld [vmem:[%s3013_s28 + $0x1a8] sm:$0xff]   ;;  %v2928_v61 = vld [vmem:[%s3013_s28 + $0x1b0] sm:$0xff]  }
  0x23   : > { %v2929_v62 = vld [vmem:[%s3013_s28 + $0xd8] sm:$0xff]  }
  0x24   : > { %2714 = vmatpush3.bf16.msra.mxu0 %v2874_v9  ;;  %2842 = vmatpush3.bf16.msra.mxu1 %v2874_v9  ;;  %v2930_v63 = vld [vmem:[%s3013_s28 + $0x1b8] sm:$0xff]  }
  0x27   : > { %2716 = vmatmul.mubr.bf16.vlgmr.msra.gmra.mrb[0].mxu0 %v2877_v10  ;;  %2772 = vmatmul.mubr.bf16.vlgmr.msra.gmra.mrb[0].mxu1 %v2878_v11 }
  0x28   : > { %2719 = vmatprep.mubr.bf16.mxu0 %v2879_v12  ;;  %2775 = vmatprep.mubr.bf16.mxu1 %v2880_v13 }
  0x2f   : > { %2720 = vmatmul.mubr.bf16.gmra.mrb[4].mxu0 %v2881_v14  ;;  %2776 = vmatmul.mubr.bf16.gmra.mrb[4].mxu1 %v2882_v15 }
  0x30   : > { %2723 = vmatprep.mubr.bf16.mxu0 %v2883_v16  ;;  %2779 = vmatprep.mubr.bf16.mxu1 %v2884_v17 }
  0x37   : > { %2724 = vmatmul.mubr.bf16.gmra.mrb[8].mxu0 %v2885_v18  ;;  %2780 = vmatmul.mubr.bf16.gmra.mrb[8].mxu1 %v2886_v19 }
  0x38   : > { %2727 = vmatprep.mubr.bf16.mxu0 %v2887_v20  ;;  %2783 = vmatprep.mubr.bf16.mxu1 %v2888_v21 }
  0x3f   : > { %2728 = vmatmul.mubr.bf16.gmra.mrb[12].mxu0 %v2889_v22  ;;  %2784 = vmatmul.mubr.bf16.gmra.mrb[12].mxu1 %v2890_v23 }
  0x40   : > { %2731 = vmatprep.mubr.bf16.mxu0 %v2891_v24  ;;  %2787 = vmatprep.mubr.bf16.mxu1 %v2892_v25 }
  0x47   : > { %2732 = vmatmul.mubr.bf16.gmra.mrb[16].mxu0 %v2893_v26  ;;  %2788 = vmatmul.mubr.bf16.gmra.mrb[16].mxu1 %v2894_v27 }
  0x48   : > { %2735 = vmatprep.mubr.bf16.mxu0 %v2895_v28  ;;  %2791 = vmatprep.mubr.bf16.mxu1 %v2896_v29 }
  0x4f   : > { %2736 = vmatmul.mubr.bf16.gmra.mrb[20].mxu0 %v2897_v30  ;;  %2792 = vmatmul.mubr.bf16.gmra.mrb[20].mxu1 %v2898_v31 }
  0x50   : > { %2739 = vmatprep.mubr.bf16.mxu0 %v2899_v32  ;;  %2795 = vmatprep.mubr.bf16.mxu1 %v2900_v33 }
  0x57   : > { %2740 = vmatmul.mubr.bf16.gmra.mrb[24].mxu0 %v2901_v34  ;;  %2796 = vmatmul.mubr.bf16.gmra.mrb[24].mxu1 %v2902_v35 }
  0x58   : > { %2743 = vmatprep.mubr.bf16.mxu0 %v2903_v36  ;;  %2799 = vmatprep.mubr.bf16.mxu1 %v2904_v37 }
  0x5f   : > { %2744 = vmatmul.mubr.bf16.gmra.mrb[28].mxu0 %v2905_v38  ;;  %2800 = vmatmul.mubr.bf16.gmra.mrb[28].mxu1 %v2906_v39 }
  0x60   : > { %2747 = vmatprep.mubr.bf16.mxu0 %v2907_v40  ;;  %2803 = vmatprep.mubr.bf16.mxu1 %v2908_v41 }
  0x67   : > { %2748 = vmatmul.mubr.bf16.gmra.mrb[32].mxu0 %v2909_v42  ;;  %2804 = vmatmul.mubr.bf16.gmra.mrb[32].mxu1 %v2910_v43 }
  0x68   : > { %2751 = vmatprep.mubr.bf16.mxu0 %v2911_v44  ;;  %2807 = vmatprep.mubr.bf16.mxu1 %v2912_v45 }
  0x6f   : > { %2752 = vmatmul.mubr.bf16.gmra.mrb[36].mxu0 %v2913_v46  ;;  %2808 = vmatmul.mubr.bf16.gmra.mrb[36].mxu1 %v2914_v47 }
  0x70   : > { %2755 = vmatprep.mubr.bf16.mxu0 %v2915_v48  ;;  %2811 = vmatprep.mubr.bf16.mxu1 %v2916_v49 }
  0x77   : > { %2756 = vmatmul.mubr.bf16.gmra.mrb[40].mxu0 %v2917_v50  ;;  %2812 = vmatmul.mubr.bf16.gmra.mrb[40].mxu1 %v2918_v51 }
  0x78   : > { %2759 = vmatprep.mubr.bf16.mxu0 %v2919_v52  ;;  %2815 = vmatprep.mubr.bf16.mxu1 %v2920_v53 }
  0x7f   : > { %2760 = vmatmul.mubr.bf16.gmra.mrb[44].mxu0 %v2921_v54  ;;  %2816 = vmatmul.mubr.bf16.gmra.mrb[44].mxu1 %v2922_v55 }
  0x80   : > { %2763 = vmatprep.mubr.bf16.mxu0 %v2923_v56  ;;  %2819 = vmatprep.mubr.bf16.mxu1 %v2924_v57 }
  0x87   : > { %2764 = vmatmul.mubr.bf16.gmra.mrb[48].mxu0 %v2925_v58  ;;  %2820 = vmatmul.mubr.bf16.gmra.mrb[48].mxu1 %v2926_v59 }
  0x88   : > { %2767 = vmatprep.mubr.bf16.mxu0 %v2927_v60  ;;  %2823 = vmatprep.mubr.bf16.mxu1 %v2928_v61 }
  0x8f   : > { %2768 = vmatmul.mubr.bf16.gmra.mrb[52].mxu0 %v2929_v62  ;;  %2824 = vmatmul.mubr.bf16.gmra.mrb[52].mxu1 %v2930_v63 }
  0xfa   : > { %v2717_v1 = vpop.f32.mrb[0].mxu0  ;;  %v2773_v2 = vpop.f32.mrb[0].mxu1 }
  0xfb   : > { %v788_v3 = vadd.f32 %v2717_v1, %v3086_v0  ;;  %v1012_v4 = vadd.f32 %v2773_v2, %v3086_v0  ;;  %v779_v5 = vpop.f32.mrb[1].mxu0  ;;  %v1003_v6 = vpop.f32.mrb[1].mxu1 }
  0xfc   : > { %v780_v7 = vadd.f32 %v3086_v0, %v779_v5  ;;  %v1004_v8 = vadd.f32 %v3086_v0, %v1003_v6  ;;  %v2718_v9 = vpop.f32.mrb[2].mxu0  ;;  %v2774_v10 = vpop.f32.mrb[2].mxu1 }
  0xfd   : > { %v791_v11 = vadd.f32 %v2718_v9, %v3086_v0  ;;  %v1015_v12 = vadd.f32 %v2774_v10, %v3086_v0  ;;  %v782_v13 = vpop.f32.mrb[3].mxu0  ;;  %v1006_v14 = vpop.f32.mrb[3].mxu1  ;;  %v1228_v17 = vmax.f32 %v788_v3, 0.0  ;;  %v1284_v18 = vmax.f32 %v1012_v4, 0.0 }
  0xfe   : > { %v783_v15 = vadd.f32 %v3086_v0, %v782_v13  ;;  %v1007_v16 = vadd.f32 %v3086_v0, %v1006_v14  ;;  %v1226_v21 = vmax.f32 %v780_v7, 0.0  ;;  %v1282_v22 = vmax.f32 %v1004_v8, 0.0 }
  0xff   : > { %v1229_v19 = vmax.f32 %v791_v11, 0.0  ;;  %v1285_v20 = vmax.f32 %v1015_v12, 0.0 }
 0x100   : > { %v1227_v23 = vmax.f32 %v783_v15, 0.0  ;;  %v1283_v24 = vmax.f32 %v1007_v16, 0.0 }
 0x101   : > { %v2308_v25 = vpack.c.bf16 %v1229_v19, %v1228_v17  ;;  %v2448_v26 = vpack.c.bf16 %v1285_v20, %v1284_v18 }
 0x102   : > { %v2303_v27 = vpack.c.bf16 %v1227_v23, %v1226_v21  ;;  %v2443_v28 = vpack.c.bf16 %v1283_v24, %v1282_v22  ;;  %v2721_v29 = vpop.f32.mrb[4].mxu0  ;;  %v2777_v30 = vpop.f32.mrb[4].mxu1 }
 0x103   : > { %2580 = vst [vmem:[%s3101_s17 + $0x8] sm:$0xff] %v2308_v25   ;;  %2608 = vst [vmem:[%s3101_s17 + $0xe8] sm:$0xff] %v2448_v26   ;;  %v804_v31 = vadd.f32 %v2721_v29, %v3086_v0  ;;  %v1028_v32 = vadd.f32 %v2777_v30, %v3086_v0  ;;  %v795_v33 = vpop.f32.mrb[5].mxu0  ;;  %v1019_v34 = vpop.f32.mrb[5].mxu1 }
 0x104   : > { %2304 = vst [vmem:[%s3101_s17] sm:$0xff] %v2303_v27   ;;  %2607 = vst [vmem:[%s3101_s17 + $0xe0] sm:$0xff] %v2443_v28   ;;  %v796_v35 = vadd.f32 %v3086_v0, %v795_v33  ;;  %v1020_v36 = vadd.f32 %v3086_v0, %v1019_v34  ;;  %v2722_v37 = vpop.f32.mrb[6].mxu0  ;;  %v2778_v38 = vpop.f32.mrb[6].mxu1 }
 0x105   : > { %v807_v39 = vadd.f32 %v2722_v37, %v3086_v0  ;;  %v1031_v40 = vadd.f32 %v2778_v38, %v3086_v0  ;;  %v798_v41 = vpop.f32.mrb[7].mxu0  ;;  %v1022_v42 = vpop.f32.mrb[7].mxu1  ;;  %v1232_v45 = vmax.f32 %v804_v31, 0.0  ;;  %v1288_v46 = vmax.f32 %v1028_v32, 0.0 }
 0x106   : > { %v799_v43 = vadd.f32 %v3086_v0, %v798_v41  ;;  %v1023_v44 = vadd.f32 %v3086_v0, %v1022_v42  ;;  %v1230_v49 = vmax.f32 %v796_v35, 0.0  ;;  %v1286_v50 = vmax.f32 %v1020_v36, 0.0 }
 0x107   : > { %v1233_v47 = vmax.f32 %v807_v39, 0.0  ;;  %v1289_v48 = vmax.f32 %v1031_v40, 0.0 }
 0x108   : > { %v1231_v51 = vmax.f32 %v799_v43, 0.0  ;;  %v1287_v52 = vmax.f32 %v1023_v44, 0.0 }
 0x109   : > { %v2318_v53 = vpack.c.bf16 %v1233_v47, %v1232_v45  ;;  %v2458_v54 = vpack.c.bf16 %v1289_v48, %v1288_v46 }
 0x10a   : > { %v2313_v55 = vpack.c.bf16 %v1231_v51, %v1230_v49  ;;  %v2453_v56 = vpack.c.bf16 %v1287_v52, %v1286_v50  ;;  %v2725_v57 = vpop.f32.mrb[8].mxu0  ;;  %v2781_v58 = vpop.f32.mrb[8].mxu1 }
 0x10b   : > { %2582 = vst [vmem:[%s3101_s17 + $0x18] sm:$0xff] %v2318_v53   ;;  %2610 = vst [vmem:[%s3101_s17 + $0xf8] sm:$0xff] %v2458_v54   ;;  %v820_v59 = vadd.f32 %v2725_v57, %v3086_v0  ;;  %v1044_v60 = vadd.f32 %v2781_v58, %v3086_v0  ;;  %v811_v61 = vpop.f32.mrb[9].mxu0  ;;  %v1035_v62 = vpop.f32.mrb[9].mxu1 }
 0x10c   : > { %2581 = vst [vmem:[%s3101_s17 + $0x10] sm:$0xff] %v2313_v55   ;;  %2609 = vst [vmem:[%s3101_s17 + $0xf0] sm:$0xff] %v2453_v56   ;;  %v812_v63 = vadd.f32 %v3086_v0, %v811_v61  ;;  %v1036_v1 = vadd.f32 %v3086_v0, %v1035_v62  ;;  %v2726_v2 = vpop.f32.mrb[10].mxu0  ;;  %v2782_v3 = vpop.f32.mrb[10].mxu1 }
 0x10d   : > { %v823_v4 = vadd.f32 %v2726_v2, %v3086_v0  ;;  %v1047_v5 = vadd.f32 %v2782_v3, %v3086_v0  ;;  %v814_v6 = vpop.f32.mrb[11].mxu0  ;;  %v1038_v7 = vpop.f32.mrb[11].mxu1  ;;  %v1236_v10 = vmax.f32 %v820_v59, 0.0  ;;  %v1292_v11 = vmax.f32 %v1044_v60, 0.0 }
 0x10e   : > { %v815_v8 = vadd.f32 %v3086_v0, %v814_v6  ;;  %v1039_v9 = vadd.f32 %v3086_v0, %v1038_v7  ;;  %v1234_v14 = vmax.f32 %v812_v63, 0.0  ;;  %v1290_v15 = vmax.f32 %v1036_v1, 0.0 }
 0x10f   : > { %v1237_v12 = vmax.f32 %v823_v4, 0.0  ;;  %v1293_v13 = vmax.f32 %v1047_v5, 0.0 }
 0x110   : > { %v1235_v16 = vmax.f32 %v815_v8, 0.0  ;;  %v1291_v17 = vmax.f32 %v1039_v9, 0.0 }
 0x111   : > { %v2328_v18 = vpack.c.bf16 %v1237_v12, %v1236_v10  ;;  %v2468_v19 = vpack.c.bf16 %v1293_v13, %v1292_v11 }
 0x112   : > { %v2323_v20 = vpack.c.bf16 %v1235_v16, %v1234_v14  ;;  %v2463_v21 = vpack.c.bf16 %v1291_v17, %v1290_v15  ;;  %v2729_v22 = vpop.f32.mrb[12].mxu0  ;;  %v2785_v23 = vpop.f32.mrb[12].mxu1 }
 0x113   : > { %2584 = vst [vmem:[%s3101_s17 + $0x28] sm:$0xff] %v2328_v18   ;;  %2612 = vst [vmem:[%s3101_s17 + $0x108] sm:$0xff] %v2468_v19   ;;  %v836_v24 = vadd.f32 %v2729_v22, %v3086_v0  ;;  %v1060_v25 = vadd.f32 %v2785_v23, %v3086_v0  ;;  %v827_v26 = vpop.f32.mrb[13].mxu0  ;;  %v1051_v27 = vpop.f32.mrb[13].mxu1 }
 0x114   : > { %2583 = vst [vmem:[%s3101_s17 + $0x20] sm:$0xff] %v2323_v20   ;;  %2611 = vst [vmem:[%s3101_s17 + $0x100] sm:$0xff] %v2463_v21   ;;  %v828_v28 = vadd.f32 %v3086_v0, %v827_v26  ;;  %v1052_v29 = vadd.f32 %v3086_v0, %v1051_v27  ;;  %v2730_v30 = vpop.f32.mrb[14].mxu0  ;;  %v2786_v31 = vpop.f32.mrb[14].mxu1 }
 0x115   : > { %v839_v32 = vadd.f32 %v2730_v30, %v3086_v0  ;;  %v1063_v33 = vadd.f32 %v2786_v31, %v3086_v0  ;;  %v830_v34 = vpop.f32.mrb[15].mxu0  ;;  %v1054_v35 = vpop.f32.mrb[15].mxu1  ;;  %v1240_v38 = vmax.f32 %v836_v24, 0.0  ;;  %v1296_v39 = vmax.f32 %v1060_v25, 0.0 }
 0x116   : > { %v831_v36 = vadd.f32 %v3086_v0, %v830_v34  ;;  %v1055_v37 = vadd.f32 %v3086_v0, %v1054_v35  ;;  %v1238_v42 = vmax.f32 %v828_v28, 0.0  ;;  %v1294_v43 = vmax.f32 %v1052_v29, 0.0 }
 0x117   : > { %v1241_v40 = vmax.f32 %v839_v32, 0.0  ;;  %v1297_v41 = vmax.f32 %v1063_v33, 0.0 }
 0x118   : > { %v1239_v44 = vmax.f32 %v831_v36, 0.0  ;;  %v1295_v45 = vmax.f32 %v1055_v37, 0.0 }
 0x119   : > { %v2338_v46 = vpack.c.bf16 %v1241_v40, %v1240_v38  ;;  %v2478_v47 = vpack.c.bf16 %v1297_v41, %v1296_v39 }
 0x11a   : > { %v2333_v48 = vpack.c.bf16 %v1239_v44, %v1238_v42  ;;  %v2473_v49 = vpack.c.bf16 %v1295_v45, %v1294_v43  ;;  %v2733_v50 = vpop.f32.mrb[16].mxu0  ;;  %v2789_v51 = vpop.f32.mrb[16].mxu1 }
 0x11b   : > { %2586 = vst [vmem:[%s3101_s17 + $0x38] sm:$0xff] %v2338_v46   ;;  %2614 = vst [vmem:[%s3101_s17 + $0x118] sm:$0xff] %v2478_v47   ;;  %v852_v52 = vadd.f32 %v2733_v50, %v3086_v0  ;;  %v1076_v53 = vadd.f32 %v2789_v51, %v3086_v0  ;;  %v843_v54 = vpop.f32.mrb[17].mxu0  ;;  %v1067_v55 = vpop.f32.mrb[17].mxu1 }
 0x11c   : > { %2585 = vst [vmem:[%s3101_s17 + $0x30] sm:$0xff] %v2333_v48   ;;  %2613 = vst [vmem:[%s3101_s17 + $0x110] sm:$0xff] %v2473_v49   ;;  %v844_v56 = vadd.f32 %v3086_v0, %v843_v54  ;;  %v1068_v57 = vadd.f32 %v3086_v0, %v1067_v55  ;;  %v2734_v58 = vpop.f32.mrb[18].mxu0  ;;  %v2790_v59 = vpop.f32.mrb[18].mxu1 }
 0x11d   : > { %v855_v60 = vadd.f32 %v2734_v58, %v3086_v0  ;;  %v1079_v61 = vadd.f32 %v2790_v59, %v3086_v0  ;;  %v846_v62 = vpop.f32.mrb[19].mxu0  ;;  %v1070_v63 = vpop.f32.mrb[19].mxu1  ;;  %v1244_v3 = vmax.f32 %v852_v52, 0.0  ;;  %v1300_v4 = vmax.f32 %v1076_v53, 0.0 }
 0x11e   : > { %v847_v1 = vadd.f32 %v3086_v0, %v846_v62  ;;  %v1071_v2 = vadd.f32 %v3086_v0, %v1070_v63  ;;  %v1242_v7 = vmax.f32 %v844_v56, 0.0  ;;  %v1298_v8 = vmax.f32 %v1068_v57, 0.0 }
 0x11f   : > { %v1245_v5 = vmax.f32 %v855_v60, 0.0  ;;  %v1301_v6 = vmax.f32 %v1079_v61, 0.0 }
 0x120   : > { %v1243_v9 = vmax.f32 %v847_v1, 0.0  ;;  %v1299_v10 = vmax.f32 %v1071_v2, 0.0 }
 0x121   : > { %v2348_v11 = vpack.c.bf16 %v1245_v5, %v1244_v3  ;;  %v2488_v12 = vpack.c.bf16 %v1301_v6, %v1300_v4 }
 0x122   : > { %v2343_v13 = vpack.c.bf16 %v1243_v9, %v1242_v7  ;;  %v2483_v14 = vpack.c.bf16 %v1299_v10, %v1298_v8  ;;  %v2737_v15 = vpop.f32.mrb[20].mxu0  ;;  %v2793_v16 = vpop.f32.mrb[20].mxu1 }
 0x123   : > { %2588 = vst [vmem:[%s3101_s17 + $0x48] sm:$0xff] %v2348_v11   ;;  %2616 = vst [vmem:[%s3101_s17 + $0x128] sm:$0xff] %v2488_v12   ;;  %v868_v17 = vadd.f32 %v2737_v15, %v3086_v0  ;;  %v1092_v18 = vadd.f32 %v2793_v16, %v3086_v0  ;;  %v859_v19 = vpop.f32.mrb[21].mxu0  ;;  %v1083_v20 = vpop.f32.mrb[21].mxu1 }
 0x124   : > { %2587 = vst [vmem:[%s3101_s17 + $0x40] sm:$0xff] %v2343_v13   ;;  %2615 = vst [vmem:[%s3101_s17 + $0x120] sm:$0xff] %v2483_v14   ;;  %v860_v21 = vadd.f32 %v3086_v0, %v859_v19  ;;  %v1084_v22 = vadd.f32 %v3086_v0, %v1083_v20  ;;  %v2738_v23 = vpop.f32.mrb[22].mxu0  ;;  %v2794_v24 = vpop.f32.mrb[22].mxu1 }
 0x125   : > { %v871_v25 = vadd.f32 %v2738_v23, %v3086_v0  ;;  %v1095_v26 = vadd.f32 %v2794_v24, %v3086_v0  ;;  %v862_v27 = vpop.f32.mrb[23].mxu0  ;;  %v1086_v28 = vpop.f32.mrb[23].mxu1  ;;  %v1248_v31 = vmax.f32 %v868_v17, 0.0  ;;  %v1304_v32 = vmax.f32 %v1092_v18, 0.0 }
 0x126   : > { %v863_v29 = vadd.f32 %v3086_v0, %v862_v27  ;;  %v1087_v30 = vadd.f32 %v3086_v0, %v1086_v28  ;;  %v1246_v35 = vmax.f32 %v860_v21, 0.0  ;;  %v1302_v36 = vmax.f32 %v1084_v22, 0.0 }
 0x127   : > { %v1249_v33 = vmax.f32 %v871_v25, 0.0  ;;  %v1305_v34 = vmax.f32 %v1095_v26, 0.0 }
 0x128   : > { %v1247_v37 = vmax.f32 %v863_v29, 0.0  ;;  %v1303_v38 = vmax.f32 %v1087_v30, 0.0 }
 0x129   : > { %v2358_v39 = vpack.c.bf16 %v1249_v33, %v1248_v31  ;;  %v2498_v40 = vpack.c.bf16 %v1305_v34, %v1304_v32 }
 0x12a   : > { %v2353_v41 = vpack.c.bf16 %v1247_v37, %v1246_v35  ;;  %v2493_v42 = vpack.c.bf16 %v1303_v38, %v1302_v36  ;;  %v2741_v43 = vpop.f32.mrb[24].mxu0  ;;  %v2797_v44 = vpop.f32.mrb[24].mxu1 }
 0x12b   : > { %2590 = vst [vmem:[%s3101_s17 + $0x58] sm:$0xff] %v2358_v39   ;;  %2618 = vst [vmem:[%s3101_s17 + $0x138] sm:$0xff] %v2498_v40   ;;  %v884_v45 = vadd.f32 %v2741_v43, %v3086_v0  ;;  %v1108_v46 = vadd.f32 %v2797_v44, %v3086_v0  ;;  %v875_v47 = vpop.f32.mrb[25].mxu0  ;;  %v1099_v48 = vpop.f32.mrb[25].mxu1 }
 0x12c   : > { %2589 = vst [vmem:[%s3101_s17 + $0x50] sm:$0xff] %v2353_v41   ;;  %2617 = vst [vmem:[%s3101_s17 + $0x130] sm:$0xff] %v2493_v42   ;;  %v876_v49 = vadd.f32 %v3086_v0, %v875_v47  ;;  %v1100_v50 = vadd.f32 %v3086_v0, %v1099_v48  ;;  %v2742_v51 = vpop.f32.mrb[26].mxu0  ;;  %v2798_v52 = vpop.f32.mrb[26].mxu1 }
 0x12d   : > { %v887_v53 = vadd.f32 %v2742_v51, %v3086_v0  ;;  %v1111_v54 = vadd.f32 %v2798_v52, %v3086_v0  ;;  %v878_v55 = vpop.f32.mrb[27].mxu0  ;;  %v1102_v56 = vpop.f32.mrb[27].mxu1  ;;  %v1252_v59 = vmax.f32 %v884_v45, 0.0  ;;  %v1308_v60 = vmax.f32 %v1108_v46, 0.0 }
 0x12e   : > { %v879_v57 = vadd.f32 %v3086_v0, %v878_v55  ;;  %v1103_v58 = vadd.f32 %v3086_v0, %v1102_v56  ;;  %v1250_v63 = vmax.f32 %v876_v49, 0.0  ;;  %v1306_v1 = vmax.f32 %v1100_v50, 0.0 }
 0x12f   : > { %v1253_v61 = vmax.f32 %v887_v53, 0.0  ;;  %v1309_v62 = vmax.f32 %v1111_v54, 0.0 }
 0x130   : > { %v1251_v2 = vmax.f32 %v879_v57, 0.0  ;;  %v1307_v3 = vmax.f32 %v1103_v58, 0.0 }
 0x131   : > { %v2368_v4 = vpack.c.bf16 %v1253_v61, %v1252_v59  ;;  %v2508_v5 = vpack.c.bf16 %v1309_v62, %v1308_v60 }
 0x132   : > { %v2363_v6 = vpack.c.bf16 %v1251_v2, %v1250_v63  ;;  %v2503_v7 = vpack.c.bf16 %v1307_v3, %v1306_v1  ;;  %v2745_v8 = vpop.f32.mrb[28].mxu0  ;;  %v2801_v9 = vpop.f32.mrb[28].mxu1 }
 0x133   : > { %2592 = vst [vmem:[%s3101_s17 + $0x68] sm:$0xff] %v2368_v4   ;;  %2620 = vst [vmem:[%s3101_s17 + $0x148] sm:$0xff] %v2508_v5   ;;  %v900_v10 = vadd.f32 %v2745_v8, %v3086_v0  ;;  %v1124_v11 = vadd.f32 %v2801_v9, %v3086_v0  ;;  %v891_v12 = vpop.f32.mrb[29].mxu0  ;;  %v1115_v13 = vpop.f32.mrb[29].mxu1 }
 0x134   : > { %2591 = vst [vmem:[%s3101_s17 + $0x60] sm:$0xff] %v2363_v6   ;;  %2619 = vst [vmem:[%s3101_s17 + $0x140] sm:$0xff] %v2503_v7   ;;  %v892_v14 = vadd.f32 %v3086_v0, %v891_v12  ;;  %v1116_v15 = vadd.f32 %v3086_v0, %v1115_v13  ;;  %v2746_v16 = vpop.f32.mrb[30].mxu0  ;;  %v2802_v17 = vpop.f32.mrb[30].mxu1 }
 0x135   : > { %v903_v18 = vadd.f32 %v2746_v16, %v3086_v0  ;;  %v1127_v19 = vadd.f32 %v2802_v17, %v3086_v0  ;;  %v894_v20 = vpop.f32.mrb[31].mxu0  ;;  %v1118_v21 = vpop.f32.mrb[31].mxu1  ;;  %v1256_v24 = vmax.f32 %v900_v10, 0.0  ;;  %v1312_v25 = vmax.f32 %v1124_v11, 0.0 }
 0x136   : > { %v895_v22 = vadd.f32 %v3086_v0, %v894_v20  ;;  %v1119_v23 = vadd.f32 %v3086_v0, %v1118_v21  ;;  %v1254_v28 = vmax.f32 %v892_v14, 0.0  ;;  %v1310_v29 = vmax.f32 %v1116_v15, 0.0 }
 0x137   : > { %v1257_v26 = vmax.f32 %v903_v18, 0.0  ;;  %v1313_v27 = vmax.f32 %v1127_v19, 0.0 }
 0x138   : > { %v1255_v30 = vmax.f32 %v895_v22, 0.0  ;;  %v1311_v31 = vmax.f32 %v1119_v23, 0.0 }
 0x139   : > { %v2378_v32 = vpack.c.bf16 %v1257_v26, %v1256_v24  ;;  %v2518_v33 = vpack.c.bf16 %v1313_v27, %v1312_v25 }
 0x13a   : > { %v2373_v34 = vpack.c.bf16 %v1255_v30, %v1254_v28  ;;  %v2513_v35 = vpack.c.bf16 %v1311_v31, %v1310_v29  ;;  %v2749_v36 = vpop.f32.mrb[32].mxu0  ;;  %v2805_v37 = vpop.f32.mrb[32].mxu1 }
 0x13b   : > { %2594 = vst [vmem:[%s3101_s17 + $0x78] sm:$0xff] %v2378_v32   ;;  %2622 = vst [vmem:[%s3101_s17 + $0x158] sm:$0xff] %v2518_v33   ;;  %v916_v38 = vadd.f32 %v2749_v36, %v3086_v0  ;;  %v1140_v39 = vadd.f32 %v2805_v37, %v3086_v0  ;;  %v907_v40 = vpop.f32.mrb[33].mxu0  ;;  %v1131_v41 = vpop.f32.mrb[33].mxu1 }
 0x13c   : > { %2593 = vst [vmem:[%s3101_s17 + $0x70] sm:$0xff] %v2373_v34   ;;  %2621 = vst [vmem:[%s3101_s17 + $0x150] sm:$0xff] %v2513_v35   ;;  %v908_v42 = vadd.f32 %v3086_v0, %v907_v40  ;;  %v1132_v43 = vadd.f32 %v3086_v0, %v1131_v41  ;;  %v2750_v44 = vpop.f32.mrb[34].mxu0  ;;  %v2806_v45 = vpop.f32.mrb[34].mxu1 }
 0x13d   : > { %v919_v46 = vadd.f32 %v2750_v44, %v3086_v0  ;;  %v1143_v47 = vadd.f32 %v2806_v45, %v3086_v0  ;;  %v910_v48 = vpop.f32.mrb[35].mxu0  ;;  %v1134_v49 = vpop.f32.mrb[35].mxu1  ;;  %v1260_v52 = vmax.f32 %v916_v38, 0.0  ;;  %v1316_v53 = vmax.f32 %v1140_v39, 0.0 }
 0x13e   : > { %v911_v50 = vadd.f32 %v3086_v0, %v910_v48  ;;  %v1135_v51 = vadd.f32 %v3086_v0, %v1134_v49  ;;  %v1258_v56 = vmax.f32 %v908_v42, 0.0  ;;  %v1314_v57 = vmax.f32 %v1132_v43, 0.0 }
 0x13f   : > { %v1261_v54 = vmax.f32 %v919_v46, 0.0  ;;  %v1317_v55 = vmax.f32 %v1143_v47, 0.0 }
 0x140   : > { %v1259_v58 = vmax.f32 %v911_v50, 0.0  ;;  %v1315_v59 = vmax.f32 %v1135_v51, 0.0 }
 0x141   : > { %v2388_v60 = vpack.c.bf16 %v1261_v54, %v1260_v52  ;;  %v2528_v61 = vpack.c.bf16 %v1317_v55, %v1316_v53 }
 0x142   : > { %v2383_v62 = vpack.c.bf16 %v1259_v58, %v1258_v56  ;;  %v2523_v63 = vpack.c.bf16 %v1315_v59, %v1314_v57  ;;  %v2753_v1 = vpop.f32.mrb[36].mxu0  ;;  %v2809_v2 = vpop.f32.mrb[36].mxu1 }
 0x143   : > { %2596 = vst [vmem:[%s3101_s17 + $0x88] sm:$0xff] %v2388_v60   ;;  %2624 = vst [vmem:[%s3101_s17 + $0x168] sm:$0xff] %v2528_v61   ;;  %v932_v3 = vadd.f32 %v2753_v1, %v3086_v0  ;;  %v1156_v4 = vadd.f32 %v2809_v2, %v3086_v0  ;;  %v923_v5 = vpop.f32.mrb[37].mxu0  ;;  %v1147_v6 = vpop.f32.mrb[37].mxu1 }
 0x144   : > { %2595 = vst [vmem:[%s3101_s17 + $0x80] sm:$0xff] %v2383_v62   ;;  %2623 = vst [vmem:[%s3101_s17 + $0x160] sm:$0xff] %v2523_v63   ;;  %v924_v7 = vadd.f32 %v3086_v0, %v923_v5  ;;  %v1148_v8 = vadd.f32 %v3086_v0, %v1147_v6  ;;  %v2754_v9 = vpop.f32.mrb[38].mxu0  ;;  %v2810_v10 = vpop.f32.mrb[38].mxu1 }
 0x145   : > { %v935_v11 = vadd.f32 %v2754_v9, %v3086_v0  ;;  %v1159_v12 = vadd.f32 %v2810_v10, %v3086_v0  ;;  %v926_v13 = vpop.f32.mrb[39].mxu0  ;;  %v1150_v14 = vpop.f32.mrb[39].mxu1  ;;  %v1264_v17 = vmax.f32 %v932_v3, 0.0  ;;  %v1320_v18 = vmax.f32 %v1156_v4, 0.0 }
 0x146   : > { %v927_v15 = vadd.f32 %v3086_v0, %v926_v13  ;;  %v1151_v16 = vadd.f32 %v3086_v0, %v1150_v14  ;;  %v1262_v21 = vmax.f32 %v924_v7, 0.0  ;;  %v1318_v22 = vmax.f32 %v1148_v8, 0.0 }
 0x147   : > { %v1265_v19 = vmax.f32 %v935_v11, 0.0  ;;  %v1321_v20 = vmax.f32 %v1159_v12, 0.0 }
 0x148   : > { %v1263_v23 = vmax.f32 %v927_v15, 0.0  ;;  %v1319_v24 = vmax.f32 %v1151_v16, 0.0 }
 0x149   : > { %v2398_v25 = vpack.c.bf16 %v1265_v19, %v1264_v17  ;;  %v2538_v26 = vpack.c.bf16 %v1321_v20, %v1320_v18 }
 0x14a   : > { %v2393_v27 = vpack.c.bf16 %v1263_v23, %v1262_v21  ;;  %v2533_v28 = vpack.c.bf16 %v1319_v24, %v1318_v22  ;;  %v2757_v29 = vpop.f32.mrb[40].mxu0  ;;  %v2813_v30 = vpop.f32.mrb[40].mxu1 }
 0x14b   : > { %2598 = vst [vmem:[%s3101_s17 + $0x98] sm:$0xff] %v2398_v25   ;;  %2626 = vst [vmem:[%s3101_s17 + $0x178] sm:$0xff] %v2538_v26   ;;  %v948_v31 = vadd.f32 %v2757_v29, %v3086_v0  ;;  %v1172_v32 = vadd.f32 %v2813_v30, %v3086_v0  ;;  %v939_v33 = vpop.f32.mrb[41].mxu0  ;;  %v1163_v34 = vpop.f32.mrb[41].mxu1 }
 0x14c   : > { %2597 = vst [vmem:[%s3101_s17 + $0x90] sm:$0xff] %v2393_v27   ;;  %2625 = vst [vmem:[%s3101_s17 + $0x170] sm:$0xff] %v2533_v28   ;;  %v940_v35 = vadd.f32 %v3086_v0, %v939_v33  ;;  %v1164_v36 = vadd.f32 %v3086_v0, %v1163_v34  ;;  %v2758_v37 = vpop.f32.mrb[42].mxu0  ;;  %v2814_v38 = vpop.f32.mrb[42].mxu1 }
 0x14d   : > { %v951_v39 = vadd.f32 %v2758_v37, %v3086_v0  ;;  %v1175_v40 = vadd.f32 %v2814_v38, %v3086_v0  ;;  %v942_v41 = vpop.f32.mrb[43].mxu0  ;;  %v1166_v42 = vpop.f32.mrb[43].mxu1  ;;  %v1268_v45 = vmax.f32 %v948_v31, 0.0  ;;  %v1324_v46 = vmax.f32 %v1172_v32, 0.0 }
 0x14e   : > { %v943_v43 = vadd.f32 %v3086_v0, %v942_v41  ;;  %v1167_v44 = vadd.f32 %v3086_v0, %v1166_v42  ;;  %v1266_v49 = vmax.f32 %v940_v35, 0.0  ;;  %v1322_v50 = vmax.f32 %v1164_v36, 0.0 }
 0x14f   : > { %v1269_v47 = vmax.f32 %v951_v39, 0.0  ;;  %v1325_v48 = vmax.f32 %v1175_v40, 0.0 }
 0x150   : > { %v1267_v51 = vmax.f32 %v943_v43, 0.0  ;;  %v1323_v52 = vmax.f32 %v1167_v44, 0.0 }
 0x151   : > { %v2408_v53 = vpack.c.bf16 %v1269_v47, %v1268_v45  ;;  %v2548_v54 = vpack.c.bf16 %v1325_v48, %v1324_v46 }
 0x152   : > { %v2403_v55 = vpack.c.bf16 %v1267_v51, %v1266_v49  ;;  %v2543_v56 = vpack.c.bf16 %v1323_v52, %v1322_v50  ;;  %v2761_v57 = vpop.f32.mrb[44].mxu0  ;;  %v2817_v58 = vpop.f32.mrb[44].mxu1 }
 0x153   : > { %2600 = vst [vmem:[%s3101_s17 + $0xa8] sm:$0xff] %v2408_v53   ;;  %2628 = vst [vmem:[%s3101_s17 + $0x188] sm:$0xff] %v2548_v54   ;;  %v964_v59 = vadd.f32 %v2761_v57, %v3086_v0  ;;  %v1188_v60 = vadd.f32 %v2817_v58, %v3086_v0  ;;  %v955_v61 = vpop.f32.mrb[45].mxu0  ;;  %v1179_v62 = vpop.f32.mrb[45].mxu1 }
 0x154   : > { %2599 = vst [vmem:[%s3101_s17 + $0xa0] sm:$0xff] %v2403_v55   ;;  %2627 = vst [vmem:[%s3101_s17 + $0x180] sm:$0xff] %v2543_v56   ;;  %v956_v63 = vadd.f32 %v3086_v0, %v955_v61  ;;  %v1180_v1 = vadd.f32 %v3086_v0, %v1179_v62  ;;  %v2762_v2 = vpop.f32.mrb[46].mxu0  ;;  %v2818_v3 = vpop.f32.mrb[46].mxu1 }
 0x155   : > { %v967_v4 = vadd.f32 %v2762_v2, %v3086_v0  ;;  %v1191_v5 = vadd.f32 %v2818_v3, %v3086_v0  ;;  %v958_v6 = vpop.f32.mrb[47].mxu0  ;;  %v1182_v7 = vpop.f32.mrb[47].mxu1  ;;  %v1272_v10 = vmax.f32 %v964_v59, 0.0  ;;  %v1328_v11 = vmax.f32 %v1188_v60, 0.0 }
 0x156   : > { %v959_v8 = vadd.f32 %v3086_v0, %v958_v6  ;;  %v1183_v9 = vadd.f32 %v3086_v0, %v1182_v7  ;;  %v1270_v14 = vmax.f32 %v956_v63, 0.0  ;;  %v1326_v15 = vmax.f32 %v1180_v1, 0.0 }
 0x157   : > { %v1273_v12 = vmax.f32 %v967_v4, 0.0  ;;  %v1329_v13 = vmax.f32 %v1191_v5, 0.0 }
 0x158   : > { %v1271_v16 = vmax.f32 %v959_v8, 0.0  ;;  %v1327_v17 = vmax.f32 %v1183_v9, 0.0 }
 0x159   : > { %v2418_v18 = vpack.c.bf16 %v1273_v12, %v1272_v10  ;;  %v2558_v19 = vpack.c.bf16 %v1329_v13, %v1328_v11 }
 0x15a   : > { %v2413_v20 = vpack.c.bf16 %v1271_v16, %v1270_v14  ;;  %v2553_v21 = vpack.c.bf16 %v1327_v17, %v1326_v15  ;;  %v2765_v22 = vpop.f32.mrb[48].mxu0  ;;  %v2821_v23 = vpop.f32.mrb[48].mxu1 }
 0x15b   : > { %2602 = vst [vmem:[%s3101_s17 + $0xb8] sm:$0xff] %v2418_v18   ;;  %2630 = vst [vmem:[%s3101_s17 + $0x198] sm:$0xff] %v2558_v19   ;;  %v980_v24 = vadd.f32 %v2765_v22, %v3086_v0  ;;  %v1204_v25 = vadd.f32 %v2821_v23, %v3086_v0  ;;  %v971_v26 = vpop.f32.mrb[49].mxu0  ;;  %v1195_v27 = vpop.f32.mrb[49].mxu1 }
 0x15c   : > { %2601 = vst [vmem:[%s3101_s17 + $0xb0] sm:$0xff] %v2413_v20   ;;  %2629 = vst [vmem:[%s3101_s17 + $0x190] sm:$0xff] %v2553_v21   ;;  %v972_v28 = vadd.f32 %v3086_v0, %v971_v26  ;;  %v1196_v29 = vadd.f32 %v3086_v0, %v1195_v27  ;;  %v2766_v30 = vpop.f32.mrb[50].mxu0  ;;  %v2822_v31 = vpop.f32.mrb[50].mxu1 }
 0x15d   : > { %v983_v32 = vadd.f32 %v2766_v30, %v3086_v0  ;;  %v1207_v33 = vadd.f32 %v2822_v31, %v3086_v0  ;;  %v974_v34 = vpop.f32.mrb[51].mxu0  ;;  %v1198_v35 = vpop.f32.mrb[51].mxu1  ;;  %v1276_v38 = vmax.f32 %v980_v24, 0.0  ;;  %v1332_v39 = vmax.f32 %v1204_v25, 0.0 }
 0x15e   : > { %v975_v36 = vadd.f32 %v3086_v0, %v974_v34  ;;  %v1199_v37 = vadd.f32 %v3086_v0, %v1198_v35  ;;  %v1274_v42 = vmax.f32 %v972_v28, 0.0  ;;  %v1330_v43 = vmax.f32 %v1196_v29, 0.0 }
 0x15f   : > { %v1277_v40 = vmax.f32 %v983_v32, 0.0  ;;  %v1333_v41 = vmax.f32 %v1207_v33, 0.0 }
 0x160   : > { %v1275_v44 = vmax.f32 %v975_v36, 0.0  ;;  %v1331_v45 = vmax.f32 %v1199_v37, 0.0 }
 0x161   : > { %v2428_v46 = vpack.c.bf16 %v1277_v40, %v1276_v38  ;;  %v2568_v47 = vpack.c.bf16 %v1333_v41, %v1332_v39 }
 0x162   : > { %v2423_v48 = vpack.c.bf16 %v1275_v44, %v1274_v42  ;;  %v2563_v49 = vpack.c.bf16 %v1331_v45, %v1330_v43  ;;  %v2769_v50 = vpop.f32.mrb[52].mxu0  ;;  %v2825_v51 = vpop.f32.mrb[52].mxu1 }
 0x163   : > { %2604 = vst [vmem:[%s3101_s17 + $0xc8] sm:$0xff] %v2428_v46   ;;  %2632 = vst [vmem:[%s3101_s17 + $0x1a8] sm:$0xff] %v2568_v47   ;;  %v996_v52 = vadd.f32 %v2769_v50, %v3086_v0  ;;  %v1220_v53 = vadd.f32 %v2825_v51, %v3086_v0  ;;  %v987_v54 = vpop.f32.mrb[53].mxu0  ;;  %v1211_v55 = vpop.f32.mrb[53].mxu1 }
 0x164   : > { %2603 = vst [vmem:[%s3101_s17 + $0xc0] sm:$0xff] %v2423_v48   ;;  %2631 = vst [vmem:[%s3101_s17 + $0x1a0] sm:$0xff] %v2563_v49   ;;  %v988_v56 = vadd.f32 %v3086_v0, %v987_v54  ;;  %v1212_v57 = vadd.f32 %v3086_v0, %v1211_v55  ;;  %v2770_v58 = vpop.f32.mrb[54].mxu0  ;;  %v2826_v59 = vpop.f32.mrb[54].mxu1 }
 0x165   : > { %v999_v60 = vadd.f32 %v2770_v58, %v3086_v0  ;;  %v1223_v61 = vadd.f32 %v2826_v59, %v3086_v0  ;;  %v990_v62 = vpop.f32.mrb[55].mxu0  ;;  %v1214_v63 = vpop.f32.mrb[55].mxu1  ;;  %v1280_v3 = vmax.f32 %v996_v52, 0.0  ;;  %v1336_v4 = vmax.f32 %v1220_v53, 0.0 }
 0x166   : > { %v991_v1 = vadd.f32 %v3086_v0, %v990_v62  ;;  %v1215_v2 = vadd.f32 %v3086_v0, %v1214_v63  ;;  %v1278_v7 = vmax.f32 %v988_v56, 0.0  ;;  %v1334_v8 = vmax.f32 %v1212_v57, 0.0 }
 0x167   : > { %v1281_v5 = vmax.f32 %v999_v60, 0.0  ;;  %v1337_v6 = vmax.f32 %v1223_v61, 0.0 }
 0x168   : > { %v1279_v9 = vmax.f32 %v991_v1, 0.0  ;;  %v1335_v10 = vmax.f32 %v1215_v2, 0.0 }
 0x169   : > { %v2438_v11 = vpack.c.bf16 %v1281_v5, %v1280_v3  ;;  %v2578_v12 = vpack.c.bf16 %v1337_v6, %v1336_v4 }
 0x16a   : > { %v2433_v13 = vpack.c.bf16 %v1279_v9, %v1278_v7  ;;  %v2573_v14 = vpack.c.bf16 %v1335_v10, %v1334_v8 }
 0x16b   : > { %2606 = vst [vmem:[%s3101_s17 + $0xd8] sm:$0xff] %v2438_v11   ;;  %2634 = vst [vmem:[%s3101_s17 + $0x1b8] sm:$0xff] %v2578_v12  }
 0x16c   : > { %2605 = vst [vmem:[%s3101_s17 + $0xd0] sm:$0xff] %v2433_v13   ;;  %2633 = vst [vmem:[%s3101_s17 + $0x1b0] sm:$0xff] %v2573_v14  }
 0x16d PF: > { %s13_s14 = sadd.s32 1, %s2953_s14   ;;  %s3276_s12 = smov %s2949_s13 }
 0x16e   : > { %p10_p5 = scmp.ge.s32.totalorder %s13_s14, 9   ;;  %s3277_s13 = smov %s3279_s15 }
 0x170   :  { %12 = sbr.rel (!%p10_p5) target bundleno = 2 (0x2), region = 68 }

// kernel: _lambda_.5
= control target key start
LH: loop header
LB: loop body
LE: loop exit
PB: predicated region body
PF: predicated region fallthrough
CT: control target
= control target key end

     0   :  { %s4381_s12 = smov 0   ;;  %s4383_s13 = smov 0   ;;  %s5049_s0 = inlined_call_operand.vmem [shape: bf16[1568,384], index: 0, kind: input, shape index: {}]   ;;  %s5050_s1 = inlined_call_operand.vmem [shape: bf16[384,128], index: 1, kind: input, shape index: {}]   ;;  %s5051_s2 = inlined_call_operand.vmem [shape: f32[1,128], index: 2, kind: input, shape index: {}]   ;;  %s5052_s3 = inlined_call_operand.vmem [shape: bf16[1568,128], index: 3, kind: output, shape index: {}]  }
   0x1   :  { %s4385_s14 = smov 0  }
   0x2 LB: > { %s25_s15 = sadd.s32 1, %s4352_s13  ;;  %p2954_p0 = scmp.ge.s32.totalorder %s4356_s14, 1  ;;  %s4356_s14 = sphi %s4385_s14, %s13_s14   ;;  %s4352_s13 = sphi %s4383_s13, %s5054_s13   ;;  %s4348_s12 = sphi %s4381_s12, %s5053_s12  }
   0x3   : > { %p27_p1 = scmp.ge.s32.totalorder %s25_s15, 2  ;;  %p170_p2 = scmp.lt.s32.totalorder %s4356_s14, 3 }
   0x5   : > { %s5056_s15 = smov (%p27_p1, %s25_s15), 0  ;;  %p171_p3 = pnand %p2954_p0, %p170_p2 }
   0x6   : > { %v4113_v0 = vld [vmem:[%s5050_s1] sm:$0xff] (!%p171_p3)   ;;  %v4358_v1 = vmov (!%p171_p3), 0   ;;  %v4114_v2 = vld [vmem:[%s5050_s1 + $0x8] sm:$0xff] (!%p171_p3)   ;;  %v4359_v3 = vmov (!%p171_p3), 0.0   ;;  %vm4360_vm0 = vmmov (!%p171_p3), 0   ;;  %v4115_v4 = vld [vmem:[%s5050_s1 + $0x10] sm:$0xff] (!%p171_p3)  }
   0x7   : > { %174 = sbr.rel (%p171_p3) target bundleno = 678 (0x2a6), region = 32  ;;  %1408 = vmatprep.subr.bf16.mxu1 (!%p171_p3), %v4358_v1  ;;  %3677 = vmatprep.subr.bf16.mxu0 (!%p171_p3), %v4359_v3  ;;  %v4121_v5 = vld [vmem:[%s5050_s1 + $0x80] sm:$0xff] (!%p171_p3)   ;;  %v4116_v6 = vld [vmem:[%s5050_s1 + $0x18] sm:$0xff] (!%p171_p3)   ;;  %v4123_v7 = vld [vmem:[%s5050_s1 + $0x88] sm:$0xff] (!%p171_p3)  }
   0x8   : > { %1409 = vmatpush1.bf16.msra.mxu1 (!%p171_p3), %v4113_v0  ;;  %3693 = vmatprep.mubr.msk.bf16.mxu0 (!%p171_p3), %vm4360_vm0, %v4359_v3  ;;  %s205_s22 = smul.u32 (!%p171_p3), 98, %s4348_s12  ;;  %v4117_v8 = vld [vmem:[%s5050_s1 + $0x20] sm:$0xff] (!%p171_p3)   ;;  %v4125_v9 = vld [vmem:[%s5050_s1 + $0x90] sm:$0xff] (!%p171_p3)   ;;  %v4118_v10 = vld [vmem:[%s5050_s1 + $0x28] sm:$0xff] (!%p171_p3)  }
   0x9   : > { %1410 = vmatprep.subr.bf16.mxu1 (!%p171_p3), %v4358_v1  ;;  %3678 = vmatpush3.bf16.msra.mxu0 (!%p171_p3), %v4121_v5  ;;  %v4127_v11 = vld [vmem:[%s5050_s1 + $0x98] sm:$0xff] (!%p171_p3)   ;;  %v4119_v12 = vld [vmem:[%s5050_s1 + $0x30] sm:$0xff] (!%p171_p3)   ;;  %v4129_v13 = vld [vmem:[%s5050_s1 + $0xa0] sm:$0xff] (!%p171_p3)  }
   0xa   : > { %p206_p4 = scmp.lt.s32.totalorder (!%p171_p3), %s205_s22, 195  ;;  %3679 = vmatprep.subr.bf16.mxu0 (!%p171_p3), %v4359_v3  ;;  %v4120_v14 = vld [vmem:[%s5050_s1 + $0x38] sm:$0xff] (!%p171_p3)   ;;  %v4131_v16 = vld [vmem:[%s5050_s1 + $0xa8] sm:$0xff] (!%p171_p3)   ;;  %v4122_v17 = vld [vmem:[%s5050_s1 + $0x40] sm:$0xff] (!%p171_p3)  }
   0xb   : > { %v4133_v18 = vld [vmem:[%s5050_s1 + $0xb0] sm:$0xff] (!%p171_p3)   ;;  %v4124_v19 = vld [vmem:[%s5050_s1 + $0x48] sm:$0xff] (!%p171_p3)   ;;  %v4135_v20 = vld [vmem:[%s5050_s1 + $0xb8] sm:$0xff] (!%p171_p3)  }
   0xc   : > { %1411 = vmatpush1.bf16.msra.mxu1 (!%p171_p3), %v4114_v2  ;;  %v4126_v22 = vld [vmem:[%s5050_s1 + $0x50] sm:$0xff] (!%p171_p3)   ;;  %v4128_v23 = vld [vmem:[%s5050_s1 + $0x58] sm:$0xff] (!%p171_p3)   ;;  %v4130_v25 = vld [vmem:[%s5050_s1 + $0x60] sm:$0xff] (!%p171_p3)  }
   0xd   : > { %1412 = vmatprep.subr.bf16.mxu1 (!%p171_p3), %v4358_v1  ;;  %3680 = vmatpush3.bf16.msra.mxu0 (!%p171_p3), %v4123_v7  ;;  %v4132_v26 = vld [vmem:[%s5050_s1 + $0x68] sm:$0xff] (!%p171_p3)   ;;  %v4134_v28 = vld [vmem:[%s5050_s1 + $0x70] sm:$0xff] (!%p171_p3)   ;;  %v4136_v29 = vld [vmem:[%s5050_s1 + $0x78] sm:$0xff] (!%p171_p3)  }
   0xe   : > { %s5058_s22 = smov (!%p206_p4, %s205_s22), 195  ;;  %3681 = vmatprep.subr.bf16.mxu0 %v4359_v3 }
   0xf   : > { %s4085_s10 = smul.u32 12, %s5058_s22  ;;  %s2956_s26 = sshll.u32 %s5058_s22, 2 }
  0x10   : > { %1413 = vmatpush1.bf16.msra.mxu1 %v4115_v4  ;;  %s4677_s29 = scalar_lea.vmem %s5052_s3, %s2956_s26 }
  0x11   : > { %1414 = vmatprep.subr.bf16.mxu1 %v4358_v1  ;;  %3682 = vmatpush3.bf16.msra.mxu0 %v4125_v9  ;;  %s4456_s20 = scalar_lea.vmem %s5049_s0, %s4085_s10 }
  0x12   : > { %3683 = vmatprep.subr.bf16.mxu0 %v4359_v3  ;;  %v4139_v15 = vld [vmem:[%s4456_s20 + $0x4] ss:$12 sps:$4 sm:$0xff]   ;;  %v4140_v21 = vld [vmem:[%s4456_s20 + $0x8] ss:$12 sps:$4 sm:$0xff]   ;;  %v4143_v24 = vld [vmem:[%s4456_s20 + $0x20] ss:$12 sps:$4 sm:$0xff]  }
  0x13   : > { %1440 = vmatprep.mubr.bf16.mxu1 %v4139_v15  ;;  %v4147_v27 = vld [vmem:[%s4456_s20 + $0x38] ss:$12 sps:$4 sm:$0xff]   ;;  %v4137_v30 = vld [vmem:[%s4456_s20] ss:$12 sps:$4 sm:$0xff]   ;;  %v4151_v31 = vld [vmem:[%s4456_s20 + $0x50] ss:$12 sps:$4 sm:$0xff]  }
  0x14   : > { %1415 = vmatpush1.bf16.msra.mxu1 %v4116_v6  ;;  %v4141_v32 = vld [vmem:[%s4456_s20 + $0x1c] ss:$12 sps:$4 sm:$0xff]   ;;  %v4144_v33 = vld [vmem:[%s4456_s20 + $0x18] ss:$12 sps:$4 sm:$0xff]   ;;  %v4145_v35 = vld [vmem:[%s4456_s20 + $0x34] ss:$12 sps:$4 sm:$0xff]  }
  0x15   : > { %1416 = vmatprep.subr.bf16.mxu1 %v4358_v1  ;;  %3684 = vmatpush3.bf16.msra.mxu0 %v4127_v11  ;;  %v4155_v34 = vld [vmem:[%s4456_s20 + $0x68] ss:$12 sps:$4 sm:$0xff]   ;;  %v4148_v36 = vld [vmem:[%s4456_s20 + $0x30] ss:$12 sps:$4 sm:$0xff]   ;;  %v4159_v37 = vld [vmem:[%s4456_s20 + $0x80] ss:$12 sps:$4 sm:$0xff]  }
  0x16   : > { %3685 = vmatprep.subr.bf16.mxu0 %v4359_v3  ;;  %v4149_v38 = vld [vmem:[%s4456_s20 + $0x4c] ss:$12 sps:$4 sm:$0xff]   ;;  %v4152_v39 = vld [vmem:[%s4456_s20 + $0x48] ss:$12 sps:$4 sm:$0xff]   ;;  %v4153_v41 = vld [vmem:[%s4456_s20 + $0x64] ss:$12 sps:$4 sm:$0xff]  }
  0x17   : > { %v4163_v40 = vld [vmem:[%s4456_s20 + $0x98] ss:$12 sps:$4 sm:$0xff]   ;;  %v4156_v42 = vld [vmem:[%s4456_s20 + $0x60] ss:$12 sps:$4 sm:$0xff]   ;;  %v4167_v43 = vld [vmem:[%s4456_s20 + $0xb0] ss:$12 sps:$4 sm:$0xff]  }
  0x18   : > { %1417 = vmatpush1.bf16.msra.mxu1 %v4117_v8  ;;  %v4157_v44 = vld [vmem:[%s4456_s20 + $0x7c] ss:$12 sps:$4 sm:$0xff]   ;;  %v4160_v45 = vld [vmem:[%s4456_s20 + $0x78] ss:$12 sps:$4 sm:$0xff]   ;;  %v4161_v47 = vld [vmem:[%s4456_s20 + $0x94] ss:$12 sps:$4 sm:$0xff]  }
  0x19   : > { %1418 = vmatprep.subr.bf16.mxu1 %v4358_v1  ;;  %3686 = vmatpush3.bf16.msra.mxu0 %v4129_v13  ;;  %v4171_v46 = vld [vmem:[%s4456_s20 + $0xc8] ss:$12 sps:$4 sm:$0xff]   ;;  %v4164_v48 = vld [vmem:[%s4456_s20 + $0x90] ss:$12 sps:$4 sm:$0xff]   ;;  %v4175_v49 = vld [vmem:[%s4456_s20 + $0xe0] ss:$12 sps:$4 sm:$0xff]  }
  0x1a   : > { %3687 = vmatprep.subr.bf16.mxu0 %v4359_v3  ;;  %v4165_v50 = vld [vmem:[%s4456_s20 + $0xac] ss:$12 sps:$4 sm:$0xff]   ;;  %v4168_v51 = vld [vmem:[%s4456_s20 + $0xa8] ss:$12 sps:$4 sm:$0xff]   ;;  %v4169_v53 = vld [vmem:[%s4456_s20 + $0xc4] ss:$12 sps:$4 sm:$0xff]  }
  0x1b   : > { %v4179_v52 = vld [vmem:[%s4456_s20 + $0xf8] ss:$12 sps:$4 sm:$0xff]   ;;  %v4172_v54 = vld [vmem:[%s4456_s20 + $0xc0] ss:$12 sps:$4 sm:$0xff]   ;;  %v4183_v55 = vld [vmem:[%s4456_s20 + $0x110] ss:$12 sps:$4 sm:$0xff]  }
  0x1c   : > { %1419 = vmatpush1.bf16.msra.mxu1 %v4118_v10  ;;  %v4173_v56 = vld [vmem:[%s4456_s20 + $0xdc] ss:$12 sps:$4 sm:$0xff]   ;;  %v4176_v57 = vld [vmem:[%s4456_s20 + $0xd8] ss:$12 sps:$4 sm:$0xff]   ;;  %v4177_v59 = vld [vmem:[%s4456_s20 + $0xf4] ss:$12 sps:$4 sm:$0xff]  }
  0x1d   : > { %1420 = vmatprep.subr.bf16.mxu1 %v4358_v1  ;;  %3688 = vmatpush3.bf16.msra.mxu0 %v4131_v16  ;;  %v4187_v58 = vld [vmem:[%s4456_s20 + $0x128] ss:$12 sps:$4 sm:$0xff]   ;;  %v4180_v60 = vld [vmem:[%s4456_s20 + $0xf0] ss:$12 sps:$4 sm:$0xff]   ;;  %v4191_v61 = vld [vmem:[%s4456_s20 + $0x140] ss:$12 sps:$4 sm:$0xff]  }
  0x1e   : > { %3689 = vmatprep.subr.bf16.mxu0 %v4359_v3  ;;  %v4181_v62 = vld [vmem:[%s4456_s20 + $0x10c] ss:$12 sps:$4 sm:$0xff]   ;;  %v4184_v63 = vld [vmem:[%s4456_s20 + $0x108] ss:$12 sps:$4 sm:$0xff]   ;;  %v4199_v4 = vld [vmem:[%s4456_s20 + $0x170] ss:$12 sps:$4 sm:$0xff]  }
  0x1f   : > { %v4195_v0 = vld [vmem:[%s4456_s20 + $0x158] ss:$12 sps:$4 sm:$0xff]   ;;  %v4188_v2 = vld [vmem:[%s4456_s20 + $0x120] ss:$12 sps:$4 sm:$0xff]   ;;  %v4189_v5 = vld [vmem:[%s4456_s20 + $0x13c] ss:$12 sps:$4 sm:$0xff]  }
  0x20   : > { %1421 = vmatpush1.bf16.msra.mxu1 %v4119_v12  ;;  %v4192_v6 = vld [vmem:[%s4456_s20 + $0x138] ss:$12 sps:$4 sm:$0xff]   ;;  %v4203_v7 = vld [vmem:[%s4456_s20 + $0x188] ss:$12 sps:$4 sm:$0xff]   ;;  %v4196_v9 = vld [vmem:[%s4456_s20 + $0x150] ss:$12 sps:$4 sm:$0xff]  }
  0x21   : > { %1422 = vmatprep.subr.bf16.mxu1 %v4358_v1  ;;  %3690 = vmatpush3.bf16.msra.mxu0 %v4133_v18  ;;  %v4193_v8 = vld [vmem:[%s4456_s20 + $0x154] ss:$12 sps:$4 sm:$0xff]   ;;  %v4197_v11 = vld [vmem:[%s4456_s20 + $0x16c] ss:$12 sps:$4 sm:$0xff]   ;;  %v4215_v16 = vld [vmem:[%s4456_s20 + $0x1d0] ss:$12 sps:$4 sm:$0xff]  }
  0x22   : > { %3691 = vmatprep.subr.bf16.mxu0 %v4359_v3  ;;  %v4207_v10 = vld [vmem:[%s4456_s20 + $0x1a0] ss:$12 sps:$4 sm:$0xff]   ;;  %v4200_v12 = vld [vmem:[%s4456_s20 + $0x168] ss:$12 sps:$4 sm:$0xff]   ;;  %v4211_v13 = vld [vmem:[%s4456_s20 + $0x1b8] ss:$12 sps:$4 sm:$0xff]  }
  0x23   : > { %v4204_v15 = vld [vmem:[%s4456_s20 + $0x180] ss:$12 sps:$4 sm:$0xff]   ;;  %v4208_v18 = vld [vmem:[%s4456_s20 + $0x198] ss:$12 sps:$4 sm:$0xff]  }
  0x24   : > { %1423 = vmatpush1.bf16.msra.mxu1 %v4120_v14  ;;  %v4201_v14 = vld [vmem:[%s4456_s20 + $0x184] ss:$12 sps:$4 sm:$0xff]  }
  0x25   : > { %1424 = vmatprep.subr.bf16.mxu1 %v4358_v1  ;;  %3692 = vmatpush3.bf16.msra.mxu0 %v4135_v20  ;;  %v4209_v20 = vld [vmem:[%s4456_s20 + $0x1b4] ss:$12 sps:$4 sm:$0xff]  }
  0x28   : > { %1425 = vmatpush1.bf16.msra.mxu1 %v4122_v17  ;;  %3694 = vmatmul.mubr.bf16.vlgmr.msra.gmra.mrb[0].mxu0 %v4140_v21  ;;  %v4205_v17 = vld [vmem:[%s4456_s20 + $0x19c] ss:$12 sps:$4 sm:$0xff]  }
  0x29   : > { %1426 = vmatprep.subr.bf16.mxu1 %v4358_v1  ;;  %3697 = vmatprep.mubr.msk.bf16.mxu0 %vm4360_vm0, %v4359_v3  ;;  %v4212_v21 = vld [vmem:[%s4456_s20 + $0x1b0] ss:$12 sps:$4 sm:$0xff]  }
  0x2c   : > { %1427 = vmatpush1.bf16.msra.mxu1 %v4124_v19  ;;  %v4219_v19 = vld [vmem:[%s4456_s20 + $0x1e8] ss:$12 sps:$4 sm:$0xff]  }
  0x2d   : > { %1428 = vmatprep.subr.bf16.mxu1 %v4358_v1 }
  0x30   : > { %1429 = vmatpush1.bf16.msra.mxu1 %v4126_v22  ;;  %3698 = vmatmul.mubr.bf16.gmra.mrb[4].mxu0 %v4143_v24  ;;  %v4223_v22 = vld [vmem:[%s4456_s20 + $0x200] ss:$12 sps:$4 sm:$0xff]   ;;  %v4216_v24 = vld [vmem:[%s4456_s20 + $0x1c8] ss:$12 sps:$4 sm:$0xff]  }
  0x31   : > { %1430 = vmatprep.subr.bf16.mxu1 %v4358_v1  ;;  %3701 = vmatprep.mubr.msk.bf16.mxu0 %vm4360_vm0, %v4359_v3 }
  0x34   : > { %1431 = vmatpush1.bf16.msra.mxu1 %v4128_v23  ;;  %v4213_v23 = vld [vmem:[%s4456_s20 + $0x1cc] ss:$12 sps:$4 sm:$0xff]  }
  0x35   : > { %1432 = vmatprep.subr.bf16.mxu1 %v4358_v1 }
  0x38   : > { %1433 = vmatpush1.bf16.msra.mxu1 %v4130_v25  ;;  %3702 = vmatmul.mubr.bf16.gmra.mrb[8].mxu0 %v4147_v27  ;;  %v4227_v25 = vld [vmem:[%s4456_s20 + $0x218] ss:$12 sps:$4 sm:$0xff]   ;;  %v4220_v27 = vld [vmem:[%s4456_s20 + $0x1e0] ss:$12 sps:$4 sm:$0xff]  }
  0x39   : > { %1434 = vmatprep.subr.bf16.mxu1 %v4358_v1  ;;  %3705 = vmatprep.mubr.msk.bf16.mxu0 %vm4360_vm0, %v4359_v3 }
  0x3c   : > { %1435 = vmatpush1.bf16.msra.mxu1 %v4132_v26  ;;  %v4217_v26 = vld [vmem:[%s4456_s20 + $0x1e4] ss:$12 sps:$4 sm:$0xff]  }
  0x3d   : > { %1436 = vmatprep.subr.bf16.mxu1 %v4358_v1 }
  0x40   : > { %1437 = vmatpush1.bf16.msra.mxu1 %v4134_v28  ;;  %3706 = vmatmul.mubr.bf16.gmra.mrb[12].mxu0 %v4151_v31  ;;  %v4231_v28 = vld [vmem:[%s4456_s20 + $0x230] ss:$12 sps:$4 sm:$0xff]   ;;  %v4235_v31 = vld [vmem:[%s4456_s20 + $0x248] ss:$12 sps:$4 sm:$0xff]  }
  0x41   : > { %1438 = vmatprep.subr.bf16.mxu1 %v4358_v1  ;;  %3709 = vmatprep.mubr.msk.bf16.mxu0 %vm4360_vm0, %v4359_v3  ;;  %v4185_v1 = vld [vmem:[%s4456_s20 + $0x124] ss:$12 sps:$4 sm:$0xff]  }
  0x44   : > { %1439 = vmatpush1.bf16.msra.mxu1 %v4136_v29  ;;  %v4221_v29 = vld [vmem:[%s4456_s20 + $0x1fc] ss:$12 sps:$4 sm:$0xff]  }
  0x47   : > { %1441 = vmatmul.mubr.bf16.vlgmr.msra.gmra.mrb[0].mxu1 %v4137_v30  ;;  %v4224_v30 = vld [vmem:[%s4456_s20 + $0x1f8] ss:$12 sps:$4 sm:$0xff]  }
  0x48   : > { %1448 = vmatprep.mubr.bf16.mxu1 %v4141_v32  ;;  %3710 = vmatmul.mubr.bf16.gmra.mrb[16].mxu0 %v4155_v34  ;;  %v4225_v32 = vld [vmem:[%s4456_s20 + $0x214] ss:$12 sps:$4 sm:$0xff]  }
  0x49   : > { %3713 = vmatprep.mubr.msk.bf16.mxu0 %vm4360_vm0, %v4359_v3  ;;  %v4239_v34 = vld [vmem:[%s4456_s20 + $0x260] ss:$12 sps:$4 sm:$0xff]  }
  0x4f   : > { %1449 = vmatmul.mubr.bf16.gmra.mrb[4].mxu1 %v4144_v33  ;;  %v4228_v33 = vld [vmem:[%s4456_s20 + $0x210] ss:$12 sps:$4 sm:$0xff]  }
  0x50   : > { %1456 = vmatprep.mubr.bf16.mxu1 %v4145_v35  ;;  %3714 = vmatmul.mubr.bf16.gmra.mrb[20].mxu0 %v4159_v37  ;;  %v4229_v35 = vld [vmem:[%s4456_s20 + $0x22c] ss:$12 sps:$4 sm:$0xff]  }
  0x51   : > { %3717 = vmatprep.mubr.msk.bf16.mxu0 %vm4360_vm0, %v4359_v3  ;;  %v4243_v37 = vld [vmem:[%s4456_s20 + $0x278] ss:$12 sps:$4 sm:$0xff]  }
  0x57   : > { %1457 = vmatmul.mubr.bf16.gmra.mrb[8].mxu1 %v4148_v36  ;;  %v4232_v36 = vld [vmem:[%s4456_s20 + $0x228] ss:$12 sps:$4 sm:$0xff]  }
  0x58   : > { %1464 = vmatprep.mubr.bf16.mxu1 %v4149_v38  ;;  %3718 = vmatmul.mubr.bf16.gmra.mrb[24].mxu0 %v4163_v40  ;;  %v4233_v38 = vld [vmem:[%s4456_s20 + $0x244] ss:$12 sps:$4 sm:$0xff]   ;;  %v4236_v40 = vld [vmem:[%s4456_s20 + $0x240] ss:$12 sps:$4 sm:$0xff]  }
  0x59   : > { %3721 = vmatprep.mubr.msk.bf16.mxu0 %vm4360_vm0, %v4359_v3 }
  0x5f   : > { %1465 = vmatmul.mubr.bf16.gmra.mrb[12].mxu1 %v4152_v39 }
  0x60   : > { %1472 = vmatprep.mubr.bf16.mxu1 %v4153_v41  ;;  %3722 = vmatmul.mubr.bf16.gmra.mrb[28].mxu0 %v4167_v43  ;;  %v4237_v43 = vld [vmem:[%s4456_s20 + $0x25c] ss:$12 sps:$4 sm:$0xff]  }
  0x61   : > { %3725 = vmatprep.mubr.msk.bf16.mxu0 %vm4360_vm0, %v4359_v3 }
  0x67   : > { %1473 = vmatmul.mubr.bf16.gmra.mrb[16].mxu1 %v4156_v42  ;;  %v4247_v42 = vld [vmem:[%s4456_s20 + $0x290] ss:$12 sps:$4 sm:$0xff]  }
  0x68   : > { %1480 = vmatprep.mubr.bf16.mxu1 %v4157_v44  ;;  %3726 = vmatmul.mubr.bf16.gmra.mrb[32].mxu0 %v4171_v46 }
  0x69   : > { %3729 = vmatprep.mubr.msk.bf16.mxu0 %vm4360_vm0, %v4359_v3 }
  0x6f   : > { %1481 = vmatmul.mubr.bf16.gmra.mrb[20].mxu1 %v4160_v45 }
  0x70   : > { %1488 = vmatprep.mubr.bf16.mxu1 %v4161_v47  ;;  %3730 = vmatmul.mubr.bf16.gmra.mrb[36].mxu0 %v4175_v49  ;;  %v4240_v47 = vld [vmem:[%s4456_s20 + $0x258] ss:$12 sps:$4 sm:$0xff]   ;;  %v4251_v49 = vld [vmem:[%s4456_s20 + $0x2a8] ss:$12 sps:$4 sm:$0xff]  }
  0x71   : > { %3733 = vmatprep.mubr.msk.bf16.mxu0 %vm4360_vm0, %v4359_v3 }
  0x77   : > { %1489 = vmatmul.mubr.bf16.gmra.mrb[24].mxu1 %v4164_v48 }
  0x78   : > { %1496 = vmatprep.mubr.bf16.mxu1 %v4165_v50  ;;  %3734 = vmatmul.mubr.bf16.gmra.mrb[40].mxu0 %v4179_v52  ;;  %v4241_v50 = vld [vmem:[%s4456_s20 + $0x274] ss:$12 sps:$4 sm:$0xff]  }
  0x79   : > { %3737 = vmatprep.mubr.msk.bf16.mxu0 %vm4360_vm0, %v4359_v3 }
  0x7f   : > { %1497 = vmatmul.mubr.bf16.gmra.mrb[28].mxu1 %v4168_v51 }
  0x80   : > { %1504 = vmatprep.mubr.bf16.mxu1 %v4169_v53  ;;  %3738 = vmatmul.mubr.bf16.gmra.mrb[44].mxu0 %v4183_v55 }
  0x81   : > { %3741 = vmatprep.mubr.msk.bf16.mxu0 %vm4360_vm0, %v4359_v3 }
  0x87   : > { %1505 = vmatmul.mubr.bf16.gmra.mrb[32].mxu1 %v4172_v54  ;;  %v4244_v54 = vld [vmem:[%s4456_s20 + $0x270] ss:$12 sps:$4 sm:$0xff]  }
  0x88   : > { %1512 = vmatprep.mubr.bf16.mxu1 %v4173_v56  ;;  %3742 = vmatmul.mubr.bf16.gmra.mrb[48].mxu0 %v4187_v58  ;;  %v4255_v56 = vld [vmem:[%s4456_s20 + $0x2c0] ss:$12 sps:$4 sm:$0xff]  }
  0x89   : > { %3745 = vmatprep.mubr.msk.bf16.mxu0 %vm4360_vm0, %v4359_v3 }
  0x8f   : > { %1513 = vmatmul.mubr.bf16.gmra.mrb[36].mxu1 %v4176_v57  ;;  %v4245_v57 = vld [vmem:[%s4456_s20 + $0x28c] ss:$12 sps:$4 sm:$0xff]  }
  0x90   : > { %1520 = vmatprep.mubr.bf16.mxu1 %v4177_v59  ;;  %3746 = vmatmul.mubr.bf16.gmra.mrb[52].mxu0 %v4191_v61 }
  0x91   : > { %3749 = vmatprep.mubr.msk.bf16.mxu0 %vm4360_vm0, %v4359_v3 }
  0x97   : > { %1521 = vmatmul.mubr.bf16.gmra.mrb[40].mxu1 %v4180_v60  ;;  %v4658_v60 = vld [vmem:[%s5051_s2] ss:$0 sm:$0xff] }
  0x98   : > { %1528 = vmatprep.mubr.bf16.mxu1 %v4181_v62  ;;  %3750 = vmatmul.mubr.bf16.gmra.mrb[56].mxu0 %v4195_v0 }
  0x99   : > { %3753 = vmatprep.mubr.msk.bf16.mxu0 %vm4360_vm0, %v4359_v3 }
  0x9f   : > { %1529 = vmatmul.mubr.bf16.gmra.mrb[44].mxu1 %v4184_v63 }
  0xa0   : > { %1536 = vmatprep.mubr.bf16.mxu1 %v4185_v1  ;;  %3754 = vmatmul.mubr.bf16.gmra.mrb[60].mxu0 %v4199_v4  ;;  %v4248_v1 = vld [vmem:[%s4456_s20 + $0x288] ss:$12 sps:$4 sm:$0xff]   ;;  %v4259_v4 = vld [vmem:[%s4456_s20 + $0x2d8] ss:$12 sps:$4 sm:$0xff]  }
  0xa1   : > { %3757 = vmatprep.mubr.msk.bf16.mxu0 %vm4360_vm0, %v4359_v3 }
  0xa7   : > { %1537 = vmatmul.mubr.bf16.gmra.mrb[48].mxu1 %v4188_v2 }
  0xa8   : > { %1544 = vmatprep.mubr.bf16.mxu1 %v4189_v5  ;;  %3758 = vmatmul.mubr.bf16.gmra.mrb[64].mxu0 %v4203_v7 }
  0xa9   : > { %3761 = vmatprep.mubr.msk.bf16.mxu0 %vm4360_vm0, %v4359_v3 }
  0xaf   : > { %1545 = vmatmul.mubr.bf16.gmra.mrb[52].mxu1 %v4192_v6  ;;  %v4249_v6 = vld [vmem:[%s4456_s20 + $0x2a4] ss:$12 sps:$4 sm:$0xff]  }
  0xb0   : > { %1552 = vmatprep.mubr.bf16.mxu1 %v4193_v8  ;;  %3762 = vmatmul.mubr.bf16.gmra.mrb[68].mxu0 %v4207_v10 }
  0xb1   : > { %3765 = vmatprep.mubr.msk.bf16.mxu0 %vm4360_vm0, %v4359_v3 }
  0xb7   : > { %1553 = vmatmul.mubr.bf16.gmra.mrb[56].mxu1 %v4196_v9 }
  0xb8   : > { %1560 = vmatprep.mubr.bf16.mxu1 %v4197_v11  ;;  %3766 = vmatmul.mubr.bf16.gmra.mrb[72].mxu0 %v4211_v13 }
  0xb9   : > { %3769 = vmatprep.mubr.msk.bf16.mxu0 %vm4360_vm0, %v4359_v3 }
  0xbf   : > { %1561 = vmatmul.mubr.bf16.gmra.mrb[60].mxu1 %v4200_v12 }
  0xc0   : > { %1568 = vmatprep.mubr.bf16.mxu1 %v4201_v14  ;;  %3770 = vmatmul.mubr.bf16.gmra.mrb[76].mxu0 %v4215_v16 }
  0xc1   : > { %3773 = vmatprep.mubr.msk.bf16.mxu0 %vm4360_vm0, %v4359_v3 }
  0xc7   : > { %1569 = vmatmul.mubr.bf16.gmra.mrb[64].mxu1 %v4204_v15 }
  0xc8   : > { %1576 = vmatprep.mubr.bf16.mxu1 %v4205_v17  ;;  %3774 = vmatmul.mubr.bf16.gmra.mrb[80].mxu0 %v4219_v19 }
  0xc9   : > { %3777 = vmatprep.mubr.msk.bf16.mxu0 %vm4360_vm0, %v4359_v3 }
  0xcf   : > { %1577 = vmatmul.mubr.bf16.gmra.mrb[68].mxu1 %v4208_v18 }
  0xd0   : > { %1584 = vmatprep.mubr.bf16.mxu1 %v4209_v20  ;;  %3778 = vmatmul.mubr.bf16.gmra.mrb[84].mxu0 %v4223_v22  ;;  %v4252_v20 = vld [vmem:[%s4456_s20 + $0x2a0] ss:$12 sps:$4 sm:$0xff]   ;;  %v4263_v22 = vld [vmem:[%s4456_s20 + $0x2f0] ss:$12 sps:$4 sm:$0xff]  }
  0xd1   : > { %3781 = vmatprep.mubr.msk.bf16.mxu0 %vm4360_vm0, %v4359_v3 }
  0xd7   : > { %1585 = vmatmul.mubr.bf16.gmra.mrb[72].mxu1 %v4212_v21 }
  0xd8   : > { %1592 = vmatprep.mubr.bf16.mxu1 %v4213_v23  ;;  %3782 = vmatmul.mubr.bf16.gmra.mrb[88].mxu0 %v4227_v25 }
  0xd9   : > { %3785 = vmatprep.mubr.msk.bf16.mxu0 %vm4360_vm0, %v4359_v3 }
  0xdf   : > { %1593 = vmatmul.mubr.bf16.gmra.mrb[76].mxu1 %v4216_v24  ;;  %v4253_v24 = vld [vmem:[%s4456_s20 + $0x2bc] ss:$12 sps:$4 sm:$0xff]  }
  0xe0   : > { %1600 = vmatprep.mubr.bf16.mxu1 %v4217_v26  ;;  %3786 = vmatmul.mubr.bf16.gmra.mrb[92].mxu0 %v4231_v28 }
  0xe1   : > { %3789 = vmatprep.mubr.msk.bf16.mxu0 %vm4360_vm0, %v4359_v3 }
  0xe7   : > { %1601 = vmatmul.mubr.bf16.gmra.mrb[80].mxu1 %v4220_v27 }
  0xe8   : > { %1608 = vmatprep.mubr.bf16.mxu1 %v4221_v29  ;;  %3790 = vmatmul.mubr.bf16.gmra.mrb[96].mxu0 %v4235_v31 }
  0xe9   : > { %3793 = vmatprep.mubr.msk.bf16.mxu0 %vm4360_vm0, %v4359_v3 }
  0xef   : > { %1609 = vmatmul.mubr.bf16.gmra.mrb[84].mxu1 %v4224_v30 }
  0xf0   : > { %1616 = vmatprep.mubr.bf16.mxu1 %v4225_v32  ;;  %3794 = vmatmul.mubr.bf16.gmra.mrb[100].mxu0 %v4239_v34 }
  0xf1   : > { %3797 = vmatprep.mubr.msk.bf16.mxu0 %vm4360_vm0, %v4359_v3 }
  0xf7   : > { %1617 = vmatmul.mubr.bf16.gmra.mrb[88].mxu1 %v4228_v33 }
  0xf8   : > { %1624 = vmatprep.mubr.bf16.mxu1 %v4229_v35  ;;  %3798 = vmatmul.mubr.bf16.gmra.mrb[104].mxu0 %v4243_v37 }
  0xf9   : > { %3801 = vmatprep.mubr.msk.bf16.mxu0 %vm4360_vm0, %v4359_v3 }
  0xfb   : > { %v1867_v39 = vpop.f32.mrb[0].mxu0 }
  0xfc   : > { %v3695_v41 = vpop.f32.mrb[1].mxu0 }
  0xfd   : > { %v1870_v44 = vpop.f32.mrb[2].mxu0 }
  0xfe   : > { %v3696_v45 = vpop.f32.mrb[3].mxu0 }
  0xff   : > { %1625 = vmatmul.mubr.bf16.gmra.mrb[92].mxu1 %v4232_v36 }
 0x100   : > { %1632 = vmatprep.mubr.bf16.mxu1 %v4233_v38  ;;  %3802 = vmatmul.mubr.bf16.gmra.mrb[108].mxu0 %v4247_v42  ;;  %v4256_v38 = vld [vmem:[%s4456_s20 + $0x2b8] ss:$12 sps:$4 sm:$0xff]   ;;  %v4257_v42 = vld [vmem:[%s4456_s20 + $0x2d4] ss:$12 sps:$4 sm:$0xff]  }
 0x101   : > { %3805 = vmatprep.mubr.msk.bf16.mxu0 %vm4360_vm0, %v4359_v3 }
 0x103   : > { %v1875_v46 = vpop.f32.mrb[4].mxu0 }
 0x104   : > { %v3699_v48 = vpop.f32.mrb[5].mxu0 }
 0x105   : > { %v1878_v51 = vpop.f32.mrb[6].mxu0 }
 0x106   : > { %v3700_v52 = vpop.f32.mrb[7].mxu0 }
 0x107   : > { %1633 = vmatmul.mubr.bf16.gmra.mrb[96].mxu1 %v4236_v40  ;;  %v4267_v40 = vld [vmem:[%s4456_s20 + $0x308] ss:$12 sps:$4 sm:$0xff]  }
 0x108   : > { %1640 = vmatprep.mubr.bf16.mxu1 %v4237_v43  ;;  %3806 = vmatmul.mubr.bf16.gmra.mrb[112].mxu0 %v4251_v49 }
 0x109   : > { %3809 = vmatprep.mubr.msk.bf16.mxu0 %vm4360_vm0, %v4359_v3 }
 0x10b   : > { %v4648_v53 = vpop.f32.mrb[8].mxu0 }
 0x10c   : > { %v3703_v55 = vpop.f32.mrb[9].mxu0 }
 0x10d   : > { %v4653_v58 = vpop.f32.mrb[10].mxu0 }
 0x10e   : > { %v3704_v59 = vpop.f32.mrb[11].mxu0 }
 0x10f   : > { %1641 = vmatmul.mubr.bf16.gmra.mrb[100].mxu1 %v4240_v47 }
 0x110   : > { %1648 = vmatprep.mubr.bf16.mxu1 %v4241_v50  ;;  %3810 = vmatmul.mubr.bf16.gmra.mrb[116].mxu0 %v4255_v56  ;;  %v4260_v56 = vld [vmem:[%s4456_s20 + $0x2d0] ss:$12 sps:$4 sm:$0xff]  }
 0x111   : > { %3813 = vmatprep.mubr.msk.bf16.mxu0 %vm4360_vm0, %v4359_v3 }
 0x113   : > { %v4662_v62 = vpop.f32.mrb[12].mxu0 }
 0x114   : > { %v3707_v2 = vpop.f32.mrb[13].mxu0 }
 0x115   : > { %v4668_v7 = vpop.f32.mrb[14].mxu0 }
 0x116   : > { %v3708_v11 = vpop.f32.mrb[15].mxu0 }
 0x117   : > { %1649 = vmatmul.mubr.bf16.gmra.mrb[104].mxu1 %v4244_v54 }
 0x118   : > { %1656 = vmatprep.mubr.bf16.mxu1 %v4245_v57  ;;  %3814 = vmatmul.mubr.bf16.gmra.mrb[120].mxu0 %v4259_v4 }
 0x119   : > { %3817 = vmatprep.mubr.msk.bf16.mxu0 %vm4360_vm0, %v4359_v3 }
 0x11a   : > { %v1442_v61 = vpop.f32.mrb[0].mxu1 }
 0x11b   : > { %v1443_v63 = vadd.f32 %v4658_v60, %v1442_v61  ;;  %v1444_v0 = vpop.f32.mrb[1].mxu1  ;;  %v4679_v16 = vpop.f32.mrb[16].mxu0  ;;  %v4261_v61 = vld [vmem:[%s4456_s20 + $0x2ec] ss:$12 sps:$4 sm:$0xff]  }
 0x11c   : > { %v1445_v5 = vpop.f32.mrb[2].mxu1  ;;  %v3711_v21 = vpop.f32.mrb[17].mxu0 }
 0x11d   : > { %v1868_v8 = vadd.f32 %v1867_v39, %v1443_v63  ;;  %v1446_v9 = vadd.f32 %v4658_v60, %v1445_v5  ;;  %v1447_v10 = vpop.f32.mrb[3].mxu1  ;;  %v4685_v25 = vpop.f32.mrb[18].mxu0 }
 0x11e   : > { %v3712_v29 = vpop.f32.mrb[19].mxu0 }
 0x11f   : > { %v1871_v12 = vadd.f32 %v1870_v44, %v1446_v9  ;;  %1657 = vmatmul.mubr.bf16.gmra.mrb[108].mxu1 %v4248_v1  ;;  %v2258_v13 = vmax.f32 %v1868_v8, 0.0 }
 0x120   : > { %1664 = vmatprep.mubr.bf16.mxu1 %v4249_v6  ;;  %3818 = vmatmul.mubr.bf16.gmra.mrb[124].mxu0 %v4263_v22 }
 0x121   : > { %v2259_v14 = vmax.f32 %v1871_v12, 0.0  ;;  %3821 = vmatprep.mubr.msk.bf16.mxu0 %vm4360_vm0, %v4359_v3 }
 0x122   : > { %v1450_v15 = vpop.f32.mrb[4].mxu1 }
 0x123   : > { %v3330_v17 = vpack.c.bf16 %v2259_v14, %v2258_v13  ;;  %v1451_v18 = vadd.f32 %v4658_v60, %v1450_v15  ;;  %v1452_v19 = vpop.f32.mrb[5].mxu1  ;;  %v4691_v34 = vpop.f32.mrb[20].mxu0  ;;  %v4264_v13 = vld [vmem:[%s4456_s20 + $0x2e8] ss:$12 sps:$4 sm:$0xff]  }
 0x124   : > { %v1453_v23 = vpop.f32.mrb[6].mxu1  ;;  %v3715_v39 = vpop.f32.mrb[21].mxu0 }
 0x125   : > { %3331 = vst [vmem:[%s4677_s29] sm:$0xff] %v3330_v17   ;;  %v1876_v26 = vadd.f32 %v1875_v46, %v1451_v18  ;;  %v1454_v27 = vadd.f32 %v4658_v60, %v1453_v23  ;;  %v1455_v28 = vpop.f32.mrb[7].mxu1  ;;  %v4697_v43 = vpop.f32.mrb[22].mxu0  ;;  %v4265_v17 = vld [vmem:[%s4456_s20 + $0x304] ss:$12 sps:$4 sm:$0xff]  }
 0x126   : > { %v3716_v47 = vpop.f32.mrb[23].mxu0 }
 0x127   : > { %v1879_v30 = vadd.f32 %v1878_v51, %v1454_v27  ;;  %1665 = vmatmul.mubr.bf16.gmra.mrb[112].mxu1 %v4252_v20  ;;  %v2260_v31 = vmax.f32 %v1876_v26, 0.0 }
 0x128   : > { %1672 = vmatprep.mubr.bf16.mxu1 %v4253_v24  ;;  %3822 = vmatmul.mubr.bf16.gmra.mrb[128].mxu0 %v4267_v40 }
 0x129   : > { %v2261_v32 = vmax.f32 %v1879_v30, 0.0  ;;  %3825 = vmatprep.mubr.msk.bf16.mxu0 %vm4360_vm0, %v4359_v3 }
 0x12a   : > { %v1458_v33 = vpop.f32.mrb[8].mxu1 }
 0x12b   : > { %v3335_v35 = vpack.c.bf16 %v2261_v32, %v2260_v31  ;;  %v1459_v36 = vadd.f32 %v4658_v60, %v1458_v33  ;;  %v1460_v37 = vpop.f32.mrb[9].mxu1  ;;  %v4705_v52 = vpop.f32.mrb[24].mxu0  ;;  %v4268_v31 = vld [vmem:[%s4456_s20 + $0x300] ss:$12 sps:$4 sm:$0xff]  }
 0x12c   : > { %v1461_v41 = vpop.f32.mrb[10].mxu1  ;;  %v3719_v57 = vpop.f32.mrb[25].mxu0 }
 0x12d   : > { %3572 = vst [vmem:[%s4677_s29 + $0x8] sm:$0xff] %v3335_v35   ;;  %v1884_v44 = vadd.f32 %v4648_v53, %v1459_v36  ;;  %v1462_v45 = vadd.f32 %v4658_v60, %v1461_v41  ;;  %v1463_v46 = vpop.f32.mrb[11].mxu1  ;;  %v4711_v63 = vpop.f32.mrb[26].mxu0  ;;  %v4269_v35 = vld [vmem:[%s4456_s20 + $0x31c] ss:$12 sps:$4 sm:$0xff]  }
 0x12e   : > { %v3720_v4 = vpop.f32.mrb[27].mxu0 }
 0x12f   : > { %v1887_v48 = vadd.f32 %v4653_v58, %v1462_v45  ;;  %1673 = vmatmul.mubr.bf16.gmra.mrb[116].mxu1 %v4256_v38  ;;  %v2262_v49 = vmax.f32 %v1884_v44, 0.0  ;;  %v4271_v58 = vld [vmem:[%s4456_s20 + $0x320] ss:$12 sps:$4 sm:$0xff]  }
 0x130   : > { %1680 = vmatprep.mubr.bf16.mxu1 %v4257_v42  ;;  %3826 = vmatmul.mubr.bf16.gmra.mrb[132].mxu0 %v4271_v58 }
 0x131   : > { %v2263_v50 = vmax.f32 %v1887_v48, 0.0  ;;  %3829 = vmatprep.mubr.msk.bf16.mxu0 %vm4360_vm0, %v4359_v3 }
 0x132   : > { %v1466_v51 = vpop.f32.mrb[12].mxu1 }
 0x133   : > { %v3340_v53 = vpack.c.bf16 %v2263_v50, %v2262_v49  ;;  %v1467_v54 = vadd.f32 %v4658_v60, %v1466_v51  ;;  %v1468_v55 = vpop.f32.mrb[13].mxu1  ;;  %v4272_v49 = vld [vmem:[%s4456_s20 + $0x318] ss:$12 sps:$4 sm:$0xff]  }
 0x134   : > { %v1469_v59 = vpop.f32.mrb[14].mxu1 }
 0x135   : > { %3573 = vst [vmem:[%s4677_s29 + $0x10] sm:$0xff] %v3340_v53   ;;  %v1892_v0 = vadd.f32 %v4662_v62, %v1467_v54  ;;  %v1470_v1 = vadd.f32 %v4658_v60, %v1469_v59  ;;  %v1471_v2 = vpop.f32.mrb[15].mxu1  ;;  %v4719_v62 = vpop.f32.mrb[28].mxu0  ;;  %v4273_v53 = vld [vmem:[%s4456_s20 + $0x334] ss:$12 sps:$4 sm:$0xff]  }
 0x136   : > { %v3723_v14 = vpop.f32.mrb[29].mxu0 }
 0x137   : > { %v1895_v5 = vadd.f32 %v4668_v7, %v1470_v1  ;;  %1681 = vmatmul.mubr.bf16.gmra.mrb[120].mxu1 %v4260_v56  ;;  %v2264_v6 = vmax.f32 %v1892_v0, 0.0  ;;  %v4275_v7 = vld [vmem:[%s4456_s20 + $0x338] ss:$12 sps:$4 sm:$0xff]   ;;  %v4725_v18 = vpop.f32.mrb[30].mxu0 }
 0x138   : > { %1688 = vmatprep.mubr.bf16.mxu1 %v4261_v61  ;;  %v3724_v22 = vpop.f32.mrb[31].mxu0  ;;  %3830 = vmatmul.mubr.bf16.gmra.mrb[136].mxu0 %v4275_v7 }
 0x139   : > { %v2265_v8 = vmax.f32 %v1895_v5, 0.0  ;;  %3833 = vmatprep.mubr.msk.bf16.mxu0 %vm4360_vm0, %v4359_v3 }
 0x13a   : > { %v1474_v9 = vpop.f32.mrb[16].mxu1 }
 0x13b   : > { %v3345_v10 = vpack.c.bf16 %v2265_v8, %v2264_v6  ;;  %v1475_v11 = vadd.f32 %v4658_v60, %v1474_v9  ;;  %v1476_v12 = vpop.f32.mrb[17].mxu1  ;;  %v4276_v6 = vld [vmem:[%s4456_s20 + $0x330] ss:$12 sps:$4 sm:$0xff]  }
 0x13c   : > { %v1477_v15 = vpop.f32.mrb[18].mxu1 }
 0x13d   : > { %3574 = vst [vmem:[%s4677_s29 + $0x18] sm:$0xff] %v3345_v10   ;;  %v1900_v19 = vadd.f32 %v4679_v16, %v1475_v11  ;;  %v1478_v20 = vadd.f32 %v4658_v60, %v1477_v15  ;;  %v1479_v21 = vpop.f32.mrb[19].mxu1  ;;  %v4733_v16 = vpop.f32.mrb[32].mxu0  ;;  %v4277_v10 = vld [vmem:[%s4456_s20 + $0x34c] ss:$12 sps:$4 sm:$0xff]  }
 0x13e   : > { %v3727_v32 = vpop.f32.mrb[33].mxu0 }
 0x13f   : > { %v1903_v23 = vadd.f32 %v4685_v25, %v1478_v20  ;;  %1689 = vmatmul.mubr.bf16.gmra.mrb[124].mxu1 %v4264_v13  ;;  %v2266_v24 = vmax.f32 %v1900_v19, 0.0  ;;  %v4279_v25 = vld [vmem:[%s4456_s20 + $0x350] ss:$12 sps:$4 sm:$0xff]   ;;  %v4739_v36 = vpop.f32.mrb[34].mxu0 }
 0x140   : > { %1696 = vmatprep.mubr.bf16.mxu1 %v4265_v17  ;;  %v3728_v40 = vpop.f32.mrb[35].mxu0  ;;  %3834 = vmatmul.mubr.bf16.gmra.mrb[140].mxu0 %v4279_v25 }
 0x141   : > { %v2267_v26 = vmax.f32 %v1903_v23, 0.0  ;;  %3837 = vmatprep.mubr.msk.bf16.mxu0 %vm4360_vm0, %v4359_v3 }
 0x142   : > { %v1482_v27 = vpop.f32.mrb[20].mxu1 }
 0x143   : > { %v3350_v28 = vpack.c.bf16 %v2267_v26, %v2266_v24  ;;  %v1483_v29 = vadd.f32 %v4658_v60, %v1482_v27  ;;  %v1484_v30 = vpop.f32.mrb[21].mxu1  ;;  %v4280_v24 = vld [vmem:[%s4456_s20 + $0x348] ss:$12 sps:$4 sm:$0xff]  }
 0x144   : > { %v1485_v33 = vpop.f32.mrb[22].mxu1 }
 0x145   : > { %3575 = vst [vmem:[%s4677_s29 + $0x20] sm:$0xff] %v3350_v28   ;;  %v1908_v37 = vadd.f32 %v4691_v34, %v1483_v29  ;;  %v1486_v38 = vadd.f32 %v4658_v60, %v1485_v33  ;;  %v1487_v39 = vpop.f32.mrb[23].mxu1  ;;  %v4747_v34 = vpop.f32.mrb[36].mxu0  ;;  %v4281_v28 = vld [vmem:[%s4456_s20 + $0x364] ss:$12 sps:$4 sm:$0xff]  }
 0x146   : > { %v3731_v50 = vpop.f32.mrb[37].mxu0 }
 0x147   : > { %v1911_v41 = vadd.f32 %v4697_v43, %v1486_v38  ;;  %1697 = vmatmul.mubr.bf16.gmra.mrb[128].mxu1 %v4268_v31  ;;  %v2268_v42 = vmax.f32 %v1908_v37, 0.0  ;;  %v4283_v43 = vld [vmem:[%s4456_s20 + $0x368] ss:$12 sps:$4 sm:$0xff]   ;;  %v4753_v54 = vpop.f32.mrb[38].mxu0 }
 0x148   : > { %1704 = vmatprep.mubr.bf16.mxu1 %v4269_v35  ;;  %v3732_v58 = vpop.f32.mrb[39].mxu0  ;;  %3838 = vmatmul.mubr.bf16.gmra.mrb[144].mxu0 %v4283_v43 }
 0x149   : > { %v2269_v44 = vmax.f32 %v1911_v41, 0.0  ;;  %3841 = vmatprep.mubr.msk.bf16.mxu0 %vm4360_vm0, %v4359_v3 }
 0x14a   : > { %v1490_v45 = vpop.f32.mrb[24].mxu1 }
 0x14b   : > { %v3355_v46 = vpack.c.bf16 %v2269_v44, %v2268_v42  ;;  %v1491_v47 = vadd.f32 %v4658_v60, %v1490_v45  ;;  %v1492_v48 = vpop.f32.mrb[25].mxu1  ;;  %v4284_v42 = vld [vmem:[%s4456_s20 + $0x360] ss:$12 sps:$4 sm:$0xff]  }
 0x14c   : > { %v1493_v51 = vpop.f32.mrb[26].mxu1 }
 0x14d   : > { %3576 = vst [vmem:[%s4677_s29 + $0x28] sm:$0xff] %v3355_v46   ;;  %v1916_v55 = vadd.f32 %v4705_v52, %v1491_v47  ;;  %v1494_v56 = vadd.f32 %v4658_v60, %v1493_v51  ;;  %v1495_v57 = vpop.f32.mrb[27].mxu1  ;;  %v4761_v52 = vpop.f32.mrb[40].mxu0  ;;  %v4285_v46 = vld [vmem:[%s4456_s20 + $0x37c] ss:$12 sps:$4 sm:$0xff]  }
 0x14e   : > { %v3735_v8 = vpop.f32.mrb[41].mxu0 }
 0x14f   : > { %v1919_v59 = vadd.f32 %v4711_v63, %v1494_v56  ;;  %1705 = vmatmul.mubr.bf16.gmra.mrb[132].mxu1 %v4272_v49  ;;  %v2270_v61 = vmax.f32 %v1916_v55, 0.0  ;;  %v4287_v63 = vld [vmem:[%s4456_s20 + $0x380] ss:$12 sps:$4 sm:$0xff]   ;;  %v4767_v11 = vpop.f32.mrb[42].mxu0 }
 0x150   : > { %1712 = vmatprep.mubr.bf16.mxu1 %v4273_v53  ;;  %v3736_v7 = vpop.f32.mrb[43].mxu0  ;;  %3842 = vmatmul.mubr.bf16.gmra.mrb[148].mxu0 %v4287_v63 }
 0x151   : > { %v2271_v0 = vmax.f32 %v1919_v59, 0.0  ;;  %3845 = vmatprep.mubr.msk.bf16.mxu0 %vm4360_vm0, %v4359_v3 }
 0x152   : > { %v1498_v1 = vpop.f32.mrb[28].mxu1 }
 0x153   : > { %v3360_v2 = vpack.c.bf16 %v2271_v0, %v2270_v61  ;;  %v1499_v4 = vadd.f32 %v4658_v60, %v1498_v1  ;;  %v1500_v5 = vpop.f32.mrb[29].mxu1  ;;  %v4288_v61 = vld [vmem:[%s4456_s20 + $0x378] ss:$12 sps:$4 sm:$0xff]  }
 0x154   : > { %v1501_v9 = vpop.f32.mrb[30].mxu1 }
 0x155   : > { %3577 = vst [vmem:[%s4677_s29 + $0x30] sm:$0xff] %v3360_v2   ;;  %v1924_v12 = vadd.f32 %v4719_v62, %v1499_v4  ;;  %v1502_v13 = vadd.f32 %v4658_v60, %v1501_v9  ;;  %v1503_v14 = vpop.f32.mrb[31].mxu1  ;;  %v4775_v62 = vpop.f32.mrb[44].mxu0  ;;  %v4289_v2 = vld [vmem:[%s4456_s20 + $0x394] ss:$12 sps:$4 sm:$0xff]  }
 0x156   : > { %v3739_v26 = vpop.f32.mrb[45].mxu0 }
 0x157   : > { %v1927_v15 = vadd.f32 %v4725_v18, %v1502_v13  ;;  %1713 = vmatmul.mubr.bf16.gmra.mrb[136].mxu1 %v4276_v6  ;;  %v2272_v17 = vmax.f32 %v1924_v12, 0.0  ;;  %v4291_v18 = vld [vmem:[%s4456_s20 + $0x398] ss:$12 sps:$4 sm:$0xff]   ;;  %v4781_v29 = vpop.f32.mrb[46].mxu0 }
 0x158   : > { %1720 = vmatprep.mubr.bf16.mxu1 %v4277_v10  ;;  %v3740_v25 = vpop.f32.mrb[47].mxu0  ;;  %3846 = vmatmul.mubr.bf16.gmra.mrb[152].mxu0 %v4291_v18 }
 0x159   : > { %v2273_v19 = vmax.f32 %v1927_v15, 0.0  ;;  %3849 = vmatprep.mubr.msk.bf16.mxu0 %vm4360_vm0, %v4359_v3 }
 0x15a   : > { %v1506_v20 = vpop.f32.mrb[32].mxu1 }
 0x15b   : > { %v3365_v21 = vpack.c.bf16 %v2273_v19, %v2272_v17  ;;  %v1507_v22 = vadd.f32 %v4658_v60, %v1506_v20  ;;  %v1508_v23 = vpop.f32.mrb[33].mxu1  ;;  %v4292_v17 = vld [vmem:[%s4456_s20 + $0x390] ss:$12 sps:$4 sm:$0xff]  }
 0x15c   : > { %v1509_v27 = vpop.f32.mrb[34].mxu1 }
 0x15d   : > { %3578 = vst [vmem:[%s4677_s29 + $0x38] sm:$0xff] %v3365_v21   ;;  %v1932_v30 = vadd.f32 %v4733_v16, %v1507_v22  ;;  %v1510_v31 = vadd.f32 %v4658_v60, %v1509_v27  ;;  %v1511_v32 = vpop.f32.mrb[35].mxu1  ;;  %v4789_v16 = vpop.f32.mrb[48].mxu0  ;;  %v4293_v21 = vld [vmem:[%s4456_s20 + $0x3ac] ss:$12 sps:$4 sm:$0xff]  }
 0x15e   : > { %v3743_v44 = vpop.f32.mrb[49].mxu0 }
 0x15f   : > { %v1935_v33 = vadd.f32 %v4739_v36, %v1510_v31  ;;  %1721 = vmatmul.mubr.bf16.gmra.mrb[140].mxu1 %v4280_v24  ;;  %v2274_v35 = vmax.f32 %v1932_v30, 0.0  ;;  %v4295_v36 = vld [vmem:[%s4456_s20 + $0x3b0] ss:$12 sps:$4 sm:$0xff]   ;;  %v4795_v47 = vpop.f32.mrb[50].mxu0 }
 0x160   : > { %1728 = vmatprep.mubr.bf16.mxu1 %v4281_v28  ;;  %v3744_v43 = vpop.f32.mrb[51].mxu0  ;;  %3850 = vmatmul.mubr.bf16.gmra.mrb[156].mxu0 %v4295_v36 }
 0x161   : > { %v2275_v37 = vmax.f32 %v1935_v33, 0.0  ;;  %3853 = vmatprep.mubr.msk.bf16.mxu0 %vm4360_vm0, %v4359_v3 }
 0x162   : > { %v1514_v38 = vpop.f32.mrb[36].mxu1 }
 0x163   : > { %v3370_v39 = vpack.c.bf16 %v2275_v37, %v2274_v35  ;;  %v1515_v40 = vadd.f32 %v4658_v60, %v1514_v38  ;;  %v1516_v41 = vpop.f32.mrb[37].mxu1  ;;  %v4296_v35 = vld [vmem:[%s4456_s20 + $0x3a8] ss:$12 sps:$4 sm:$0xff]  }
 0x164   : > { %v1517_v45 = vpop.f32.mrb[38].mxu1 }
 0x165   : > { %3579 = vst [vmem:[%s4677_s29 + $0x40] sm:$0xff] %v3370_v39   ;;  %v1940_v48 = vadd.f32 %v4747_v34, %v1515_v40  ;;  %v1518_v49 = vadd.f32 %v4658_v60, %v1517_v45  ;;  %v1519_v50 = vpop.f32.mrb[39].mxu1  ;;  %v4803_v34 = vpop.f32.mrb[52].mxu0  ;;  %v4297_v39 = vld [vmem:[%s4456_s20 + $0x3c4] ss:$12 sps:$4 sm:$0xff]  }
 0x166   : > { %v3747_v0 = vpop.f32.mrb[53].mxu0 }
 0x167   : > { %v1943_v51 = vadd.f32 %v4753_v54, %v1518_v49  ;;  %1729 = vmatmul.mubr.bf16.gmra.mrb[144].mxu1 %v4284_v42  ;;  %v2276_v53 = vmax.f32 %v1940_v48, 0.0  ;;  %v4299_v54 = vld [vmem:[%s4456_s20 + $0x3c8] ss:$12 sps:$4 sm:$0xff]   ;;  %v4809_v4 = vpop.f32.mrb[54].mxu0 }
 0x168   : > { %1736 = vmatprep.mubr.bf16.mxu1 %v4285_v46  ;;  %v3748_v63 = vpop.f32.mrb[55].mxu0  ;;  %3854 = vmatmul.mubr.bf16.gmra.mrb[160].mxu0 %v4299_v54 }
 0x169   : > { %v2277_v55 = vmax.f32 %v1943_v51, 0.0  ;;  %3857 = vmatprep.mubr.msk.bf16.mxu0 %vm4360_vm0, %v4359_v3 }
 0x16a   : > { %v1522_v56 = vpop.f32.mrb[40].mxu1 }
 0x16b   : > { %v3375_v57 = vpack.c.bf16 %v2277_v55, %v2276_v53  ;;  %v1523_v58 = vadd.f32 %v4658_v60, %v1522_v56  ;;  %v1524_v59 = vpop.f32.mrb[41].mxu1  ;;  %v4300_v53 = vld [vmem:[%s4456_s20 + $0x3c0] ss:$12 sps:$4 sm:$0xff]  }
 0x16c   : > { %v1525_v1 = vpop.f32.mrb[42].mxu1 }
 0x16d   : > { %3580 = vst [vmem:[%s4677_s29 + $0x48] sm:$0xff] %v3375_v57   ;;  %v1948_v5 = vadd.f32 %v4761_v52, %v1523_v58  ;;  %v1526_v6 = vadd.f32 %v4658_v60, %v1525_v1  ;;  %v1527_v8 = vpop.f32.mrb[43].mxu1  ;;  %v4817_v52 = vpop.f32.mrb[56].mxu0  ;;  %v4301_v57 = vld [vmem:[%s4456_s20 + $0x3dc] ss:$12 sps:$4 sm:$0xff]  }
 0x16e   : > { %v3751_v19 = vpop.f32.mrb[57].mxu0 }
 0x16f   : > { %v1951_v9 = vadd.f32 %v4767_v11, %v1526_v6  ;;  %1737 = vmatmul.mubr.bf16.gmra.mrb[148].mxu1 %v4288_v61  ;;  %v2278_v10 = vmax.f32 %v1948_v5, 0.0  ;;  %v4303_v11 = vld [vmem:[%s4456_s20 + $0x3e0] ss:$12 sps:$4 sm:$0xff]   ;;  %v4823_v22 = vpop.f32.mrb[58].mxu0 }
 0x170   : > { %1744 = vmatprep.mubr.bf16.mxu1 %v4289_v2  ;;  %v3752_v18 = vpop.f32.mrb[59].mxu0  ;;  %3858 = vmatmul.mubr.bf16.gmra.mrb[164].mxu0 %v4303_v11 }
 0x171   : > { %v2279_v12 = vmax.f32 %v1951_v9, 0.0  ;;  %3861 = vmatprep.mubr.msk.bf16.mxu0 %vm4360_vm0, %v4359_v3 }
 0x172   : > { %v1530_v13 = vpop.f32.mrb[44].mxu1 }
 0x173   : > { %v3380_v14 = vpack.c.bf16 %v2279_v12, %v2278_v10  ;;  %v1531_v7 = vadd.f32 %v4658_v60, %v1530_v13  ;;  %v1532_v15 = vpop.f32.mrb[45].mxu1  ;;  %v4304_v10 = vld [vmem:[%s4456_s20 + $0x3d8] ss:$12 sps:$4 sm:$0xff]  }
 0x174   : > { %v1533_v20 = vpop.f32.mrb[46].mxu1 }
 0x175   : > { %3581 = vst [vmem:[%s4677_s29 + $0x50] sm:$0xff] %v3380_v14   ;;  %v1956_v23 = vadd.f32 %v4775_v62, %v1531_v7  ;;  %v1534_v24 = vadd.f32 %v4658_v60, %v1533_v20  ;;  %v1535_v26 = vpop.f32.mrb[47].mxu1  ;;  %v4831_v62 = vpop.f32.mrb[60].mxu0  ;;  %v4305_v14 = vld [vmem:[%s4456_s20 + $0x3f4] ss:$12 sps:$4 sm:$0xff]  }
 0x176   : > { %v3755_v37 = vpop.f32.mrb[61].mxu0 }
 0x177   : > { %v1959_v27 = vadd.f32 %v4781_v29, %v1534_v24  ;;  %1745 = vmatmul.mubr.bf16.gmra.mrb[152].mxu1 %v4292_v17  ;;  %v2280_v28 = vmax.f32 %v1956_v23, 0.0  ;;  %v4307_v29 = vld [vmem:[%s4456_s20 + $0x3f8] ss:$12 sps:$4 sm:$0xff]   ;;  %v4837_v40 = vpop.f32.mrb[62].mxu0 }
 0x178   : > { %1752 = vmatprep.mubr.bf16.mxu1 %v4293_v21  ;;  %v3756_v36 = vpop.f32.mrb[63].mxu0  ;;  %3862 = vmatmul.mubr.bf16.gmra.mrb[168].mxu0 %v4307_v29 }
 0x179   : > { %v2281_v30 = vmax.f32 %v1959_v27, 0.0  ;;  %3865 = vmatprep.mubr.msk.bf16.mxu0 %vm4360_vm0, %v4359_v3 }
 0x17a   : > { %v1538_v31 = vpop.f32.mrb[48].mxu1 }
 0x17b   : > { %v3385_v32 = vpack.c.bf16 %v2281_v30, %v2280_v28  ;;  %v1539_v25 = vadd.f32 %v4658_v60, %v1538_v31  ;;  %v1540_v33 = vpop.f32.mrb[49].mxu1  ;;  %v4308_v28 = vld [vmem:[%s4456_s20 + $0x3f0] ss:$12 sps:$4 sm:$0xff]  }
 0x17c   : > { %v1541_v38 = vpop.f32.mrb[50].mxu1 }
 0x17d   : > { %3582 = vst [vmem:[%s4677_s29 + $0x58] sm:$0xff] %v3385_v32   ;;  %v1964_v41 = vadd.f32 %v4789_v16, %v1539_v25  ;;  %v1542_v42 = vadd.f32 %v4658_v60, %v1541_v38  ;;  %v1543_v44 = vpop.f32.mrb[51].mxu1  ;;  %v4845_v16 = vpop.f32.mrb[64].mxu0  ;;  %v4309_v32 = vld [vmem:[%s4456_s20 + $0x40c] ss:$12 sps:$4 sm:$0xff]  }
 0x17e   : > { %v3759_v55 = vpop.f32.mrb[65].mxu0 }
 0x17f   : > { %v1967_v45 = vadd.f32 %v4795_v47, %v1542_v42  ;;  %1753 = vmatmul.mubr.bf16.gmra.mrb[156].mxu1 %v4296_v35  ;;  %v2282_v46 = vmax.f32 %v1964_v41, 0.0  ;;  %v4311_v47 = vld [vmem:[%s4456_s20 + $0x410] ss:$12 sps:$4 sm:$0xff]   ;;  %v4851_v58 = vpop.f32.mrb[66].mxu0 }
 0x180   : > { %1760 = vmatprep.mubr.bf16.mxu1 %v4297_v39  ;;  %v3760_v54 = vpop.f32.mrb[67].mxu0  ;;  %3866 = vmatmul.mubr.bf16.gmra.mrb[172].mxu0 %v4311_v47 }
 0x181   : > { %v2283_v48 = vmax.f32 %v1967_v45, 0.0  ;;  %3869 = vmatprep.mubr.msk.bf16.mxu0 %vm4360_vm0, %v4359_v3 }
 0x182   : > { %v1546_v49 = vpop.f32.mrb[52].mxu1 }
 0x183   : > { %v3390_v50 = vpack.c.bf16 %v2283_v48, %v2282_v46  ;;  %v1547_v43 = vadd.f32 %v4658_v60, %v1546_v49  ;;  %v1548_v51 = vpop.f32.mrb[53].mxu1  ;;  %v4312_v46 = vld [vmem:[%s4456_s20 + $0x408] ss:$12 sps:$4 sm:$0xff]  }
 0x184   : > { %v1549_v56 = vpop.f32.mrb[54].mxu1 }
 0x185   : > { %3583 = vst [vmem:[%s4677_s29 + $0x60] sm:$0xff] %v3390_v50   ;;  %v1972_v59 = vadd.f32 %v4803_v34, %v1547_v43  ;;  %v1550_v61 = vadd.f32 %v4658_v60, %v1549_v56  ;;  %v1551_v0 = vpop.f32.mrb[55].mxu1  ;;  %v4859_v34 = vpop.f32.mrb[68].mxu0  ;;  %v4313_v50 = vld [vmem:[%s4456_s20 + $0x424] ss:$12 sps:$4 sm:$0xff]  }
 0x186   : > { %v3763_v12 = vpop.f32.mrb[69].mxu0 }
 0x187   : > { %v1975_v1 = vadd.f32 %v4809_v4, %v1550_v61  ;;  %1761 = vmatmul.mubr.bf16.gmra.mrb[160].mxu1 %v4300_v53  ;;  %v2284_v2 = vmax.f32 %v1972_v59, 0.0  ;;  %v4315_v4 = vld [vmem:[%s4456_s20 + $0x428] ss:$12 sps:$4 sm:$0xff]   ;;  %v4865_v7 = vpop.f32.mrb[70].mxu0 }
 0x188   : > { %1768 = vmatprep.mubr.bf16.mxu1 %v4301_v57  ;;  %v3764_v11 = vpop.f32.mrb[71].mxu0  ;;  %3870 = vmatmul.mubr.bf16.gmra.mrb[176].mxu0 %v4315_v4 }
 0x189   : > { %v2285_v5 = vmax.f32 %v1975_v1, 0.0  ;;  %3873 = vmatprep.mubr.msk.bf16.mxu0 %vm4360_vm0, %v4359_v3 }
 0x18a   : > { %v1554_v6 = vpop.f32.mrb[56].mxu1 }
 0x18b   : > { %v3395_v8 = vpack.c.bf16 %v2285_v5, %v2284_v2  ;;  %v1555_v63 = vadd.f32 %v4658_v60, %v1554_v6  ;;  %v1556_v9 = vpop.f32.mrb[57].mxu1  ;;  %v4316_v2 = vld [vmem:[%s4456_s20 + $0x420] ss:$12 sps:$4 sm:$0xff]  }
 0x18c   : > { %v1557_v13 = vpop.f32.mrb[58].mxu1 }
 0x18d   : > { %3584 = vst [vmem:[%s4677_s29 + $0x68] sm:$0xff] %v3395_v8   ;;  %v1980_v15 = vadd.f32 %v4817_v52, %v1555_v63  ;;  %v1558_v17 = vadd.f32 %v4658_v60, %v1557_v13  ;;  %v1559_v19 = vpop.f32.mrb[59].mxu1  ;;  %v4873_v52 = vpop.f32.mrb[72].mxu0  ;;  %v4317_v8 = vld [vmem:[%s4456_s20 + $0x43c] ss:$12 sps:$4 sm:$0xff]  }
 0x18e   : > { %v3767_v30 = vpop.f32.mrb[73].mxu0 }
 0x18f   : > { %v1983_v20 = vadd.f32 %v4823_v22, %v1558_v17  ;;  %1769 = vmatmul.mubr.bf16.gmra.mrb[164].mxu1 %v4304_v10  ;;  %v2286_v21 = vmax.f32 %v1980_v15, 0.0  ;;  %v4319_v22 = vld [vmem:[%s4456_s20 + $0x440] ss:$12 sps:$4 sm:$0xff]   ;;  %v4879_v25 = vpop.f32.mrb[74].mxu0 }
 0x190   : > { %1776 = vmatprep.mubr.bf16.mxu1 %v4305_v14  ;;  %v3768_v29 = vpop.f32.mrb[75].mxu0  ;;  %3874 = vmatmul.mubr.bf16.gmra.mrb[180].mxu0 %v4319_v22 }
 0x191   : > { %v2287_v23 = vmax.f32 %v1983_v20, 0.0  ;;  %3877 = vmatprep.mubr.msk.bf16.mxu0 %vm4360_vm0, %v4359_v3 }
 0x192   : > { %v1562_v24 = vpop.f32.mrb[60].mxu1 }
 0x193   : > { %v3400_v26 = vpack.c.bf16 %v2287_v23, %v2286_v21  ;;  %v1563_v18 = vadd.f32 %v4658_v60, %v1562_v24  ;;  %v1564_v27 = vpop.f32.mrb[61].mxu1  ;;  %v4320_v21 = vld [vmem:[%s4456_s20 + $0x438] ss:$12 sps:$4 sm:$0xff]  }
 0x194   : > { %v1565_v31 = vpop.f32.mrb[62].mxu1 }
 0x195   : > { %3585 = vst [vmem:[%s4677_s29 + $0x70] sm:$0xff] %v3400_v26   ;;  %v1988_v33 = vadd.f32 %v4831_v62, %v1563_v18  ;;  %v1566_v35 = vadd.f32 %v4658_v60, %v1565_v31  ;;  %v1567_v37 = vpop.f32.mrb[63].mxu1  ;;  %v4887_v62 = vpop.f32.mrb[76].mxu0  ;;  %v4321_v26 = vld [vmem:[%s4456_s20 + $0x454] ss:$12 sps:$4 sm:$0xff]  }
 0x196   : > { %v3771_v48 = vpop.f32.mrb[77].mxu0 }
 0x197   : > { %v1991_v38 = vadd.f32 %v4837_v40, %v1566_v35  ;;  %1777 = vmatmul.mubr.bf16.gmra.mrb[168].mxu1 %v4308_v28  ;;  %v2288_v39 = vmax.f32 %v1988_v33, 0.0  ;;  %v4323_v40 = vld [vmem:[%s4456_s20 + $0x458] ss:$12 sps:$4 sm:$0xff]   ;;  %v4893_v43 = vpop.f32.mrb[78].mxu0 }
 0x198   : > { %1784 = vmatprep.mubr.bf16.mxu1 %v4309_v32  ;;  %v3772_v47 = vpop.f32.mrb[79].mxu0  ;;  %3878 = vmatmul.mubr.bf16.gmra.mrb[184].mxu0 %v4323_v40 }
 0x199   : > { %v2289_v41 = vmax.f32 %v1991_v38, 0.0  ;;  %3881 = vmatprep.mubr.msk.bf16.mxu0 %vm4360_vm0, %v4359_v3  ;;  %v4324_v38 = vld [vmem:[%s4456_s20 + $0x450] ss:$12 sps:$4 sm:$0xff]  }
 0x19a   : > { %v1570_v42 = vpop.f32.mrb[64].mxu1 }
 0x19b   : > { %v3405_v44 = vpack.c.bf16 %v2289_v41, %v2288_v39  ;;  %v1571_v36 = vadd.f32 %v4658_v60, %v1570_v42  ;;  %v1572_v45 = vpop.f32.mrb[65].mxu1  ;;  %v4325_v42 = vld [vmem:[%s4456_s20 + $0x46c] ss:$12 sps:$4 sm:$0xff]  }
 0x19c   : > { %v1573_v49 = vpop.f32.mrb[66].mxu1 }
 0x19d   : > { %3586 = vst [vmem:[%s4677_s29 + $0x78] sm:$0xff] %v3405_v44   ;;  %v1996_v51 = vadd.f32 %v4845_v16, %v1571_v36  ;;  %v1574_v53 = vadd.f32 %v4658_v60, %v1573_v49  ;;  %v1575_v55 = vpop.f32.mrb[67].mxu1  ;;  %v4901_v16 = vpop.f32.mrb[80].mxu0 }
 0x19e   : > { %v3775_v5 = vpop.f32.mrb[81].mxu0 }
 0x19f   : > { %v1999_v56 = vadd.f32 %v4851_v58, %v1574_v53  ;;  %1785 = vmatmul.mubr.bf16.gmra.mrb[172].mxu1 %v4312_v46  ;;  %v2290_v57 = vmax.f32 %v1996_v51, 0.0  ;;  %v4327_v58 = vld [vmem:[%s4456_s20 + $0x470] ss:$12 sps:$4 sm:$0xff]   ;;  %v4907_v63 = vpop.f32.mrb[82].mxu0 }
 0x1a0   : > { %1792 = vmatprep.mubr.bf16.mxu1 %v4313_v50  ;;  %v3776_v4 = vpop.f32.mrb[83].mxu0  ;;  %3882 = vmatmul.mubr.bf16.gmra.mrb[188].mxu0 %v4327_v58 }
 0x1a1   : > { %v2291_v59 = vmax.f32 %v1999_v56, 0.0  ;;  %3885 = vmatprep.mubr.msk.bf16.mxu0 %vm4360_vm0, %v4359_v3  ;;  %v4332_v4 = vld [vmem:[%s4456_s20 + $0x480] ss:$12 sps:$4 sm:$0xff]  }
 0x1a2   : > { %v1578_v61 = vpop.f32.mrb[68].mxu1 }
 0x1a3   : > { %v3410_v0 = vpack.c.bf16 %v2291_v59, %v2290_v57  ;;  %v1579_v54 = vadd.f32 %v4658_v60, %v1578_v61  ;;  %v1580_v1 = vpop.f32.mrb[69].mxu1  ;;  %v4329_v59 = vld [vmem:[%s4456_s20 + $0x484] ss:$12 sps:$4 sm:$0xff]  }
 0x1a4   : > { %v1581_v6 = vpop.f32.mrb[70].mxu1 }
 0x1a5   : > { %3587 = vst [vmem:[%s4677_s29 + $0x80] sm:$0xff] %v3410_v0   ;;  %v2004_v9 = vadd.f32 %v4859_v34, %v1579_v54  ;;  %v1582_v10 = vadd.f32 %v4658_v60, %v1581_v6  ;;  %v1583_v12 = vpop.f32.mrb[71].mxu1  ;;  %v4915_v34 = vpop.f32.mrb[84].mxu0 }
 0x1a6   : > { %v3779_v23 = vpop.f32.mrb[85].mxu0 }
 0x1a7   : > { %v2007_v13 = vadd.f32 %v4865_v7, %v1582_v10  ;;  %1793 = vmatmul.mubr.bf16.gmra.mrb[176].mxu1 %v4316_v2  ;;  %v2292_v14 = vmax.f32 %v2004_v9, 0.0  ;;  %v4331_v7 = vld [vmem:[%s4456_s20 + $0x488] ss:$12 sps:$4 sm:$0xff]   ;;  %v4921_v18 = vpop.f32.mrb[86].mxu0 }
 0x1a8   : > { %1800 = vmatprep.mubr.bf16.mxu1 %v4317_v8  ;;  %v3780_v30 = vpop.f32.mrb[87].mxu0  ;;  %3886 = vmatmul.mubr.bf16.gmra.mrb[192].mxu0 %v4331_v7 }
 0x1a9   : > { %v2293_v15 = vmax.f32 %v2007_v13, 0.0 }
 0x1aa   : > { %v1586_v17 = vpop.f32.mrb[72].mxu1 }
 0x1ab   : > { %v3415_v19 = vpack.c.bf16 %v2293_v15, %v2292_v14  ;;  %v1587_v11 = vadd.f32 %v4658_v60, %v1586_v17  ;;  %v1588_v20 = vpop.f32.mrb[73].mxu1  ;;  %v4927_v35 = vpop.f32.mrb[88].mxu0 }
 0x1ac   : > { %v1589_v24 = vpop.f32.mrb[74].mxu1  ;;  %v3783_v39 = vpop.f32.mrb[89].mxu0 }
 0x1ad   : > { %3588 = vst [vmem:[%s4677_s29 + $0x88] sm:$0xff] %v3415_v19   ;;  %v2012_v3 = vadd.f32 %v4873_v52, %v1587_v11  ;;  %v1590_v27 = vadd.f32 %v4658_v60, %v1589_v24  ;;  %v1591_v28 = vpop.f32.mrb[75].mxu1  ;;  %v2046_v44 = vpop.f32.mrb[90].mxu0  ;;  %v4958_v39 = vld [vmem:[%s5051_s2] ss:$0 sm:$0xff] }
 0x1ae   : > { %v3784_v46 = vpop.f32.mrb[91].mxu0 }
 0x1af   : > { %v2015_v22 = vadd.f32 %v4879_v25, %v1590_v27  ;;  %1801 = vmatmul.mubr.bf16.gmra.mrb[180].mxu1 %v4320_v21  ;;  %v2294_v31 = vmax.f32 %v2012_v3, 0.0 }
 0x1b0   : > { %1808 = vmatprep.mubr.bf16.mxu1 %v4321_v26 }
 0x1b1   : > { %v2295_v32 = vmax.f32 %v2015_v22, 0.0 }
 0x1b2   : > { %v1594_v33 = vpop.f32.mrb[76].mxu1 }
 0x1b3   : > { %v3420_v37 = vpack.c.bf16 %v2295_v32, %v2294_v31  ;;  %v1595_v29 = vadd.f32 %v4658_v60, %v1594_v33  ;;  %v1596_v52 = vpop.f32.mrb[77].mxu1  ;;  %v4936_v51 = vpop.f32.mrb[92].mxu0 }
 0x1b4   : > { %v1597_v41 = vpop.f32.mrb[78].mxu1  ;;  %v3787_v56 = vpop.f32.mrb[93].mxu0 }
 0x1b5   : > { %3589 = vst [vmem:[%s4677_s29 + $0x90] sm:$0xff] %v3420_v37   ;;  %v2020_v25 = vadd.f32 %v4887_v62, %v1595_v29  ;;  %v1598_v36 = vadd.f32 %v4658_v60, %v1597_v41  ;;  %v1599_v45 = vpop.f32.mrb[79].mxu1  ;;  %v4328_v62 = vld [vmem:[%s4456_s20 + $0x468] ss:$12 sps:$4 sm:$0xff]   ;;  %v2054_v61 = vpop.f32.mrb[94].mxu0 }
 0x1b6   : > { %v3788_v1 = vpop.f32.mrb[95].mxu0 }
 0x1b7   : > { %v2023_v48 = vadd.f32 %v4893_v43, %v1598_v36  ;;  %1809 = vmatmul.mubr.bf16.gmra.mrb[184].mxu1 %v4324_v38  ;;  %v2296_v40 = vmax.f32 %v2020_v25, 0.0 }
 0x1b8   : > { %1816 = vmatprep.mubr.bf16.mxu1 %v4325_v42 }
 0x1b9   : > { %v2297_v49 = vmax.f32 %v2023_v48, 0.0 }
 0x1ba   : > { %v1602_v50 = vpop.f32.mrb[80].mxu1 }
 0x1bb   : > { %v3425_v53 = vpack.c.bf16 %v2297_v49, %v2296_v40  ;;  %v1603_v55 = vadd.f32 %v4658_v60, %v1602_v50  ;;  %v1604_v47 = vpop.f32.mrb[81].mxu1  ;;  %v2059_v8 = vpop.f32.mrb[96].mxu0 }
 0x1bc   : > { %v1605_v57 = vpop.f32.mrb[82].mxu1  ;;  %v3791_v13 = vpop.f32.mrb[97].mxu0 }
 0x1bd   : > { %3590 = vst [vmem:[%s4677_s29 + $0x98] sm:$0xff] %v3425_v53   ;;  %v2028_v43 = vadd.f32 %v4901_v16, %v1603_v55  ;;  %v1606_v0 = vadd.f32 %v4658_v60, %v1605_v57  ;;  %v1607_v54 = vpop.f32.mrb[83].mxu1  ;;  %v2062_v14 = vpop.f32.mrb[98].mxu0 }
 0x1be   : > { %v3792_v19 = vpop.f32.mrb[99].mxu0 }
 0x1bf   : > { %v2031_v2 = vadd.f32 %v4907_v63, %v1606_v0  ;;  %1817 = vmatmul.mubr.bf16.gmra.mrb[188].mxu1 %v4328_v62  ;;  %v2298_v5 = vmax.f32 %v2028_v43, 0.0 }
 0x1c0   : > { %1824 = vmatprep.mubr.bf16.mxu1 %v4329_v59 }
 0x1c1   : > { %v2299_v58 = vmax.f32 %v2031_v2, 0.0 }
 0x1c2   : > { %v1610_v6 = vpop.f32.mrb[84].mxu1 }
 0x1c3   : > { %v3430_v9 = vpack.c.bf16 %v2299_v58, %v2298_v5  ;;  %v1611_v10 = vadd.f32 %v4658_v60, %v1610_v6  ;;  %v1612_v12 = vpop.f32.mrb[85].mxu1  ;;  %v2067_v7 = vpop.f32.mrb[100].mxu0 }
 0x1c4   : > { %v1613_v16 = vpop.f32.mrb[86].mxu1  ;;  %v3795_v27 = vpop.f32.mrb[101].mxu0 }
 0x1c5   : > { %3591 = vst [vmem:[%s4677_s29 + $0xa0] sm:$0xff] %v3430_v9   ;;  %v2036_v15 = vadd.f32 %v4915_v34, %v1611_v10  ;;  %v1614_v63 = vadd.f32 %v4658_v60, %v1613_v16  ;;  %v1615_v17 = vpop.f32.mrb[87].mxu1  ;;  %v2070_v30 = vpop.f32.mrb[102].mxu0 }
 0x1c7   : > { %v2039_v11 = vadd.f32 %v4921_v18, %v1614_v63  ;;  %1825 = vmatmul.mubr.bf16.gmra.mrb[192].mxu1 %v4332_v4  ;;  %v2300_v20 = vmax.f32 %v2036_v15, 0.0  ;;  %v3796_v18 = vpop.f32.mrb[103].mxu0 }
 0x1c9   : > { %v2301_v21 = vmax.f32 %v2039_v11, 0.0 }
 0x1ca   : > { %v1618_v23 = vpop.f32.mrb[88].mxu1 }
 0x1cb   : > { %v3435_v24 = vpack.c.bf16 %v2301_v21, %v2300_v20  ;;  %v1619_v26 = vadd.f32 %v4658_v60, %v1618_v23  ;;  %v1620_v3 = vpop.f32.mrb[89].mxu1  ;;  %v2075_v52 = vpop.f32.mrb[104].mxu0 }
 0x1cc   : > { %v1621_v28 = vpop.f32.mrb[90].mxu1 }
 0x1cd   : > { %3592 = vst [vmem:[%s4677_s29 + $0xa8] sm:$0xff] %v3435_v24   ;;  %v2044_v34 = vadd.f32 %v4927_v35, %v1619_v26  ;;  %v1622_v22 = vadd.f32 %v4658_v60, %v1621_v28  ;;  %v1623_v31 = vpop.f32.mrb[91].mxu1  ;;  %v3799_v35 = vpop.f32.mrb[105].mxu0 }
 0x1ce   : > { %v2078_v36 = vpop.f32.mrb[106].mxu0 }
 0x1cf   : > { %v2047_v32 = vadd.f32 %v2046_v44, %v1622_v22  ;;  %v2302_v33 = vmax.f32 %v2044_v34, 0.0  ;;  %v3800_v46 = vpop.f32.mrb[107].mxu0 }
 0x1d1   : > { %v2303_v37 = vmax.f32 %v2047_v32, 0.0 }
 0x1d2   : > { %v1626_v29 = vpop.f32.mrb[92].mxu1 }
 0x1d3   : > { %v3440_v38 = vpack.c.bf16 %v2303_v37, %v2302_v33  ;;  %v1627_v41 = vadd.f32 %v4958_v39, %v1626_v29  ;;  %v1628_v42 = vpop.f32.mrb[93].mxu1  ;;  %v2083_v53 = vpop.f32.mrb[108].mxu0 }
 0x1d4   : > { %v1629_v25 = vpop.f32.mrb[94].mxu1  ;;  %v3803_v56 = vpop.f32.mrb[109].mxu0 }
 0x1d5   : > { %3593 = vst [vmem:[%s4677_s29 + $0xb0] sm:$0xff] %v3440_v38   ;;  %v2052_v60 = vadd.f32 %v4936_v51, %v1627_v41  ;;  %v1630_v44 = vadd.f32 %v4958_v39, %v1629_v25  ;;  %v1631_v45 = vpop.f32.mrb[95].mxu1  ;;  %v2086_v59 = vpop.f32.mrb[110].mxu0 }
 0x1d6   : > { %v3804_v54 = vpop.f32.mrb[111].mxu0 }
 0x1d7   : > { %v2055_v48 = vadd.f32 %v2054_v61, %v1630_v44  ;;  %v2304_v40 = vmax.f32 %v2052_v60, 0.0 }
 0x1d9   : > { %v2305_v49 = vmax.f32 %v2055_v48, 0.0 }
 0x1da   : > { %v1634_v50 = vpop.f32.mrb[96].mxu1 }
 0x1db   : > { %v3445_v55 = vpack.c.bf16 %v2305_v49, %v2304_v40  ;;  %v1635_v47 = vadd.f32 %v4958_v39, %v1634_v50  ;;  %v1636_v62 = vpop.f32.mrb[97].mxu1  ;;  %v2091_v58 = vpop.f32.mrb[112].mxu0 }
 0x1dc   : > { %v1637_v57 = vpop.f32.mrb[98].mxu1  ;;  %v3807_v12 = vpop.f32.mrb[113].mxu0 }
 0x1dd   : > { %3594 = vst [vmem:[%s4677_s29 + $0xb8] sm:$0xff] %v3445_v55   ;;  %v2060_v43 = vadd.f32 %v2059_v8, %v1635_v47  ;;  %v1638_v51 = vadd.f32 %v4958_v39, %v1637_v57  ;;  %v1639_v0 = vpop.f32.mrb[99].mxu1  ;;  %v2094_v13 = vpop.f32.mrb[114].mxu0 }
 0x1de   : > { %v3808_v63 = vpop.f32.mrb[115].mxu0 }
 0x1df   : > { %v2063_v1 = vadd.f32 %v2062_v14, %v1638_v51  ;;  %v2306_v61 = vmax.f32 %v2060_v43, 0.0 }
 0x1e1   : > { %v2307_v2 = vmax.f32 %v2063_v1, 0.0 }
 0x1e2   : > { %v1642_v5 = vpop.f32.mrb[100].mxu1 }
 0x1e3   : > { %v3450_v6 = vpack.c.bf16 %v2307_v2, %v2306_v61  ;;  %v1643_v9 = vadd.f32 %v4958_v39, %v1642_v5  ;;  %v1644_v10 = vpop.f32.mrb[101].mxu1  ;;  %v2099_v20 = vpop.f32.mrb[116].mxu0 }
 0x1e4   : > { %v1645_v4 = vpop.f32.mrb[102].mxu1  ;;  %v3811_v26 = vpop.f32.mrb[117].mxu0 }
 0x1e5   : > { %3595 = vst [vmem:[%s4677_s29 + $0xc0] sm:$0xff] %v3450_v6   ;;  %v2068_v16 = vadd.f32 %v2067_v7, %v1643_v9  ;;  %v1646_v8 = vadd.f32 %v4958_v39, %v1645_v4  ;;  %v1647_v15 = vpop.f32.mrb[103].mxu1  ;;  %v2102_v27 = vpop.f32.mrb[118].mxu0 }
 0x1e6   : > { %v3812_v22 = vpop.f32.mrb[119].mxu0 }
 0x1e7   : > { %v2071_v17 = vadd.f32 %v2070_v30, %v1646_v8  ;;  %v2308_v14 = vmax.f32 %v2068_v16, 0.0 }
 0x1e9   : > { %v2309_v19 = vmax.f32 %v2071_v17, 0.0 }
 0x1ea   : > { %v1650_v11 = vpop.f32.mrb[104].mxu1 }
 0x1eb   : > { %v3455_v21 = vpack.c.bf16 %v2309_v19, %v2308_v14  ;;  %v1651_v23 = vadd.f32 %v4958_v39, %v1650_v11  ;;  %v1652_v24 = vpop.f32.mrb[105].mxu1  ;;  %v2107_v33 = vpop.f32.mrb[120].mxu0 }
 0x1ec   : > { %v1653_v3 = vpop.f32.mrb[106].mxu1  ;;  %v3815_v41 = vpop.f32.mrb[121].mxu0 }
 0x1ed   : > { %3596 = vst [vmem:[%s4677_s29 + $0xc8] sm:$0xff] %v3455_v21   ;;  %v2076_v28 = vadd.f32 %v2075_v52, %v1651_v23  ;;  %v1654_v7 = vadd.f32 %v4958_v39, %v1653_v3  ;;  %v1655_v34 = vpop.f32.mrb[107].mxu1  ;;  %v2110_v35 = vpop.f32.mrb[122].mxu0 }
 0x1ee   : > { %v3816_v44 = vpop.f32.mrb[123].mxu0 }
 0x1ef   : > { %v2079_v31 = vadd.f32 %v2078_v36, %v1654_v7  ;;  %v2310_v30 = vmax.f32 %v2076_v28, 0.0 }
 0x1f1   : > { %v2311_v18 = vmax.f32 %v2079_v31, 0.0 }
 0x1f2   : > { %v1658_v32 = vpop.f32.mrb[108].mxu1 }
 0x1f3   : > { %v3460_v37 = vpack.c.bf16 %v2311_v18, %v2310_v30  ;;  %v1659_v29 = vadd.f32 %v4958_v39, %v1658_v32  ;;  %v1660_v38 = vpop.f32.mrb[109].mxu1  ;;  %v2115_v40 = vpop.f32.mrb[124].mxu0 }
 0x1f4   : > { %v1661_v42 = vpop.f32.mrb[110].mxu1  ;;  %v3819_v47 = vpop.f32.mrb[125].mxu0 }
 0x1f5   : > { %3597 = vst [vmem:[%s4677_s29 + $0xd0] sm:$0xff] %v3460_v37   ;;  %v2084_v25 = vadd.f32 %v2083_v53, %v1659_v29  ;;  %v1662_v52 = vadd.f32 %v4958_v39, %v1661_v42  ;;  %v1663_v60 = vpop.f32.mrb[111].mxu1  ;;  %v2118_v56 = vpop.f32.mrb[126].mxu0 }
 0x1f6   : > { %v3820_v51 = vpop.f32.mrb[127].mxu0 }
 0x1f7   : > { %v2087_v45 = vadd.f32 %v2086_v59, %v1662_v52  ;;  %v2312_v36 = vmax.f32 %v2084_v25, 0.0 }
 0x1f9   : > { %v2313_v46 = vmax.f32 %v2087_v45, 0.0 }
 0x1fa   : > { %v1666_v48 = vpop.f32.mrb[112].mxu1 }
 0x1fb   : > { %v3465_v49 = vpack.c.bf16 %v2313_v46, %v2312_v36  ;;  %v1667_v50 = vadd.f32 %v4958_v39, %v1666_v48  ;;  %v1668_v55 = vpop.f32.mrb[113].mxu1  ;;  %v2123_v61 = vpop.f32.mrb[128].mxu0 }
 0x1fc   : > { %v1669_v62 = vpop.f32.mrb[114].mxu1  ;;  %v3823_v9 = vpop.f32.mrb[129].mxu0 }
 0x1fd   : > { %3598 = vst [vmem:[%s4677_s29 + $0xd8] sm:$0xff] %v3465_v49   ;;  %v2092_v57 = vadd.f32 %v2091_v58, %v1667_v50  ;;  %v1670_v53 = vadd.f32 %v4958_v39, %v1669_v62  ;;  %v1671_v43 = vpop.f32.mrb[115].mxu1  ;;  %v2126_v12 = vpop.f32.mrb[130].mxu0 }
 0x1fe   : > { %v3824_v8 = vpop.f32.mrb[131].mxu0 }
 0x1ff   : > { %v2095_v0 = vadd.f32 %v2094_v13, %v1670_v53  ;;  %v2314_v59 = vmax.f32 %v2092_v57, 0.0 }
 0x201   : > { %v2315_v54 = vmax.f32 %v2095_v0, 0.0 }
 0x202   : > { %v1674_v1 = vpop.f32.mrb[116].mxu1 }
 0x203   : > { %v3470_v2 = vpack.c.bf16 %v2315_v54, %v2314_v59  ;;  %v1675_v5 = vadd.f32 %v4958_v39, %v1674_v1  ;;  %v1676_v6 = vpop.f32.mrb[117].mxu1  ;;  %v2131_v14 = vpop.f32.mrb[132].mxu0 }
 0x204   : > { %v1677_v10 = vpop.f32.mrb[118].mxu1  ;;  %v3827_v23 = vpop.f32.mrb[133].mxu0 }
 0x205   : > { %3599 = vst [vmem:[%s4677_s29 + $0xe0] sm:$0xff] %v3470_v2   ;;  %v2100_v4 = vadd.f32 %v2099_v20, %v1675_v5  ;;  %v1678_v58 = vadd.f32 %v4958_v39, %v1677_v10  ;;  %v1679_v16 = vpop.f32.mrb[119].mxu1  ;;  %v2134_v26 = vpop.f32.mrb[134].mxu0 }
 0x206   : > { %v3828_v7 = vpop.f32.mrb[135].mxu0 }
 0x207   : > { %v2103_v15 = vadd.f32 %v2102_v27, %v1678_v58  ;;  %v2316_v13 = vmax.f32 %v2100_v4, 0.0 }
 0x209   : > { %v2317_v63 = vmax.f32 %v2103_v15, 0.0 }
 0x20a   : > { %v1682_v17 = vpop.f32.mrb[120].mxu1 }
 0x20b   : > { %v3475_v19 = vpack.c.bf16 %v2317_v63, %v2316_v13  ;;  %v1683_v11 = vadd.f32 %v4958_v39, %v1682_v17  ;;  %v1684_v21 = vpop.f32.mrb[121].mxu1  ;;  %v2139_v30 = vpop.f32.mrb[136].mxu0 }
 0x20c   : > { %v1685_v24 = vpop.f32.mrb[122].mxu1  ;;  %v3831_v29 = vpop.f32.mrb[137].mxu0 }
 0x20d   : > { %3600 = vst [vmem:[%s4677_s29 + $0xe8] sm:$0xff] %v3475_v19   ;;  %v2108_v3 = vadd.f32 %v2107_v33, %v1683_v11  ;;  %v1686_v20 = vadd.f32 %v4958_v39, %v1685_v24  ;;  %v1687_v28 = vpop.f32.mrb[123].mxu1  ;;  %v2142_v41 = vpop.f32.mrb[138].mxu0 }
 0x20e   : > { %v3832_v52 = vpop.f32.mrb[139].mxu0 }
 0x20f   : > { %v2111_v34 = vadd.f32 %v2110_v35, %v1686_v20  ;;  %v2318_v27 = vmax.f32 %v2108_v3, 0.0 }
 0x211   : > { %v2319_v22 = vmax.f32 %v2111_v34, 0.0 }
 0x212   : > { %v1690_v31 = vpop.f32.mrb[124].mxu1 }
 0x213   : > { %v3480_v18 = vpack.c.bf16 %v2319_v22, %v2318_v27  ;;  %v1691_v32 = vadd.f32 %v4958_v39, %v1690_v31  ;;  %v1692_v37 = vpop.f32.mrb[125].mxu1  ;;  %v2147_v36 = vpop.f32.mrb[140].mxu0 }
 0x214   : > { %v1693_v38 = vpop.f32.mrb[126].mxu1  ;;  %v3835_v50 = vpop.f32.mrb[141].mxu0 }
 0x215   : > { %3601 = vst [vmem:[%s4677_s29 + $0xf0] sm:$0xff] %v3480_v18   ;;  %v2116_v42 = vadd.f32 %v2115_v40, %v1691_v32  ;;  %v1694_v33 = vadd.f32 %v4958_v39, %v1693_v38  ;;  %v1695_v25 = vpop.f32.mrb[127].mxu1  ;;  %v2150_v47 = vpop.f32.mrb[142].mxu0 }
 0x216   : > { %v3836_v53 = vpop.f32.mrb[143].mxu0 }
 0x217   : > { %v2119_v60 = vadd.f32 %v2118_v56, %v1694_v33  ;;  %v2320_v35 = vmax.f32 %v2116_v42, 0.0 }
 0x219   : > { %v2321_v44 = vmax.f32 %v2119_v60, 0.0 }
 0x21a   : > { %v1698_v45 = vpop.f32.mrb[128].mxu1 }
 0x21b   : > { %v3485_v46 = vpack.c.bf16 %v2321_v44, %v2320_v35  ;;  %v1699_v48 = vadd.f32 %v4958_v39, %v1698_v45  ;;  %v1700_v49 = vpop.f32.mrb[129].mxu1  ;;  %v2155_v59 = vpop.f32.mrb[144].mxu0 }
 0x21c   : > { %v1701_v55 = vpop.f32.mrb[130].mxu1  ;;  %v3839_v5 = vpop.f32.mrb[145].mxu0 }
 0x21d   : > { %3602 = vst [vmem:[%s4677_s29 + $0xf8] sm:$0xff] %v3485_v46   ;;  %v2124_v62 = vadd.f32 %v2123_v61, %v1699_v48  ;;  %v1702_v40 = vadd.f32 %v4958_v39, %v1701_v55  ;;  %v1703_v57 = vpop.f32.mrb[131].mxu1  ;;  %v2158_v9 = vpop.f32.mrb[146].mxu0 }
 0x21e   : > { %v3840_v58 = vpop.f32.mrb[147].mxu0 }
 0x21f   : > { %v2127_v43 = vadd.f32 %v2126_v12, %v1702_v40  ;;  %v2322_v56 = vmax.f32 %v2124_v62, 0.0 }
 0x221   : > { %v2323_v51 = vmax.f32 %v2127_v43, 0.0 }
 0x222   : > { %v1706_v0 = vpop.f32.mrb[132].mxu1 }
 0x223   : > { %v3490_v54 = vpack.c.bf16 %v2323_v51, %v2322_v56  ;;  %v1707_v1 = vadd.f32 %v4958_v39, %v1706_v0  ;;  %v1708_v2 = vpop.f32.mrb[133].mxu1  ;;  %v2163_v13 = vpop.f32.mrb[148].mxu0 }
 0x224   : > { %v1709_v6 = vpop.f32.mrb[134].mxu1  ;;  %v3843_v11 = vpop.f32.mrb[149].mxu0 }
 0x225   : > { %3603 = vst [vmem:[%s4677_s29 + $0x100] sm:$0xff] %v3490_v54   ;;  %v2132_v10 = vadd.f32 %v2131_v14, %v1707_v1  ;;  %v1710_v61 = vadd.f32 %v4958_v39, %v1709_v6  ;;  %v1711_v4 = vpop.f32.mrb[135].mxu1  ;;  %v2166_v23 = vpop.f32.mrb[150].mxu0 }
 0x226   : > { %v3844_v20 = vpop.f32.mrb[151].mxu0 }
 0x227   : > { %v2135_v16 = vadd.f32 %v2134_v26, %v1710_v61  ;;  %v2324_v12 = vmax.f32 %v2132_v10, 0.0 }
 0x229   : > { %v2325_v8 = vmax.f32 %v2135_v16, 0.0 }
 0x22a   : > { %v1714_v15 = vpop.f32.mrb[136].mxu1 }
 0x22b   : > { %v3495_v63 = vpack.c.bf16 %v2325_v8, %v2324_v12  ;;  %v1715_v17 = vadd.f32 %v4958_v39, %v1714_v15  ;;  %v1716_v19 = vpop.f32.mrb[137].mxu1  ;;  %v2171_v27 = vpop.f32.mrb[152].mxu0 }
 0x22c   : > { %v1717_v21 = vpop.f32.mrb[138].mxu1  ;;  %v3847_v32 = vpop.f32.mrb[153].mxu0 }
 0x22d   : > { %3604 = vst [vmem:[%s4677_s29 + $0x108] sm:$0xff] %v3495_v63   ;;  %v2140_v24 = vadd.f32 %v2139_v30, %v1715_v17  ;;  %v1718_v14 = vadd.f32 %v4958_v39, %v1717_v21  ;;  %v1719_v3 = vpop.f32.mrb[139].mxu1  ;;  %v2174_v29 = vpop.f32.mrb[154].mxu0 }
 0x22e   : > { %v3848_v33 = vpop.f32.mrb[155].mxu0 }
 0x22f   : > { %v2143_v28 = vadd.f32 %v2142_v41, %v1718_v14  ;;  %v2326_v26 = vmax.f32 %v2140_v24, 0.0 }
 0x231   : > { %v2327_v7 = vmax.f32 %v2143_v28, 0.0 }
 0x232   : > { %v1722_v34 = vpop.f32.mrb[140].mxu1 }
 0x233   : > { %v3500_v22 = vpack.c.bf16 %v2327_v7, %v2326_v26  ;;  %v1723_v31 = vadd.f32 %v4958_v39, %v1722_v34  ;;  %v1724_v18 = vpop.f32.mrb[141].mxu1  ;;  %v2179_v35 = vpop.f32.mrb[156].mxu0 }
 0x234   : > { %v1725_v37 = vpop.f32.mrb[142].mxu1  ;;  %v3851_v48 = vpop.f32.mrb[157].mxu0 }
 0x235   : > { %3605 = vst [vmem:[%s4677_s29 + $0x110] sm:$0xff] %v3500_v22   ;;  %v2148_v38 = vadd.f32 %v2147_v36, %v1723_v31  ;;  %v1726_v30 = vadd.f32 %v4958_v39, %v1725_v37  ;;  %v1727_v42 = vpop.f32.mrb[143].mxu1  ;;  %v2182_v50 = vpop.f32.mrb[158].mxu0 }
 0x236   : > { %v3852_v40 = vpop.f32.mrb[159].mxu0 }
 0x237   : > { %v2151_v25 = vadd.f32 %v2150_v47, %v1726_v30  ;;  %v2328_v41 = vmax.f32 %v2148_v38, 0.0 }
 0x239   : > { %v2329_v52 = vmax.f32 %v2151_v25, 0.0 }
 0x23a   : > { %v1730_v60 = vpop.f32.mrb[144].mxu1 }
 0x23b   : > { %v3505_v44 = vpack.c.bf16 %v2329_v52, %v2328_v41  ;;  %v1731_v45 = vadd.f32 %v4958_v39, %v1730_v60  ;;  %v1732_v46 = vpop.f32.mrb[145].mxu1  ;;  %v2187_v56 = vpop.f32.mrb[160].mxu0 }
 0x23c   : > { %v1733_v49 = vpop.f32.mrb[146].mxu1  ;;  %v3855_v1 = vpop.f32.mrb[161].mxu0 }
 0x23d   : > { %3606 = vst [vmem:[%s4677_s29 + $0x118] sm:$0xff] %v3505_v44   ;;  %v2156_v55 = vadd.f32 %v2155_v59, %v1731_v45  ;;  %v1734_v36 = vadd.f32 %v4958_v39, %v1733_v49  ;;  %v1735_v62 = vpop.f32.mrb[147].mxu1  ;;  %v2190_v5 = vpop.f32.mrb[162].mxu0 }
 0x23e   : > { %v3856_v61 = vpop.f32.mrb[163].mxu0 }
 0x23f   : > { %v2159_v57 = vadd.f32 %v2158_v9, %v1734_v36  ;;  %v2330_v47 = vmax.f32 %v2156_v55, 0.0 }
 0x241   : > { %v2331_v53 = vmax.f32 %v2159_v57, 0.0 }
 0x242   : > { %v1738_v43 = vpop.f32.mrb[148].mxu1 }
 0x243   : > { %v3510_v51 = vpack.c.bf16 %v2331_v53, %v2330_v47  ;;  %v1739_v0 = vadd.f32 %v4958_v39, %v1738_v43  ;;  %v1740_v54 = vpop.f32.mrb[149].mxu1  ;;  %v2195_v12 = vpop.f32.mrb[164].mxu0 }
 0x244   : > { %v1741_v2 = vpop.f32.mrb[150].mxu1  ;;  %v3859_v17 = vpop.f32.mrb[165].mxu0 }
 0x245   : > { %3607 = vst [vmem:[%s4677_s29 + $0x120] sm:$0xff] %v3510_v51   ;;  %v2164_v6 = vadd.f32 %v2163_v13, %v1739_v0  ;;  %v1742_v59 = vadd.f32 %v4958_v39, %v1741_v2  ;;  %v1743_v10 = vpop.f32.mrb[151].mxu1  ;;  %v2198_v11 = vpop.f32.mrb[166].mxu0 }
 0x246   : > { %v3860_v14 = vpop.f32.mrb[167].mxu0 }
 0x247   : > { %v2167_v4 = vadd.f32 %v2166_v23, %v1742_v59  ;;  %v2332_v9 = vmax.f32 %v2164_v6, 0.0 }
 0x249   : > { %v2333_v58 = vmax.f32 %v2167_v4, 0.0 }
 0x24a   : > { %v1746_v16 = vpop.f32.mrb[152].mxu1 }
 0x24b   : > { %v3515_v8 = vpack.c.bf16 %v2333_v58, %v2332_v9  ;;  %v1747_v15 = vadd.f32 %v4958_v39, %v1746_v16  ;;  %v1748_v63 = vpop.f32.mrb[153].mxu1  ;;  %v2203_v26 = vpop.f32.mrb[168].mxu0 }
 0x24c   : > { %v1749_v19 = vpop.f32.mrb[154].mxu1  ;;  %v3863_v31 = vpop.f32.mrb[169].mxu0 }
 0x24d   : > { %3608 = vst [vmem:[%s4677_s29 + $0x128] sm:$0xff] %v3515_v8   ;;  %v2172_v21 = vadd.f32 %v2171_v27, %v1747_v15  ;;  %v1750_v13 = vadd.f32 %v4958_v39, %v1749_v19  ;;  %v1751_v24 = vpop.f32.mrb[155].mxu1  ;;  %v2206_v32 = vpop.f32.mrb[170].mxu0 }
 0x24e   : > { %v3864_v30 = vpop.f32.mrb[171].mxu0 }
 0x24f   : > { %v2175_v3 = vadd.f32 %v2174_v29, %v1750_v13  ;;  %v2334_v23 = vmax.f32 %v2172_v21, 0.0 }
 0x251   : > { %v2335_v20 = vmax.f32 %v2175_v3, 0.0 }
 0x252   : > { %v1754_v28 = vpop.f32.mrb[156].mxu1 }
 0x253   : > { %v3520_v7 = vpack.c.bf16 %v2335_v20, %v2334_v23  ;;  %v1755_v34 = vadd.f32 %v4958_v39, %v1754_v28  ;;  %v1756_v22 = vpop.f32.mrb[157].mxu1  ;;  %v2211_v41 = vpop.f32.mrb[172].mxu0 }
 0x254   : > { %v1757_v18 = vpop.f32.mrb[158].mxu1  ;;  %v3867_v45 = vpop.f32.mrb[173].mxu0 }
 0x255   : > { %3609 = vst [vmem:[%s4677_s29 + $0x130] sm:$0xff] %v3520_v7   ;;  %v2180_v37 = vadd.f32 %v2179_v35, %v1755_v34  ;;  %v1758_v27 = vadd.f32 %v4958_v39, %v1757_v18  ;;  %v1759_v38 = vpop.f32.mrb[159].mxu1  ;;  %v2214_v48 = vpop.f32.mrb[174].mxu0 }
 0x256   : > { %v3868_v36 = vpop.f32.mrb[175].mxu0 }
 0x257   : > { %v2183_v42 = vadd.f32 %v2182_v50, %v1758_v27  ;;  %v2336_v29 = vmax.f32 %v2180_v37, 0.0 }
 0x259   : > { %v2337_v33 = vmax.f32 %v2183_v42, 0.0 }
 0x25a   : > { %v1762_v25 = vpop.f32.mrb[160].mxu1 }
 0x25b   : > { %v3525_v52 = vpack.c.bf16 %v2337_v33, %v2336_v29  ;;  %v1763_v60 = vadd.f32 %v4958_v39, %v1762_v25  ;;  %v1764_v44 = vpop.f32.mrb[161].mxu1  ;;  %v2219_v47 = vpop.f32.mrb[176].mxu0 }
 0x25c   : > { %v1765_v46 = vpop.f32.mrb[162].mxu1  ;;  %v3871_v0 = vpop.f32.mrb[177].mxu0 }
 0x25d   : > { %3610 = vst [vmem:[%s4677_s29 + $0x138] sm:$0xff] %v3525_v52   ;;  %v2188_v49 = vadd.f32 %v2187_v56, %v1763_v60  ;;  %v1766_v35 = vadd.f32 %v4958_v39, %v1765_v46  ;;  %v1767_v55 = vpop.f32.mrb[163].mxu1  ;;  %v2222_v1 = vpop.f32.mrb[178].mxu0 }
 0x25e   : > { %v3872_v59 = vpop.f32.mrb[179].mxu0 }
 0x25f   : > { %v2191_v62 = vadd.f32 %v2190_v5, %v1766_v35  ;;  %v2338_v50 = vmax.f32 %v2188_v49, 0.0 }
 0x261   : > { %v2339_v40 = vmax.f32 %v2191_v62, 0.0 }
 0x262   : > { %v1770_v57 = vpop.f32.mrb[164].mxu1 }
 0x263   : > { %v3530_v53 = vpack.c.bf16 %v2339_v40, %v2338_v50  ;;  %v1771_v43 = vadd.f32 %v4958_v39, %v1770_v57  ;;  %v1772_v51 = vpop.f32.mrb[165].mxu1  ;;  %v2227_v9 = vpop.f32.mrb[180].mxu0 }
 0x264   : > { %v1773_v54 = vpop.f32.mrb[166].mxu1  ;;  %v3875_v15 = vpop.f32.mrb[181].mxu0 }
 0x265   : > { %3611 = vst [vmem:[%s4677_s29 + $0x140] sm:$0xff] %v3530_v53   ;;  %v2196_v2 = vadd.f32 %v2195_v12, %v1771_v43  ;;  %v1774_v56 = vadd.f32 %v4958_v39, %v1773_v54  ;;  %v1775_v6 = vpop.f32.mrb[167].mxu1  ;;  %v2230_v17 = vpop.f32.mrb[182].mxu0 }
 0x266   : > { %v3876_v13 = vpop.f32.mrb[183].mxu0 }
 0x267   : > { %v2199_v10 = vadd.f32 %v2198_v11, %v1774_v56  ;;  %v2340_v5 = vmax.f32 %v2196_v2, 0.0 }
 0x269   : > { %v2341_v61 = vmax.f32 %v2199_v10, 0.0 }
 0x26a   : > { %v1778_v4 = vpop.f32.mrb[168].mxu1 }
 0x26b   : > { %v3535_v58 = vpack.c.bf16 %v2341_v61, %v2340_v5  ;;  %v1779_v16 = vadd.f32 %v4958_v39, %v1778_v4  ;;  %v1780_v8 = vpop.f32.mrb[169].mxu1  ;;  %v2235_v23 = vpop.f32.mrb[184].mxu0 }
 0x26c   : > { %v1781_v63 = vpop.f32.mrb[170].mxu1  ;;  %v3879_v34 = vpop.f32.mrb[185].mxu0 }
 0x26d   : > { %3612 = vst [vmem:[%s4677_s29 + $0x148] sm:$0xff] %v3535_v58   ;;  %v2204_v19 = vadd.f32 %v2203_v26, %v1779_v16  ;;  %v1782_v12 = vadd.f32 %v4958_v39, %v1781_v63  ;;  %v1783_v21 = vpop.f32.mrb[171].mxu1  ;;  %v2238_v31 = vpop.f32.mrb[186].mxu0 }
 0x26e   : > { %v3880_v27 = vpop.f32.mrb[187].mxu0 }
 0x26f   : > { %v2207_v24 = vadd.f32 %v2206_v32, %v1782_v12  ;;  %v2342_v11 = vmax.f32 %v2204_v19, 0.0 }
 0x271   : > { %v2343_v14 = vmax.f32 %v2207_v24, 0.0 }
 0x272   : > { %v1786_v3 = vpop.f32.mrb[172].mxu1 }
 0x273   : > { %v3540_v20 = vpack.c.bf16 %v2343_v14, %v2342_v11  ;;  %v1787_v28 = vadd.f32 %v4958_v39, %v1786_v3  ;;  %v1788_v7 = vpop.f32.mrb[173].mxu1  ;;  %v2243_v29 = vpop.f32.mrb[188].mxu0 }
 0x274   : > { %v1789_v22 = vpop.f32.mrb[174].mxu1  ;;  %v3883_v60 = vpop.f32.mrb[189].mxu0 }
 0x275   : > { %3613 = vst [vmem:[%s4677_s29 + $0x150] sm:$0xff] %v3540_v20   ;;  %v2212_v18 = vadd.f32 %v2211_v41, %v1787_v28  ;;  %v1790_v26 = vadd.f32 %v4958_v39, %v1789_v22  ;;  %v1791_v37 = vpop.f32.mrb[175].mxu1  ;;  %v2246_v45 = vpop.f32.mrb[190].mxu0 }
 0x276   : > { %v3884_v35 = vpop.f32.mrb[191].mxu0 }
 0x277   : > { %v2215_v38 = vadd.f32 %v2214_v48, %v1790_v26  ;;  %v2344_v32 = vmax.f32 %v2212_v18, 0.0 }
 0x279   : > { %v2345_v30 = vmax.f32 %v2215_v38, 0.0 }
 0x27a   : > { %v1794_v42 = vpop.f32.mrb[176].mxu1 }
 0x27b   : > { %v3545_v33 = vpack.c.bf16 %v2345_v30, %v2344_v32  ;;  %v1795_v25 = vadd.f32 %v4958_v39, %v1794_v42  ;;  %v1796_v52 = vpop.f32.mrb[177].mxu1  ;;  %v2251_v50 = vpop.f32.mrb[192].mxu0 }
 0x27c   : > { %v1797_v44 = vpop.f32.mrb[178].mxu1  ;;  %v3887_v43 = vpop.f32.mrb[193].mxu0 }
 0x27d   : > { %3614 = vst [vmem:[%s4677_s29 + $0x158] sm:$0xff] %v3545_v33   ;;  %v2220_v46 = vadd.f32 %v2219_v47, %v1795_v25  ;;  %v1798_v41 = vadd.f32 %v4958_v39, %v1797_v44  ;;  %v1799_v49 = vpop.f32.mrb[179].mxu1  ;;  %v2254_v0 = vpop.f32.mrb[194].mxu0 }
 0x27e   : > { %v3888_v56 = vpop.f32.mrb[195].mxu0 }
 0x27f   : > { %v2223_v55 = vadd.f32 %v2222_v1, %v1798_v41  ;;  %v2346_v48 = vmax.f32 %v2220_v46, 0.0 }
 0x281   : > { %v2347_v36 = vmax.f32 %v2223_v55, 0.0 }
 0x282   : > { %v1802_v62 = vpop.f32.mrb[180].mxu1 }
 0x283   : > { %v3550_v40 = vpack.c.bf16 %v2347_v36, %v2346_v48  ;;  %v1803_v57 = vadd.f32 %v4958_v39, %v1802_v62  ;;  %v1804_v53 = vpop.f32.mrb[181].mxu1 }
 0x284   : > { %v1805_v51 = vpop.f32.mrb[182].mxu1 }
 0x285   : > { %3615 = vst [vmem:[%s4677_s29 + $0x160] sm:$0xff] %v3550_v40   ;;  %v2228_v54 = vadd.f32 %v2227_v9, %v1803_v57  ;;  %v1806_v47 = vadd.f32 %v4958_v39, %v1805_v51  ;;  %v1807_v2 = vpop.f32.mrb[183].mxu1 }
 0x287   : > { %v2231_v6 = vadd.f32 %v2230_v17, %v1806_v47  ;;  %v2348_v1 = vmax.f32 %v2228_v54, 0.0 }
 0x289   : > { %v2349_v59 = vmax.f32 %v2231_v6, 0.0 }
 0x28a   : > { %v1810_v10 = vpop.f32.mrb[184].mxu1 }
 0x28b   : > { %v3555_v5 = vpack.c.bf16 %v2349_v59, %v2348_v1  ;;  %v1811_v61 = vadd.f32 %v4958_v39, %v1810_v10  ;;  %v1812_v4 = vpop.f32.mrb[185].mxu1 }
 0x28c   : > { %v1813_v58 = vpop.f32.mrb[186].mxu1 }
 0x28d   : > { %3616 = vst [vmem:[%s4677_s29 + $0x168] sm:$0xff] %v3555_v5   ;;  %v2236_v16 = vadd.f32 %v2235_v23, %v1811_v61  ;;  %v1814_v8 = vadd.f32 %v4958_v39, %v1813_v58  ;;  %v1815_v15 = vpop.f32.mrb[187].mxu1 }
 0x28f   : > { %v2239_v9 = vadd.f32 %v2238_v31, %v1814_v8  ;;  %v2350_v63 = vmax.f32 %v2236_v16, 0.0 }
 0x291   : > { %v2351_v19 = vmax.f32 %v2239_v9, 0.0 }
 0x292   : > { %v1818_v12 = vpop.f32.mrb[188].mxu1 }
 0x293   : > { %v3560_v21 = vpack.c.bf16 %v2351_v19, %v2350_v63  ;;  %v1819_v17 = vadd.f32 %v4958_v39, %v1818_v12  ;;  %v1820_v13 = vpop.f32.mrb[189].mxu1 }
 0x294   : > { %v1821_v24 = vpop.f32.mrb[190].mxu1 }
 0x295   : > { %3617 = vst [vmem:[%s4677_s29 + $0x170] sm:$0xff] %v3560_v21   ;;  %v2244_v11 = vadd.f32 %v2243_v29, %v1819_v17  ;;  %v1822_v14 = vadd.f32 %v4958_v39, %v1821_v24  ;;  %v1823_v3 = vpop.f32.mrb[191].mxu1 }
 0x297   : > { %v2247_v20 = vadd.f32 %v2246_v45, %v1822_v14  ;;  %v2352_v23 = vmax.f32 %v2244_v11, 0.0 }
 0x299   : > { %v2353_v28 = vmax.f32 %v2247_v20, 0.0 }
 0x29a   : > { %v1826_v7 = vpop.f32.mrb[192].mxu1 }
 0x29b   : > { %v3565_v34 = vpack.c.bf16 %v2353_v28, %v2352_v23  ;;  %v1827_v22 = vadd.f32 %v4958_v39, %v1826_v7  ;;  %v1828_v31 = vpop.f32.mrb[193].mxu1 }
 0x29c   : > { %v1829_v18 = vpop.f32.mrb[194].mxu1 }
 0x29d   : > { %3618 = vst [vmem:[%s4677_s29 + $0x178] sm:$0xff] %v3565_v34   ;;  %v2252_v26 = vadd.f32 %v2251_v50, %v1827_v22  ;;  %v1830_v37 = vadd.f32 %v4958_v39, %v1829_v18  ;;  %v1831_v27 = vpop.f32.mrb[195].mxu1 }
 0x29f   : > { %v2255_v38 = vadd.f32 %v2254_v0, %v1830_v37  ;;  %v2354_v32 = vmax.f32 %v2252_v26, 0.0 }
 0x2a1   : > { %v2355_v30 = vmax.f32 %v2255_v38, 0.0 }
 0x2a3   : > { %v3570_v42 = vpack.c.bf16 %v2355_v30, %v2354_v32 }
 0x2a5   : > { %3619 = vst [vmem:[%s4677_s29 + $0x180] sm:$0xff] %v3570_v42  }
 0x2a6 PF: > { %s13_s14 = sadd.s32 1, %s4356_s14   ;;  %s5053_s12 = smov %s4352_s13 }
 0x2a7   : > { %p10_p5 = scmp.ge.s32.totalorder %s13_s14, 4   ;;  %s5054_s13 = smov %s5056_s15 }
 0x2a9   :  { %12 = sbr.rel (!%p10_p5) target bundleno = 2 (0x2), region = 68 }

// kernel: _lambda_.6
= control target key start
LH: loop header
LB: loop body
LE: loop exit
PB: predicated region body
PF: predicated region fallthrough
CT: control target
= control target key end

     0   :  { %v3128_v0 = vmov 0   ;;  %v3129_v39 = vmov 0.0   ;;  %vm3130_vm0 = vmmov 0   ;;  %s4017_s1 = inlined_call_operand.vmem [shape: bf16[640,128], index: 1, kind: input, shape index: {}]   ;;  %s4018_s0 = inlined_call_operand.vmem [shape: bf16[392,640], index: 0, kind: input, shape index: {}]   ;;  %s4019_s2 = inlined_call_operand.vmem [shape: f32[1,128], index: 2, kind: input, shape index: {}]   ;;  %s4020_s3 = inlined_call_operand.vmem [shape: bf16[392,128], index: 3, kind: output, shape index: {}]  }
   0x1   :  { %1131 = vmatprep.subr.bf16.mxu1 %v3128_v0  ;;  %1363 = vmatprep.subr.bf16.mxu0 %v3128_v0  ;;  %v2915_v1 = vld [vmem:[%s4017_s1] sm:$0xff]   ;;  %v2917_v3 = vld [vmem:[%s4017_s1 + $0x8] sm:$0xff]   ;;  %v2919_v5 = vld [vmem:[%s4017_s1 + $0x10] sm:$0xff]  }
   0x2   :  { %v3159_v2 = vld [vmem:[%s4017_s1 + $0x80] sm:$0xff]   ;;  %1132 = vmatpush1.bf16.msra.mxu1 %v2915_v1  ;;  %v3169_v4 = vld [vmem:[%s4017_s1 + $0x88] sm:$0xff]   ;;  %v3180_v6 = vld [vmem:[%s4017_s1 + $0x90] sm:$0xff]  }
   0x3   :  { %1364 = vmatpush1.bf16.msra.mxu0 %v3159_v2  ;;  %1133 = vmatprep.subr.bf16.mxu1 %v3128_v0  ;;  %v2921_v7 = vld [vmem:[%s4017_s1 + $0x18] sm:$0xff]   ;;  %v2923_v9 = vld [vmem:[%s4017_s1 + $0x20] sm:$0xff]   ;;  %v2925_v11 = vld [vmem:[%s4017_s1 + $0x28] sm:$0xff]  }
   0x4   :  { %1365 = vmatprep.subr.bf16.mxu0 %v3128_v0  ;;  %v3191_v8 = vld [vmem:[%s4017_s1 + $0x98] sm:$0xff]   ;;  %v3202_v10 = vld [vmem:[%s4017_s1 + $0xa0] sm:$0xff]   ;;  %v3213_v12 = vld [vmem:[%s4017_s1 + $0xa8] sm:$0xff]  }
   0x5   :  { %v2927_v13 = vld [vmem:[%s4017_s1 + $0x30] sm:$0xff]   ;;  %v2929_v15 = vld [vmem:[%s4017_s1 + $0x38] sm:$0xff]   ;;  %v2931_v17 = vld [vmem:[%s4017_s1 + $0x40] sm:$0xff]  }
   0x6   :  { %1134 = vmatpush1.bf16.msra.mxu1 %v2917_v3  ;;  %v3224_v14 = vld [vmem:[%s4017_s1 + $0xb0] sm:$0xff]   ;;  %v3235_v16 = vld [vmem:[%s4017_s1 + $0xb8] sm:$0xff]   ;;  %v3246_v18 = vld [vmem:[%s4017_s1 + $0xc0] sm:$0xff]  }
   0x7   :  { %1366 = vmatpush1.bf16.msra.mxu0 %v3169_v4  ;;  %1135 = vmatprep.subr.bf16.mxu1 %v3128_v0  ;;  %v2949_v19 = vld [vmem:[%s4018_s0 + $0x4] ss:$20 sps:$4 sm:$0xff]   ;;  %v2933_v20 = vld [vmem:[%s4017_s1 + $0x48] sm:$0xff]   ;;  %v2935_v23 = vld [vmem:[%s4017_s1 + $0x50] sm:$0xff]  }
   0x8   :  { %1367 = vmatprep.subr.bf16.mxu0 %v3128_v0  ;;  %v2952_v21 = vld [vmem:[%s4018_s0 + $0xc] ss:$20 sps:$4 sm:$0xff]   ;;  %1163 = vmatprep.mubr.bf16.mxu1 %v2949_v19  ;;  %v3274_v24 = vld [vmem:[%s4017_s1 + $0xd0] sm:$0xff]   ;;  %v2937_v25 = vld [vmem:[%s4017_s1 + $0x58] sm:$0xff]  }
   0x9   :  { %v3263_v22 = vld [vmem:[%s4017_s1 + $0xc8] sm:$0xff]   ;;  %1395 = vmatprep.mubr.bf16.mxu0 %v2952_v21  ;;  %v3285_v26 = vld [vmem:[%s4017_s1 + $0xd8] sm:$0xff]   ;;  %v2939_v27 = vld [vmem:[%s4017_s1 + $0x60] sm:$0xff]  }
   0xa   :  { %1136 = vmatpush1.bf16.msra.mxu1 %v2919_v5  ;;  %v3296_v28 = vld [vmem:[%s4017_s1 + $0xe0] sm:$0xff]   ;;  %v2941_v29 = vld [vmem:[%s4017_s1 + $0x68] sm:$0xff]   ;;  %v2943_v31 = vld [vmem:[%s4017_s1 + $0x70] sm:$0xff]  }
   0xb   :  { %1368 = vmatpush1.bf16.msra.mxu0 %v3180_v6  ;;  %1137 = vmatprep.subr.bf16.mxu1 %v3128_v0  ;;  %v3307_v30 = vld [vmem:[%s4017_s1 + $0xe8] sm:$0xff]   ;;  %v3318_v32 = vld [vmem:[%s4017_s1 + $0xf0] sm:$0xff]   ;;  %v2945_v33 = vld [vmem:[%s4017_s1 + $0x78] sm:$0xff]  }
   0xc   :  { %1369 = vmatprep.subr.bf16.mxu0 %v3128_v0  ;;  %v3329_v34 = vld [vmem:[%s4017_s1 + $0xf8] sm:$0xff]   ;;  %v2947_v35 = vld [vmem:[%s4018_s0] ss:$20 sps:$4 sm:$0xff]   ;;  %v2960_v41 = vld [vmem:[%s4017_s1 + $0x108] sm:$0xff]  }
   0xd   :  { %v2950_v36 = vld [vmem:[%s4018_s0 + $0x8] ss:$20 sps:$4 sm:$0xff]   ;;  %v2954_v37 = vld [vmem:[%s4018_s0 + $0x2c] ss:$20 sps:$4 sm:$0xff]   ;;  %v2959_v43 = vld [vmem:[%s4018_s0 + $0x30] ss:$20 sps:$4 sm:$0xff]  }
   0xe   :  { %1138 = vmatpush1.bf16.msra.mxu1 %v2921_v7  ;;  %v2953_v38 = vld [vmem:[%s4017_s1 + $0x100] sm:$0xff]   ;;  %v2956_v40 = vld [vmem:[%s4018_s0 + $0x34] ss:$20 sps:$4 sm:$0xff]   ;;  %v2963_v45 = vld [vmem:[%s4018_s0 + $0x5c] ss:$20 sps:$4 sm:$0xff]  }
   0xf   :  { %1370 = vmatpush1.bf16.msra.mxu0 %v3191_v8  ;;  %1139 = vmatprep.subr.bf16.mxu1 %v3128_v0  ;;  %v2958_v42 = vld [vmem:[%s4018_s0 + $0x28] ss:$20 sps:$4 sm:$0xff]   ;;  %v2973_v46 = vld [vmem:[%s4017_s1 + $0x110] sm:$0xff]   ;;  %v2966_v49 = vld [vmem:[%s4018_s0 + $0x58] ss:$20 sps:$4 sm:$0xff]  }
  0x10   :  { %1371 = vmatprep.subr.bf16.mxu0 %v3128_v0  ;;  %v2961_v44 = vld [vmem:[%s4018_s0 + $0x54] ss:$20 sps:$4 sm:$0xff]   ;;  %v2965_v47 = vld [vmem:[%s4018_s0 + $0x50] ss:$20 sps:$4 sm:$0xff]   ;;  %v2986_v48 = vld [vmem:[%s4017_s1 + $0x118] sm:$0xff]  }
  0x11   :  { %v2967_v50 = vld [vmem:[%s4018_s0 + $0x7c] ss:$20 sps:$4 sm:$0xff]   ;;  %v2969_v51 = vld [vmem:[%s4018_s0 + $0x84] ss:$20 sps:$4 sm:$0xff]   ;;  %v3006_v53 = vld [vmem:[%s4017_s1 + $0x128] sm:$0xff]  }
  0x12   :  { %1140 = vmatpush1.bf16.msra.mxu1 %v2923_v9  ;;  %v2993_v52 = vld [vmem:[%s4017_s1 + $0x120] sm:$0xff]   ;;  %v2971_v54 = vld [vmem:[%s4018_s0 + $0x78] ss:$20 sps:$4 sm:$0xff]   ;;  %v3017_v58 = vld [vmem:[%s4017_s1 + $0x130] sm:$0xff]  }
  0x13   :  { %1372 = vmatpush1.bf16.msra.mxu0 %v3202_v10  ;;  %1141 = vmatprep.subr.bf16.mxu1 %v3128_v0  ;;  %v2972_v55 = vld [vmem:[%s4018_s0 + $0x80] ss:$20 sps:$4 sm:$0xff]   ;;  %v2974_v56 = vld [vmem:[%s4018_s0 + $0xa4] ss:$20 sps:$4 sm:$0xff]   ;;  %v2979_v61 = vld [vmem:[%s4018_s0 + $0xa8] ss:$20 sps:$4 sm:$0xff]  }
  0x14   :  { %1373 = vmatprep.subr.bf16.mxu0 %v3128_v0  ;;  %v2976_v57 = vld [vmem:[%s4018_s0 + $0xac] ss:$20 sps:$4 sm:$0xff]   ;;  %v3026_v60 = vld [vmem:[%s4017_s1 + $0x138] sm:$0xff]   ;;  %v2982_v63 = vld [vmem:[%s4018_s0 + $0xd4] ss:$20 sps:$4 sm:$0xff]  }
  0x15   :  { %v2978_v59 = vld [vmem:[%s4018_s0 + $0xa0] ss:$20 sps:$4 sm:$0xff]   ;;  %v2984_v1 = vld [vmem:[%s4018_s0 + $0xc8] ss:$20 sps:$4 sm:$0xff]   ;;  %v2991_v5 = vld [vmem:[%s4018_s0 + $0xf0] ss:$20 sps:$4 sm:$0xff]  }
  0x16   :  { %1142 = vmatpush1.bf16.msra.mxu1 %v2925_v11  ;;  %v2980_v62 = vld [vmem:[%s4018_s0 + $0xcc] ss:$20 sps:$4 sm:$0xff]   ;;  %v2987_v3 = vld [vmem:[%s4018_s0 + $0xf4] ss:$20 sps:$4 sm:$0xff]   ;;  %v2994_v7 = vld [vmem:[%s4018_s0 + $0x11c] ss:$20 sps:$4 sm:$0xff]  }
  0x17   :  { %1374 = vmatpush1.bf16.msra.mxu0 %v3213_v12  ;;  %1143 = vmatprep.subr.bf16.mxu1 %v3128_v0  ;;  %v2998_v9 = vld [vmem:[%s4018_s0 + $0x118] ss:$20 sps:$4 sm:$0xff]   ;;  %v3015_v19 = vld [vmem:[%s4018_s0 + $0x19c] ss:$20 sps:$4 sm:$0xff]  }
  0x18   :  { %1375 = vmatprep.subr.bf16.mxu0 %v3128_v0  ;;  %v3000_v11 = vld [vmem:[%s4018_s0 + $0x144] ss:$20 sps:$4 sm:$0xff]  }
  0x19   :  { %v3019_v21 = vld [vmem:[%s4018_s0 + $0x198] ss:$20 sps:$4 sm:$0xff]  }
  0x1a   :  { %1144 = vmatpush1.bf16.msra.mxu1 %v2927_v13  ;;  %v3004_v13 = vld [vmem:[%s4018_s0 + $0x140] ss:$20 sps:$4 sm:$0xff]  }
  0x1b   :  { %1376 = vmatpush1.bf16.msra.mxu0 %v3224_v14  ;;  %1145 = vmatprep.subr.bf16.mxu1 %v3128_v0 }
  0x1c   :  { %1377 = vmatprep.subr.bf16.mxu0 %v3128_v0 }
  0x1e   :  { %1146 = vmatpush1.bf16.msra.mxu1 %v2929_v15  ;;  %v3007_v15 = vld [vmem:[%s4018_s0 + $0x16c] ss:$20 sps:$4 sm:$0xff]  }
  0x1f   :  { %1378 = vmatpush1.bf16.msra.mxu0 %v3235_v16  ;;  %1147 = vmatprep.subr.bf16.mxu1 %v3128_v0 }
  0x20   :  { %1379 = vmatprep.subr.bf16.mxu0 %v3128_v0 }
  0x22   :  { %1148 = vmatpush1.bf16.msra.mxu1 %v2931_v17  ;;  %v3012_v17 = vld [vmem:[%s4018_s0 + $0x170] ss:$20 sps:$4 sm:$0xff]  }
  0x23   :  { %1380 = vmatpush1.bf16.msra.mxu0 %v3246_v18  ;;  %1149 = vmatprep.subr.bf16.mxu1 %v3128_v0 }
  0x24   :  { %1381 = vmatprep.subr.bf16.mxu0 %v3128_v0 }
  0x26   :  { %1150 = vmatpush1.bf16.msra.mxu1 %v2933_v20  ;;  %v3018_v20 = vld [vmem:[%s4018_s0 + $0x190] ss:$20 sps:$4 sm:$0xff]  }
  0x27   :  { %1382 = vmatpush1.bf16.msra.mxu0 %v3263_v22  ;;  %1151 = vmatprep.subr.bf16.mxu1 %v3128_v0 }
  0x28   :  { %1383 = vmatprep.subr.bf16.mxu0 %v3128_v0 }
  0x2a   :  { %1152 = vmatpush1.bf16.msra.mxu1 %v2935_v23  ;;  %v3022_v23 = vld [vmem:[%s4018_s0 + $0x1c4] ss:$20 sps:$4 sm:$0xff]  }
  0x2b   :  { %1384 = vmatpush1.bf16.msra.mxu0 %v3274_v24  ;;  %1153 = vmatprep.subr.bf16.mxu1 %v3128_v0 }
  0x2c   :  { %1385 = vmatprep.subr.bf16.mxu0 %v3128_v0 }
  0x2e   :  { %1154 = vmatpush1.bf16.msra.mxu1 %v2937_v25  ;;  %v3025_v25 = vld [vmem:[%s4018_s0 + $0x1c0] ss:$20 sps:$4 sm:$0xff]  }
  0x2f   :  { %1386 = vmatpush1.bf16.msra.mxu0 %v3285_v26  ;;  %1155 = vmatprep.subr.bf16.mxu1 %v3128_v0 }
  0x30   :  { %1387 = vmatprep.subr.bf16.mxu0 %v3128_v0 }
  0x32   :  { %1156 = vmatpush1.bf16.msra.mxu1 %v2939_v27  ;;  %v3029_v27 = vld [vmem:[%s4018_s0 + $0x1ec] ss:$20 sps:$4 sm:$0xff]  }
  0x33   :  { %1388 = vmatpush1.bf16.msra.mxu0 %v3296_v28  ;;  %1157 = vmatprep.subr.bf16.mxu1 %v3128_v0 }
  0x34   :  { %1389 = vmatprep.subr.bf16.mxu0 %v3128_v0 }
  0x36   :  { %1158 = vmatpush1.bf16.msra.mxu1 %v2941_v29  ;;  %v3032_v29 = vld [vmem:[%s4018_s0 + $0x1e8] ss:$20 sps:$4 sm:$0xff]  }
  0x37   :  { %1390 = vmatpush1.bf16.msra.mxu0 %v3307_v30  ;;  %1159 = vmatprep.subr.bf16.mxu1 %v3128_v0 }
  0x38   :  { %1391 = vmatprep.subr.bf16.mxu0 %v3128_v0 }
  0x3a   :  { %1160 = vmatpush1.bf16.msra.mxu1 %v2943_v31  ;;  %v3035_v31 = vld [vmem:[%s4018_s0 + $0x208] ss:$20 sps:$4 sm:$0xff]  }
  0x3b   :  { %1392 = vmatpush1.bf16.msra.mxu0 %v3318_v32  ;;  %1161 = vmatprep.subr.bf16.mxu1 %v3128_v0 }
  0x3c   :  { %1393 = vmatprep.subr.bf16.mxu0 %v3128_v0 }
  0x3e   :  { %1162 = vmatpush1.bf16.msra.mxu1 %v2945_v33  ;;  %v3037_v33 = vld [vmem:[%s4018_s0 + $0x234] ss:$20 sps:$4 sm:$0xff]  }
  0x3f   :  { %1394 = vmatpush1.bf16.msra.mxu0 %v3329_v34  ;;  %2682 = vmatprep.subr.bf16.mxu1 %v3128_v0 }
  0x40   :  { %2566 = vmatprep.subr.bf16.mxu0 %v3129_v39 }
  0x41   :  { %1164 = vmatmul.mubr.bf16.vlgmr.msra.gmra.mrb[0].mxu1 %v2947_v35  ;;  %v3040_v35 = vld [vmem:[%s4018_s0 + $0x38] ss:$20 sps:$4 sm:$0xff]  }
  0x42   :  { %1396 = vmatmul.mubr.bf16.vlgmr.msra.gmra.mrb[0].mxu0 %v2950_v36  ;;  %1171 = vmatprep.mubr.bf16.mxu1 %v2954_v37  ;;  %v3041_v36 = vld [vmem:[%s4018_s0 + $0x25c] ss:$20 sps:$4 sm:$0xff]   ;;  %v3043_v37 = vld [vmem:[%s4018_s0 + $0x258] ss:$20 sps:$4 sm:$0xff]  }
  0x43   :  { %2567 = vmatpush3.bf16.msra.mxu0 %v2953_v38  ;;  %2698 = vmatpush1.bf16.msra.mxu1 %v3159_v2  ;;  %v2985_v2 = vld [vmem:[%s4018_s0 + $0xd0] ss:$20 sps:$4 sm:$0xff]   ;;  %v3044_v38 = vld [vmem:[%s4018_s0 + $0x60] ss:$20 sps:$4 sm:$0xff]  }
  0x44   :  { %1403 = vmatprep.mubr.bf16.mxu0 %v2956_v40  ;;  %2568 = vmatprep.subr.bf16.mxu0 %v3129_v39  ;;  %v3045_v40 = vld [vmem:[%s4018_s0 + $0x284] ss:$20 sps:$4 sm:$0xff]  }
  0x45   :  { %2683 = vmatprep.subr.bf16.mxu1 %v3128_v0 }
  0x47   :  { %2569 = vmatpush3.bf16.msra.mxu0 %v2960_v41  ;;  %2699 = vmatpush1.bf16.msra.mxu1 %v3169_v4  ;;  %v2989_v4 = vld [vmem:[%s4018_s0 + $0xfc] ss:$20 sps:$4 sm:$0xff]   ;;  %v3047_v41 = vld [vmem:[%s4018_s0 + $0x280] ss:$20 sps:$4 sm:$0xff]  }
  0x48   :  { %2570 = vmatprep.subr.bf16.mxu0 %v3129_v39  ;;  %2684 = vmatprep.subr.bf16.mxu1 %v3128_v0 }
  0x49   :  { %1172 = vmatmul.mubr.bf16.gmra.mrb[4].mxu1 %v2958_v42  ;;  %v3048_v42 = vld [vmem:[%s4018_s0 + $0x88] ss:$20 sps:$4 sm:$0xff]  }
  0x4a   :  { %1404 = vmatmul.mubr.bf16.gmra.mrb[4].mxu0 %v2959_v43  ;;  %1179 = vmatprep.mubr.bf16.mxu1 %v2961_v44  ;;  %v3049_v43 = vld [vmem:[%s4018_s0 + $0x2ac] ss:$20 sps:$4 sm:$0xff]   ;;  %v3051_v44 = vld [vmem:[%s4018_s0 + $0x2a8] ss:$20 sps:$4 sm:$0xff]  }
  0x4b   :  { %1411 = vmatprep.mubr.bf16.mxu0 %v2963_v45  ;;  %2571 = vmatpush3.bf16.msra.mxu0 %v2973_v46  ;;  %v3052_v45 = vld [vmem:[%s4018_s0 + $0xb0] ss:$20 sps:$4 sm:$0xff]   ;;  %v3053_v46 = vld [vmem:[%s4018_s0 + $0x2d4] ss:$20 sps:$4 sm:$0xff]  }
  0x4c   :  { %2700 = vmatpush1.bf16.msra.mxu1 %v3180_v6  ;;  %2572 = vmatprep.subr.bf16.mxu0 %v3129_v39  ;;  %v2992_v6 = vld [vmem:[%s4018_s0 + $0xf8] ss:$20 sps:$4 sm:$0xff]  }
  0x4d   :  { %2685 = vmatprep.subr.bf16.mxu1 %v3128_v0 }
  0x4f   :  { %2573 = vmatpush3.bf16.msra.mxu0 %v2986_v48  ;;  %v3056_v48 = vld [vmem:[%s4018_s0 + $0xd8] ss:$20 sps:$4 sm:$0xff]  }
  0x50   :  { %2701 = vmatpush1.bf16.msra.mxu1 %v3191_v8  ;;  %2574 = vmatprep.subr.bf16.mxu0 %v3129_v39  ;;  %v2996_v8 = vld [vmem:[%s4018_s0 + $0x124] ss:$20 sps:$4 sm:$0xff]  }
  0x51   :  { %1180 = vmatmul.mubr.bf16.gmra.mrb[8].mxu1 %v2965_v47  ;;  %2686 = vmatprep.subr.bf16.mxu1 %v3128_v0  ;;  %v3055_v47 = vld [vmem:[%s4018_s0 + $0x2d0] ss:$20 sps:$4 sm:$0xff]  }
  0x52   :  { %1412 = vmatmul.mubr.bf16.gmra.mrb[8].mxu0 %v2966_v49  ;;  %1187 = vmatprep.mubr.bf16.mxu1 %v2967_v50  ;;  %v3057_v49 = vld [vmem:[%s4018_s0 + $0x2fc] ss:$20 sps:$4 sm:$0xff]   ;;  %v3059_v50 = vld [vmem:[%s4018_s0 + $0x2f8] ss:$20 sps:$4 sm:$0xff]  }
  0x53   :  { %1419 = vmatprep.mubr.bf16.mxu0 %v2969_v51  ;;  %2575 = vmatpush3.bf16.msra.mxu0 %v2993_v52  ;;  %v3060_v51 = vld [vmem:[%s4018_s0 + $0x100] ss:$20 sps:$4 sm:$0xff]   ;;  %v3061_v52 = vld [vmem:[%s4018_s0 + $0x324] ss:$20 sps:$4 sm:$0xff]  }
  0x54   :  { %2702 = vmatpush1.bf16.msra.mxu1 %v3202_v10  ;;  %2576 = vmatprep.subr.bf16.mxu0 %v3129_v39  ;;  %v2999_v10 = vld [vmem:[%s4018_s0 + $0x120] ss:$20 sps:$4 sm:$0xff]  }
  0x55   :  { %2687 = vmatprep.subr.bf16.mxu1 %v3128_v0 }
  0x57   :  { %2577 = vmatpush3.bf16.msra.mxu0 %v3006_v53  ;;  %v3063_v53 = vld [vmem:[%s4018_s0 + $0x320] ss:$20 sps:$4 sm:$0xff]  }
  0x58   :  { %2703 = vmatpush1.bf16.msra.mxu1 %v3213_v12  ;;  %2578 = vmatprep.subr.bf16.mxu0 %v3129_v39  ;;  %v3002_v12 = vld [vmem:[%s4018_s0 + $0x14c] ss:$20 sps:$4 sm:$0xff]  }
  0x59   :  { %1188 = vmatmul.mubr.bf16.gmra.mrb[12].mxu1 %v2971_v54  ;;  %2688 = vmatprep.subr.bf16.mxu1 %v3128_v0  ;;  %v3064_v54 = vld [vmem:[%s4018_s0 + $0x128] ss:$20 sps:$4 sm:$0xff]  }
  0x5a   :  { %1420 = vmatmul.mubr.bf16.gmra.mrb[12].mxu0 %v2972_v55  ;;  %1195 = vmatprep.mubr.bf16.mxu1 %v2974_v56  ;;  %v3065_v55 = vld [vmem:[%s4018_s0 + $0x34c] ss:$20 sps:$4 sm:$0xff]   ;;  %v3067_v56 = vld [vmem:[%s4018_s0 + $0x348] ss:$20 sps:$4 sm:$0xff]  }
  0x5b   :  { %1427 = vmatprep.mubr.bf16.mxu0 %v2976_v57  ;;  %2579 = vmatpush3.bf16.msra.mxu0 %v3017_v58  ;;  %v3068_v57 = vld [vmem:[%s4018_s0 + $0x150] ss:$20 sps:$4 sm:$0xff]   ;;  %v3069_v58 = vld [vmem:[%s4018_s0 + $0x374] ss:$20 sps:$4 sm:$0xff]  }
  0x5c   :  { %2704 = vmatpush1.bf16.msra.mxu1 %v3224_v14  ;;  %2580 = vmatprep.subr.bf16.mxu0 %v3129_v39  ;;  %v3005_v14 = vld [vmem:[%s4018_s0 + $0x148] ss:$20 sps:$4 sm:$0xff]  }
  0x5d   :  { %2689 = vmatprep.subr.bf16.mxu1 %v3128_v0 }
  0x5f   :  { %2581 = vmatpush3.bf16.msra.mxu0 %v3026_v60  ;;  %v3072_v60 = vld [vmem:[%s4018_s0 + $0x178] ss:$20 sps:$4 sm:$0xff]  }
  0x60   :  { %2705 = vmatpush1.bf16.msra.mxu1 %v3235_v16  ;;  %v3009_v16 = vld [vmem:[%s4018_s0 + $0x174] ss:$20 sps:$4 sm:$0xff]  }
  0x61   :  { %1196 = vmatmul.mubr.bf16.gmra.mrb[16].mxu1 %v2978_v59  ;;  %2690 = vmatprep.subr.bf16.mxu1 %v3128_v0  ;;  %v3071_v59 = vld [vmem:[%s4018_s0 + $0x370] ss:$20 sps:$4 sm:$0xff]  }
  0x62   :  { %1428 = vmatmul.mubr.bf16.gmra.mrb[16].mxu0 %v2979_v61  ;;  %1203 = vmatprep.mubr.bf16.mxu1 %v2980_v62  ;;  %v3073_v61 = vld [vmem:[%s4018_s0 + $0x39c] ss:$20 sps:$4 sm:$0xff]   ;;  %v159_v62 = vld [vmem:[%s4018_s0 + $0x3c0] sm:$0xff] }
  0x63   :  { %1435 = vmatprep.mubr.bf16.mxu0 %v2982_v63  ;;  %v3075_v63 = vld [vmem:[%s4018_s0 + $0x398] ss:$20 sps:$4 sm:$0xff]  }
  0x64   :  { %2706 = vmatpush1.bf16.msra.mxu1 %v3246_v18  ;;  %v3013_v18 = vld [vmem:[%s4018_s0 + $0x194] ss:$20 sps:$4 sm:$0xff]  }
  0x65   :  { %2691 = vmatprep.subr.bf16.mxu1 %v3128_v0 }
  0x68   :  { %2707 = vmatpush1.bf16.msra.mxu1 %v3263_v22  ;;  %v3020_v22 = vld [vmem:[%s4018_s0 + $0x1bc] ss:$20 sps:$4 sm:$0xff]  }
  0x69   :  { %1204 = vmatmul.mubr.bf16.gmra.mrb[20].mxu1 %v2984_v1  ;;  %2692 = vmatprep.subr.bf16.mxu1 %v3128_v0  ;;  %v3076_v1 = vld [vmem:[%s4018_s0 + $0x1a0] ss:$20 sps:$4 sm:$0xff]  }
  0x6a   :  { %1436 = vmatmul.mubr.bf16.gmra.mrb[20].mxu0 %v2985_v2  ;;  %1211 = vmatprep.mubr.bf16.mxu1 %v2987_v3  ;;  %v2248_v2 = vcombine.high %v159_v62, %v159_v62  ;;  %v2247_v3 = vcombine.low %v159_v62, %v159_v62 }
  0x6b   :  { %1443 = vmatprep.mubr.bf16.mxu0 %v2989_v4  ;;  %v3079_v4 = vld [vmem:[%s4018_s0 + $0x1c8] ss:$20 sps:$4 sm:$0xff]  }
  0x6c   :  { %2708 = vmatpush1.bf16.msra.mxu1 %v3274_v24  ;;  %v3024_v24 = vld [vmem:[%s4018_s0 + $0x1b8] ss:$20 sps:$4 sm:$0xff]  }
  0x6d   :  { %2693 = vmatprep.subr.bf16.mxu1 %v3128_v0 }
  0x70   :  { %2709 = vmatpush1.bf16.msra.mxu1 %v3285_v26  ;;  %v3027_v26 = vld [vmem:[%s4018_s0 + $0x1e4] ss:$20 sps:$4 sm:$0xff]  }
  0x71   :  { %1212 = vmatmul.mubr.bf16.gmra.mrb[24].mxu1 %v2991_v5  ;;  %2694 = vmatprep.subr.bf16.mxu1 %v3128_v0  ;;  %v3082_v5 = vld [vmem:[%s4018_s0 + $0x214] ss:$20 sps:$4 sm:$0xff]  }
  0x72   :  { %1444 = vmatmul.mubr.bf16.gmra.mrb[24].mxu0 %v2992_v6  ;;  %1219 = vmatprep.mubr.bf16.mxu1 %v2994_v7  ;;  %v3080_v6 = vld [vmem:[%s4018_s0 + $0x210] ss:$20 sps:$4 sm:$0xff]  }
  0x73   :  { %1451 = vmatprep.mubr.bf16.mxu0 %v2996_v8  ;;  %v3083_v7 = vld [vmem:[%s4018_s0 + $0x1f0] ss:$20 sps:$4 sm:$0xff]  }
  0x74   :  { %2710 = vmatpush1.bf16.msra.mxu1 %v3296_v28  ;;  %v3031_v28 = vld [vmem:[%s4018_s0 + $0x1e0] ss:$20 sps:$4 sm:$0xff]   ;;  %v3084_v8 = vld [vmem:[%s4018_s0 + $0x23c] ss:$20 sps:$4 sm:$0xff]  }
  0x75   :  { %2695 = vmatprep.subr.bf16.mxu1 %v3128_v0 }
  0x78   :  { %2711 = vmatpush1.bf16.msra.mxu1 %v3307_v30  ;;  %v3033_v30 = vld [vmem:[%s4018_s0 + $0x20c] ss:$20 sps:$4 sm:$0xff]  }
  0x79   :  { %1220 = vmatmul.mubr.bf16.gmra.mrb[28].mxu1 %v2998_v9  ;;  %2696 = vmatprep.subr.bf16.mxu1 %v3128_v0  ;;  %v3086_v9 = vld [vmem:[%s4018_s0 + $0x238] ss:$20 sps:$4 sm:$0xff]  }
  0x7a   :  { %1452 = vmatmul.mubr.bf16.gmra.mrb[28].mxu0 %v2999_v10  ;;  %1227 = vmatprep.mubr.bf16.mxu1 %v3000_v11  ;;  %v3087_v10 = vld [vmem:[%s4018_s0 + $0x218] ss:$20 sps:$4 sm:$0xff]  }
  0x7b   :  { %1459 = vmatprep.mubr.bf16.mxu0 %v3002_v12  ;;  %v3088_v11 = vld [vmem:[%s4018_s0 + $0x264] ss:$20 sps:$4 sm:$0xff]  }
  0x7c   :  { %2712 = vmatpush1.bf16.msra.mxu1 %v3318_v32  ;;  %v3036_v32 = vld [vmem:[%s4018_s0 + $0x10] ss:$20 sps:$4 sm:$0xff]  }
  0x7d   :  { %2697 = vmatprep.subr.bf16.mxu1 %v3128_v0  ;;  %v3011_v0 = vld [vmem:[%s4018_s0 + $0x168] ss:$20 sps:$4 sm:$0xff]  }
  0x80   :  { %2713 = vmatpush1.bf16.msra.mxu1 %v3329_v34  ;;  %v3039_v34 = vld [vmem:[%s4018_s0 + $0x230] ss:$20 sps:$4 sm:$0xff]  }
  0x81   :  { %1228 = vmatmul.mubr.bf16.gmra.mrb[32].mxu1 %v3004_v13 }
  0x82   :  { %1460 = vmatmul.mubr.bf16.gmra.mrb[32].mxu0 %v3005_v14  ;;  %1235 = vmatprep.mubr.bf16.mxu1 %v3007_v15  ;;  %v3090_v14 = vld [vmem:[%s4018_s0 + $0x260] ss:$20 sps:$4 sm:$0xff]  }
  0x83   :  { %1467 = vmatprep.mubr.bf16.mxu0 %v3009_v16  ;;  %v3091_v15 = vld [vmem:[%s4018_s0 + $0x240] ss:$20 sps:$4 sm:$0xff]  }
  0x89   :  { %1236 = vmatmul.mubr.bf16.gmra.mrb[36].mxu1 %v3011_v0  ;;  %v3092_v0 = vld [vmem:[%s4018_s0 + $0x28c] ss:$20 sps:$4 sm:$0xff]  }
  0x8a   :  { %1468 = vmatmul.mubr.bf16.gmra.mrb[36].mxu0 %v3012_v17  ;;  %1243 = vmatprep.mubr.bf16.mxu1 %v3013_v18 }
  0x8b   :  { %1475 = vmatprep.mubr.bf16.mxu0 %v3015_v19 }
  0x91   :  { %1244 = vmatmul.mubr.bf16.gmra.mrb[40].mxu1 %v3018_v20  ;;  %v3094_v20 = vld [vmem:[%s4018_s0 + $0x288] ss:$20 sps:$4 sm:$0xff]  }
  0x92   :  { %1476 = vmatmul.mubr.bf16.gmra.mrb[40].mxu0 %v3019_v21  ;;  %1251 = vmatprep.mubr.bf16.mxu1 %v3020_v22  ;;  %v3095_v21 = vld [vmem:[%s4018_s0 + $0x268] ss:$20 sps:$4 sm:$0xff]  }
  0x93   :  { %1483 = vmatprep.mubr.bf16.mxu0 %v3022_v23  ;;  %v3096_v23 = vld [vmem:[%s4018_s0 + $0x2b4] ss:$20 sps:$4 sm:$0xff]  }
  0x99   :  { %1252 = vmatmul.mubr.bf16.gmra.mrb[44].mxu1 %v3024_v24 }
  0x9a   :  { %1484 = vmatmul.mubr.bf16.gmra.mrb[44].mxu0 %v3025_v25  ;;  %1259 = vmatprep.mubr.bf16.mxu1 %v3027_v26 }
  0x9b   :  { %1491 = vmatprep.mubr.bf16.mxu0 %v3029_v27  ;;  %v3098_v27 = vld [vmem:[%s4018_s0 + $0x2b0] ss:$20 sps:$4 sm:$0xff]  }
  0xa1   :  { %1260 = vmatmul.mubr.bf16.gmra.mrb[48].mxu1 %v3031_v28  ;;  %v3099_v28 = vld [vmem:[%s4018_s0 + $0x290] ss:$20 sps:$4 sm:$0xff]  }
  0xa2   :  { %1492 = vmatmul.mubr.bf16.gmra.mrb[48].mxu0 %v3032_v29  ;;  %1267 = vmatprep.mubr.bf16.mxu1 %v3033_v30  ;;  %v3100_v30 = vld [vmem:[%s4018_s0 + $0x2dc] ss:$20 sps:$4 sm:$0xff]  }
  0xa3   :  { %2582 = vmatprep.mubr.msk.bf16.mxu0 %vm3130_vm0, %v3129_v39 }
  0xa9   :  { %1268 = vmatmul.mubr.bf16.gmra.mrb[52].mxu1 %v3035_v31 }
  0xaa   :  { %2583 = vmatmul.mubr.bf16.vlgmr.msra.gmra.mrb[0].mxu0 %v3036_v32  ;;  %1275 = vmatprep.mubr.bf16.mxu1 %v3037_v33 }
  0xab   :  { %2586 = vmatprep.mubr.msk.bf16.mxu0 %vm3130_vm0, %v3129_v39 }
  0xb1   :  { %1276 = vmatmul.mubr.bf16.gmra.mrb[56].mxu1 %v3039_v34  ;;  %v3102_v34 = vld [vmem:[%s4018_s0 + $0x2d8] ss:$20 sps:$4 sm:$0xff]  }
  0xb2   :  { %2587 = vmatmul.mubr.bf16.gmra.mrb[4].mxu0 %v3040_v35  ;;  %1283 = vmatprep.mubr.bf16.mxu1 %v3041_v36  ;;  %v3103_v35 = vld [vmem:[%s4018_s0 + $0x2b8] ss:$20 sps:$4 sm:$0xff]  }
  0xb3   :  { %2590 = vmatprep.mubr.msk.bf16.mxu0 %vm3130_vm0, %v3129_v39 }
  0xb9   :  { %1284 = vmatmul.mubr.bf16.gmra.mrb[60].mxu1 %v3043_v37  ;;  %v3104_v37 = vld [vmem:[%s4018_s0 + $0x304] ss:$20 sps:$4 sm:$0xff]  }
  0xba   :  { %2591 = vmatmul.mubr.bf16.gmra.mrb[8].mxu0 %v3044_v38  ;;  %1291 = vmatprep.mubr.bf16.mxu1 %v3045_v40 }
  0xbb   :  { %2594 = vmatprep.mubr.msk.bf16.mxu0 %vm3130_vm0, %v3129_v39 }
  0xc1   :  { %1292 = vmatmul.mubr.bf16.gmra.mrb[64].mxu1 %v3047_v41 }
  0xc2   :  { %2595 = vmatmul.mubr.bf16.gmra.mrb[12].mxu0 %v3048_v42  ;;  %1299 = vmatprep.mubr.bf16.mxu1 %v3049_v43  ;;  %v3106_v42 = vld [vmem:[%s4018_s0 + $0x300] ss:$20 sps:$4 sm:$0xff]  }
  0xc3   :  { %2598 = vmatprep.mubr.msk.bf16.mxu0 %vm3130_vm0, %v3129_v39  ;;  %v3107_v43 = vld [vmem:[%s4018_s0 + $0x2e0] ss:$20 sps:$4 sm:$0xff]  }
  0xc9   :  { %1300 = vmatmul.mubr.bf16.gmra.mrb[68].mxu1 %v3051_v44 }
  0xca   :  { %2599 = vmatmul.mubr.bf16.gmra.mrb[16].mxu0 %v3052_v45  ;;  %1307 = vmatprep.mubr.bf16.mxu1 %v3053_v46  ;;  %v3108_v45 = vld [vmem:[%s4018_s0 + $0x32c] ss:$20 sps:$4 sm:$0xff]  }
  0xcb   :  { %2602 = vmatprep.mubr.msk.bf16.mxu0 %vm3130_vm0, %v3129_v39 }
  0xd1   :  { %1308 = vmatmul.mubr.bf16.gmra.mrb[72].mxu1 %v3055_v47 }
  0xd2   :  { %2603 = vmatmul.mubr.bf16.gmra.mrb[20].mxu0 %v3056_v48  ;;  %1315 = vmatprep.mubr.bf16.mxu1 %v3057_v49  ;;  %v3110_v49 = vld [vmem:[%s4018_s0 + $0x328] ss:$20 sps:$4 sm:$0xff]  }
  0xd3   :  { %2606 = vmatprep.mubr.msk.bf16.mxu0 %vm3130_vm0, %v3129_v39 }
  0xd9   :  { %1316 = vmatmul.mubr.bf16.gmra.mrb[76].mxu1 %v3059_v50  ;;  %v3111_v50 = vld [vmem:[%s4018_s0 + $0x308] ss:$20 sps:$4 sm:$0xff]  }
  0xda   :  { %2607 = vmatmul.mubr.bf16.gmra.mrb[24].mxu0 %v3060_v51  ;;  %1323 = vmatprep.mubr.bf16.mxu1 %v3061_v52  ;;  %v3112_v52 = vld [vmem:[%s4018_s0 + $0x354] ss:$20 sps:$4 sm:$0xff]  }
  0xdb   :  { %2610 = vmatprep.mubr.msk.bf16.mxu0 %vm3130_vm0, %v3129_v39 }
  0xe1   :  { %1324 = vmatmul.mubr.bf16.gmra.mrb[80].mxu1 %v3063_v53 }
  0xe2   :  { %2611 = vmatmul.mubr.bf16.gmra.mrb[28].mxu0 %v3064_v54  ;;  %1331 = vmatprep.mubr.bf16.mxu1 %v3065_v55 }
  0xe3   :  { %2614 = vmatprep.mubr.msk.bf16.mxu0 %vm3130_vm0, %v3129_v39 }
  0xe9   :  { %1332 = vmatmul.mubr.bf16.gmra.mrb[84].mxu1 %v3067_v56  ;;  %v3114_v56 = vld [vmem:[%s4018_s0 + $0x350] ss:$20 sps:$4 sm:$0xff]  }
  0xea   :  { %2615 = vmatmul.mubr.bf16.gmra.mrb[32].mxu0 %v3068_v57  ;;  %1339 = vmatprep.mubr.bf16.mxu1 %v3069_v58  ;;  %v3115_v57 = vld [vmem:[%s4018_s0 + $0x330] ss:$20 sps:$4 sm:$0xff]  }
  0xeb   :  { %2618 = vmatprep.mubr.msk.bf16.mxu0 %vm3130_vm0, %v3129_v39 }
  0xf1   :  { %1340 = vmatmul.mubr.bf16.gmra.mrb[88].mxu1 %v3071_v59  ;;  %v3116_v59 = vld [vmem:[%s4018_s0 + $0x37c] ss:$20 sps:$4 sm:$0xff]  }
  0xf2   :  { %2619 = vmatmul.mubr.bf16.gmra.mrb[36].mxu0 %v3072_v60  ;;  %1347 = vmatprep.mubr.bf16.mxu1 %v3073_v61 }
  0xf3   :  { %2622 = vmatprep.mubr.msk.bf16.mxu0 %vm3130_vm0, %v3129_v39 }
  0xf9   :  { %1348 = vmatmul.mubr.bf16.gmra.mrb[92].mxu1 %v3075_v63  ;;  %v3118_v63 = vld [vmem:[%s4018_s0 + $0x378] ss:$20 sps:$4 sm:$0xff]  }
  0xfa   :  { %2623 = vmatmul.mubr.bf16.gmra.mrb[40].mxu0 %v3076_v1  ;;  %1355 = vmatprep.mubr.bf16.mxu1 %v2248_v2  ;;  %v3119_v1 = vld [vmem:[%s4018_s0 + $0x358] ss:$20 sps:$4 sm:$0xff]  }
  0xfb   :  { %2626 = vmatprep.mubr.msk.bf16.mxu0 %vm3130_vm0, %v3129_v39 }
 0x101   :  { %1356 = vmatmul.mubr.bf16.gmra.mrb[96].mxu1 %v2247_v3  ;;  %v3120_v3 = vld [vmem:[%s4018_s0 + $0x3a4] ss:$20 sps:$4 sm:$0xff]  }
 0x102   :  { %2627 = vmatmul.mubr.bf16.gmra.mrb[44].mxu0 %v3079_v4  ;;  %1499 = vmatprep.mubr.bf16.mxu1 %v3082_v5  ;;  %v160_v5 = vld [vmem:[%s4018_s0 + $0x3c8] sm:$0xff] }
 0x103   :  { %2630 = vmatprep.mubr.msk.bf16.mxu0 %vm3130_vm0, %v3129_v39 }
 0x109   :  { %1500 = vmatmul.mubr.bf16.vlgmr.msra.gmra.mrb[52].mxu1 %v3080_v6 }
 0x10a   :  { %2631 = vmatmul.mubr.bf16.gmra.mrb[48].mxu0 %v3083_v7  ;;  %1507 = vmatprep.mubr.bf16.mxu1 %v3084_v8  ;;  %v3122_v8 = vld [vmem:[%s4018_s0 + $0x3a0] ss:$20 sps:$4 sm:$0xff]  }
 0x10b   :  { %2634 = vmatprep.mubr.msk.bf16.mxu0 %vm3130_vm0, %v3129_v39 }
 0x111   :  { %1508 = vmatmul.mubr.bf16.gmra.mrb[56].mxu1 %v3086_v9  ;;  %v3123_v9 = vld [vmem:[%s4018_s0 + $0x380] ss:$20 sps:$4 sm:$0xff]  }
 0x112   :  { %2635 = vmatmul.mubr.bf16.gmra.mrb[52].mxu0 %v3087_v10  ;;  %1515 = vmatprep.mubr.bf16.mxu1 %v3088_v11  ;;  %v2250_v11 = vcombine.high %v160_v5, %v160_v5 }
 0x113   :  { %2638 = vmatprep.mubr.msk.bf16.mxu0 %vm3130_vm0, %v3129_v39 }
 0x114   :  { %v3703_v12 = vpop.f32.mrb[0].mxu1 }
 0x115   :  { %v1167_v13 = vpop.f32.mrb[1].mxu1 }
 0x116   :  { %v3711_v16 = vpop.f32.mrb[2].mxu1 }
 0x117   :  { %v1170_v17 = vpop.f32.mrb[3].mxu1 }
 0x118   :  { %v3126_v17 = vld [vmem:[%s4018_s0 + $0x3a8] ss:$20 sps:$4 sm:$0xff]  }
 0x119   :  { %1516 = vmatmul.mubr.bf16.gmra.mrb[60].mxu1 %v3090_v14 }
 0x11a   :  { %2639 = vmatmul.mubr.bf16.gmra.mrb[56].mxu0 %v3091_v15  ;;  %1523 = vmatprep.mubr.bf16.mxu1 %v3092_v0  ;;  %v2249_v0 = vcombine.low %v160_v5, %v160_v5 }
 0x11b   :  { %2642 = vmatprep.mubr.msk.bf16.mxu0 %vm3130_vm0, %v3129_v39 }
 0x11c   :  { %v3718_v18 = vpop.f32.mrb[4].mxu1 }
 0x11d   :  { %v1175_v19 = vpop.f32.mrb[5].mxu1 }
 0x11e   :  { %v3726_v22 = vpop.f32.mrb[6].mxu1 }
 0x11f   :  { %v1178_v24 = vpop.f32.mrb[7].mxu1 }
 0x120   :  { %v3127_v24 = vld [vmem:[%s4018_s0 + $0x3d0] ss:$0 sps:$4 sm:$0xff]  }
 0x121   :  { %1524 = vmatmul.mubr.bf16.gmra.mrb[64].mxu1 %v3094_v20 }
 0x122   :  { %2643 = vmatmul.mubr.bf16.gmra.mrb[60].mxu0 %v3095_v21  ;;  %1531 = vmatprep.mubr.bf16.mxu1 %v3096_v23 }
 0x123   :  { %2646 = vmatprep.mubr.msk.bf16.mxu0 %vm3130_vm0, %v3129_v39 }
 0x124   :  { %v3733_v25 = vpop.f32.mrb[8].mxu1 }
 0x125   :  { %v1183_v26 = vpop.f32.mrb[9].mxu1 }
 0x126   :  { %v3741_v29 = vpop.f32.mrb[10].mxu1 }
 0x127   :  { %v1186_v31 = vpop.f32.mrb[11].mxu1 }
 0x129   :  { %1532 = vmatmul.mubr.bf16.gmra.mrb[68].mxu1 %v3098_v27 }
 0x12a   :  { %2647 = vmatmul.mubr.bf16.gmra.mrb[64].mxu0 %v3099_v28  ;;  %1539 = vmatprep.mubr.bf16.mxu1 %v3100_v30 }
 0x12b   :  { %2650 = vmatprep.mubr.msk.bf16.mxu0 %vm3130_vm0, %v3129_v39 }
 0x12c   :  { %v3748_v32 = vpop.f32.mrb[12].mxu1 }
 0x12d   :  { %v1191_v33 = vpop.f32.mrb[13].mxu1 }
 0x12e   :  { %v3756_v36 = vpop.f32.mrb[14].mxu1 }
 0x12f   :  { %v1194_v38 = vpop.f32.mrb[15].mxu1 }
 0x130   :  { %v3865_v38 = vld [vmem:[%s4019_s2] ss:$0 sm:$0xff] }
 0x131   :  { %1540 = vmatmul.mubr.bf16.gmra.mrb[72].mxu1 %v3102_v34 }
 0x132   :  { %2651 = vmatmul.mubr.bf16.gmra.mrb[68].mxu0 %v3103_v35  ;;  %1547 = vmatprep.mubr.bf16.mxu1 %v3104_v37 }
 0x133   :  { %2654 = vmatprep.mubr.msk.bf16.mxu0 %vm3130_vm0, %v3129_v39 }
 0x134   :  { %v3763_v40 = vpop.f32.mrb[16].mxu1 }
 0x135   :  { %v1199_v41 = vpop.f32.mrb[17].mxu1 }
 0x136   :  { %v3771_v44 = vpop.f32.mrb[18].mxu1  ;;  %v1166_v41 = vadd.f32 %v3865_v38, %v3703_v12 }
 0x137   :  { %v1202_v46 = vpop.f32.mrb[19].mxu1 }
 0x139   :  { %1548 = vmatmul.mubr.bf16.gmra.mrb[76].mxu1 %v3106_v42 }
 0x13a   :  { %2655 = vmatmul.mubr.bf16.gmra.mrb[72].mxu0 %v3107_v43  ;;  %1555 = vmatprep.mubr.bf16.mxu1 %v3108_v45  ;;  %v1169_v43 = vadd.f32 %v3865_v38, %v3711_v16 }
 0x13b   :  { %2658 = vmatprep.mubr.msk.bf16.mxu0 %vm3130_vm0, %v3129_v39 }
 0x13c   :  { %v3778_v47 = vpop.f32.mrb[20].mxu1 }
 0x13d   :  { %v1207_v48 = vpop.f32.mrb[21].mxu1 }
 0x13e   :  { %v3786_v51 = vpop.f32.mrb[22].mxu1 }
 0x13f   :  { %v1210_v53 = vpop.f32.mrb[23].mxu1 }
 0x141   :  { %1556 = vmatmul.mubr.bf16.gmra.mrb[80].mxu1 %v3110_v49 }
 0x142   :  { %2659 = vmatmul.mubr.bf16.gmra.mrb[76].mxu0 %v3111_v50  ;;  %1563 = vmatprep.mubr.bf16.mxu1 %v3112_v52 }
 0x143   :  { %2662 = vmatprep.mubr.msk.bf16.mxu0 %vm3130_vm0, %v3129_v39 }
 0x144   :  { %v3793_v54 = vpop.f32.mrb[24].mxu1 }
 0x145   :  { %v1215_v55 = vpop.f32.mrb[25].mxu1 }
 0x146   :  { %v3801_v58 = vpop.f32.mrb[26].mxu1  ;;  %v1174_v55 = vadd.f32 %v3865_v38, %v3718_v18 }
 0x147   :  { %v1218_v60 = vpop.f32.mrb[27].mxu1 }
 0x149   :  { %1564 = vmatmul.mubr.bf16.gmra.mrb[84].mxu1 %v3114_v56 }
 0x14a   :  { %2663 = vmatmul.mubr.bf16.gmra.mrb[80].mxu0 %v3115_v57  ;;  %1571 = vmatprep.mubr.bf16.mxu1 %v3116_v59  ;;  %v1177_v59 = vadd.f32 %v3865_v38, %v3726_v22 }
 0x14b   :  { %2666 = vmatprep.mubr.msk.bf16.mxu0 %vm3130_vm0, %v3129_v39 }
 0x14c   :  { %v3808_v61 = vpop.f32.mrb[28].mxu1 }
 0x14d   :  { %v1223_v62 = vpop.f32.mrb[29].mxu1 }
 0x14e   :  { %v3816_v2 = vpop.f32.mrb[30].mxu1 }
 0x14f   :  { %v1226_v4 = vpop.f32.mrb[31].mxu1 }
 0x150   :  { %v1182_v4 = vadd.f32 %v3865_v38, %v3733_v25 }
 0x151   :  { %1572 = vmatmul.mubr.bf16.gmra.mrb[88].mxu1 %v3118_v63 }
 0x152   :  { %2667 = vmatmul.mubr.bf16.gmra.mrb[84].mxu0 %v3119_v1  ;;  %1579 = vmatprep.mubr.bf16.mxu1 %v3120_v3 }
 0x153   :  { %2670 = vmatprep.mubr.msk.bf16.mxu0 %vm3130_vm0, %v3129_v39 }
 0x154   :  { %v3826_v6 = vpop.f32.mrb[32].mxu1 }
 0x155   :  { %v1231_v7 = vpop.f32.mrb[33].mxu1 }
 0x156   :  { %v3834_v10 = vpop.f32.mrb[34].mxu1  ;;  %v1185_v7 = vadd.f32 %v3865_v38, %v3741_v29 }
 0x157   :  { %v1234_v13 = vpop.f32.mrb[35].mxu1 }
 0x159   :  { %1580 = vmatmul.mubr.bf16.gmra.mrb[92].mxu1 %v3122_v8 }
 0x15a   :  { %2671 = vmatmul.mubr.bf16.gmra.mrb[88].mxu0 %v3123_v9  ;;  %1587 = vmatprep.mubr.bf16.mxu1 %v2250_v11 }
 0x15b   :  { %2674 = vmatprep.mubr.msk.bf16.mxu0 %vm3130_vm0, %v3129_v39 }
 0x15c   :  { %v3838_v14 = vpop.f32.mrb[36].mxu1 }
 0x15d   :  { %v1239_v15 = vpop.f32.mrb[37].mxu1 }
 0x15e   :  { %v3843_v19 = vpop.f32.mrb[38].mxu1 }
 0x15f   :  { %v1242_v20 = vpop.f32.mrb[39].mxu1 }
 0x161   :  { %1588 = vmatmul.mubr.bf16.gmra.mrb[96].mxu1 %v2249_v0 }
 0x162   :  { %2675 = vmatmul.mubr.bf16.gmra.mrb[92].mxu0 %v3126_v17  ;;  %v1190_v17 = vadd.f32 %v3865_v38, %v3748_v32 }
 0x163   :  { %2678 = vmatprep.mubr.msk.bf16.mxu0 %vm3130_vm0, %v3129_v39 }
 0x164   :  { %v3847_v21 = vpop.f32.mrb[40].mxu1 }
 0x165   :  { %v1247_v23 = vpop.f32.mrb[41].mxu1 }
 0x166   :  { %v3852_v26 = vpop.f32.mrb[42].mxu1  ;;  %v1193_v23 = vadd.f32 %v3865_v38, %v3756_v36 }
 0x167   :  { %v1250_v27 = vpop.f32.mrb[43].mxu1 }
 0x16a   :  { %2679 = vmatmul.mubr.bf16.gmra.mrb[96].mxu0 %v3127_v24 }
 0x16c   :  { %v3854_v28 = vpop.f32.mrb[44].mxu1 }
 0x16d   :  { %v1255_v30 = vpop.f32.mrb[45].mxu1 }
 0x16e   :  { %v3856_v31 = vpop.f32.mrb[46].mxu1 }
 0x16f   :  { %v1258_v33 = vpop.f32.mrb[47].mxu1 }
 0x174   :  { %v3858_v34 = vpop.f32.mrb[48].mxu1 }
 0x175   :  { %v1263_v39 = vpop.f32.mrb[49].mxu1 }
 0x176   :  { %v3860_v35 = vpop.f32.mrb[50].mxu1 }
 0x177   :  { %v1266_v37 = vpop.f32.mrb[51].mxu1 }
 0x17d   :  { %v1629_v42 = vpop.f32.mrb[0].mxu0 }
 0x17e   :  { %v2715_v45 = vadd.f32 %v1629_v42, %v1166_v41  ;;  %v2584_v46 = vpop.f32.mrb[1].mxu0  ;;  %v1198_v41 = vadd.f32 %v3865_v38, %v3763_v40 }
 0x17f   :  { %v1632_v48 = vpop.f32.mrb[2].mxu0 }
 0x180   :  { %v2717_v49 = vadd.f32 %v1632_v48, %v1169_v43  ;;  %v2585_v50 = vpop.f32.mrb[3].mxu0  ;;  %v1827_v52 = vmax.f32 %v2715_v45, 0.0  ;;  %v1201_v43 = vadd.f32 %v3865_v38, %v3771_v44 }
 0x182   :  { %v1828_v53 = vmax.f32 %v2717_v49, 0.0 }
 0x184   :  { %v2393_v56 = vpack.c.bf16 %v1828_v53, %v1827_v52  ;;  %v1206_v53 = vadd.f32 %v3865_v38, %v3778_v47 }
 0x185   :  { %v1637_v57 = vpop.f32.mrb[4].mxu0 }
 0x186   :  { %2394 = vst [vmem:[%s4020_s3] sm:$0xff] %v2393_v56   ;;  %v2719_v12 = vadd.f32 %v1637_v57, %v1174_v55  ;;  %v2588_v16 = vpop.f32.mrb[5].mxu0  ;;  %v1209_v56 = vadd.f32 %v3865_v38, %v3786_v51 }
 0x187   :  { %v1640_v60 = vpop.f32.mrb[6].mxu0 }
 0x188   :  { %v2721_v62 = vadd.f32 %v1640_v60, %v1177_v59  ;;  %v2589_v63 = vpop.f32.mrb[7].mxu0  ;;  %v1829_v1 = vmax.f32 %v2719_v12, 0.0 }
 0x189   :  { %v1214_v63 = vadd.f32 %v3865_v38, %v3793_v54 }
 0x18a   :  { %v1830_v3 = vmax.f32 %v2721_v62, 0.0 }
 0x18c   :  { %v2398_v18 = vpack.c.bf16 %v1830_v3, %v1829_v1  ;;  %v1217_v3 = vadd.f32 %v3865_v38, %v3801_v58 }
 0x18d   :  { %v1645_v5 = vpop.f32.mrb[8].mxu0 }
 0x18e   :  { %2510 = vst [vmem:[%s4020_s3 + $0x8] sm:$0xff] %v2398_v18   ;;  %v2723_v22 = vadd.f32 %v1645_v5, %v1182_v4  ;;  %v2592_v8 = vpop.f32.mrb[9].mxu0 }
 0x18f   :  { %v1648_v9 = vpop.f32.mrb[10].mxu0 }
 0x190   :  { %v2725_v11 = vadd.f32 %v1648_v9, %v1185_v7  ;;  %v2593_v13 = vpop.f32.mrb[11].mxu0  ;;  %v1831_v15 = vmax.f32 %v2723_v22, 0.0  ;;  %v1222_v9 = vadd.f32 %v3865_v38, %v3808_v61 }
 0x191   :  { %v1225_v13 = vadd.f32 %v3865_v38, %v3816_v2 }
 0x192   :  { %v1832_v0 = vmax.f32 %v2725_v11, 0.0 }
 0x194   :  { %v2403_v25 = vpack.c.bf16 %v1832_v0, %v1831_v15 }
 0x195   :  { %v1653_v20 = vpop.f32.mrb[12].mxu0 }
 0x196   :  { %2511 = vst [vmem:[%s4020_s3 + $0x10] sm:$0xff] %v2403_v25   ;;  %v2727_v29 = vadd.f32 %v1653_v20, %v1190_v17  ;;  %v2596_v24 = vpop.f32.mrb[13].mxu0 }
 0x197   :  { %v1656_v27 = vpop.f32.mrb[14].mxu0 }
 0x198   :  { %v2729_v30 = vadd.f32 %v1656_v27, %v1193_v23  ;;  %v2597_v33 = vpop.f32.mrb[15].mxu0  ;;  %v1833_v39 = vmax.f32 %v2727_v29, 0.0  ;;  %v1230_v29 = vadd.f32 %v3865_v38, %v3826_v6  ;;  %v1233_v27 = vadd.f32 %v3865_v38, %v3834_v10 }
 0x19a   :  { %v1834_v37 = vmax.f32 %v2729_v30, 0.0 }
 0x19c   :  { %v2408_v32 = vpack.c.bf16 %v1834_v37, %v1833_v39 }
 0x19d   :  { %v1661_v42 = vpop.f32.mrb[16].mxu0 }
 0x19e   :  { %2512 = vst [vmem:[%s4020_s3 + $0x18] sm:$0xff] %v2408_v32   ;;  %v2731_v36 = vadd.f32 %v1661_v42, %v1198_v41  ;;  %v2600_v45 = vpop.f32.mrb[17].mxu0  ;;  %v1238_v42 = vadd.f32 %v3865_v38, %v3838_v14 }
 0x19f   :  { %v1664_v46 = vpop.f32.mrb[18].mxu0 }
 0x1a0   :  { %v2733_v48 = vadd.f32 %v1664_v46, %v1201_v43  ;;  %v2601_v49 = vpop.f32.mrb[19].mxu0  ;;  %v1835_v50 = vmax.f32 %v2731_v36, 0.0  ;;  %v1241_v36 = vadd.f32 %v3865_v38, %v3843_v19 }
 0x1a2   :  { %v1836_v52 = vmax.f32 %v2733_v48, 0.0 }
 0x1a4   :  { %v2413_v40 = vpack.c.bf16 %v1836_v52, %v1835_v50 }
 0x1a5   :  { %v1669_v55 = vpop.f32.mrb[20].mxu0 }
 0x1a6   :  { %2513 = vst [vmem:[%s4020_s3 + $0x20] sm:$0xff] %v2413_v40   ;;  %v2735_v44 = vadd.f32 %v1669_v55, %v1206_v53  ;;  %v2604_v57 = vpop.f32.mrb[21].mxu0  ;;  %v1246_v53 = vadd.f32 %v3865_v38, %v3847_v21  ;;  %v1249_v55 = vadd.f32 %v3865_v38, %v3852_v26 }
 0x1a7   :  { %v1672_v59 = vpop.f32.mrb[22].mxu0 }
 0x1a8   :  { %v2737_v12 = vadd.f32 %v1672_v59, %v1209_v56  ;;  %v2605_v16 = vpop.f32.mrb[23].mxu0  ;;  %v1837_v60 = vmax.f32 %v2735_v44, 0.0 }
 0x1aa   :  { %v1838_v62 = vmax.f32 %v2737_v12, 0.0 }
 0x1ac   :  { %v2418_v47 = vpack.c.bf16 %v1838_v62, %v1837_v60  ;;  %v1254_v60 = vadd.f32 %v3865_v38, %v3854_v28 }
 0x1ad   :  { %v1677_v1 = vpop.f32.mrb[24].mxu0 }
 0x1ae   :  { %2514 = vst [vmem:[%s4020_s3 + $0x28] sm:$0xff] %v2418_v47   ;;  %v2739_v51 = vadd.f32 %v1677_v1, %v1214_v63  ;;  %v2608_v4 = vpop.f32.mrb[25].mxu0  ;;  %v1257_v63 = vadd.f32 %v3865_v38, %v3856_v31  ;;  %v1265_v31 = vadd.f32 %v3865_v38, %v3860_v35 }
 0x1af   :  { %v1680_v18 = vpop.f32.mrb[26].mxu0 }
 0x1b0   :  { %v2741_v5 = vadd.f32 %v1680_v18, %v1217_v3  ;;  %v2609_v7 = vpop.f32.mrb[27].mxu0  ;;  %v1839_v22 = vmax.f32 %v2739_v51, 0.0 }
 0x1b2   :  { %v1840_v8 = vmax.f32 %v2741_v5, 0.0  ;;  %v1262_v5 = vadd.f32 %v3865_v38, %v3858_v34 }
 0x1b4   :  { %v2423_v54 = vpack.c.bf16 %v1840_v8, %v1839_v22 }
 0x1b5   :  { %v1685_v11 = vpop.f32.mrb[28].mxu0 }
 0x1b6   :  { %2515 = vst [vmem:[%s4020_s3 + $0x30] sm:$0xff] %v2423_v54   ;;  %v2743_v58 = vadd.f32 %v1685_v11, %v1222_v9  ;;  %v2612_v15 = vpop.f32.mrb[29].mxu0 }
 0x1b7   :  { %v1688_v0 = vpop.f32.mrb[30].mxu0 }
 0x1b8   :  { %v2745_v17 = vadd.f32 %v1688_v0, %v1225_v13  ;;  %v2613_v25 = vpop.f32.mrb[31].mxu0  ;;  %v1841_v20 = vmax.f32 %v2743_v58, 0.0 }
 0x1ba   :  { %v1842_v23 = vmax.f32 %v2745_v17, 0.0 }
 0x1bc   :  { %v2428_v61 = vpack.c.bf16 %v1842_v23, %v1841_v20 }
 0x1bd   :  { %v1693_v24 = vpop.f32.mrb[32].mxu0 }
 0x1be   :  { %2516 = vst [vmem:[%s4020_s3 + $0x38] sm:$0xff] %v2428_v61   ;;  %v2747_v2 = vadd.f32 %v1693_v24, %v1230_v29  ;;  %v2616_v30 = vpop.f32.mrb[33].mxu0 }
 0x1bf   :  { %v1696_v33 = vpop.f32.mrb[34].mxu0 }
 0x1c0   :  { %v2749_v39 = vadd.f32 %v1696_v33, %v1233_v27  ;;  %v2617_v37 = vpop.f32.mrb[35].mxu0  ;;  %v1843_v41 = vmax.f32 %v2747_v2, 0.0 }
 0x1c2   :  { %v1844_v32 = vmax.f32 %v2749_v39, 0.0 }
 0x1c4   :  { %v2433_v6 = vpack.c.bf16 %v1844_v32, %v1843_v41 }
 0x1c5   :  { %v1701_v43 = vpop.f32.mrb[36].mxu0 }
 0x1c6   :  { %2517 = vst [vmem:[%s4020_s3 + $0x40] sm:$0xff] %v2433_v6   ;;  %v2751_v10 = vadd.f32 %v1701_v43, %v1238_v42  ;;  %v2620_v45 = vpop.f32.mrb[37].mxu0 }
 0x1c7   :  { %v1704_v46 = vpop.f32.mrb[38].mxu0 }
 0x1c8   :  { %v2753_v48 = vadd.f32 %v1704_v46, %v1241_v36  ;;  %v2621_v49 = vpop.f32.mrb[39].mxu0  ;;  %v1845_v50 = vmax.f32 %v2751_v10, 0.0 }
 0x1ca   :  { %v1846_v52 = vmax.f32 %v2753_v48, 0.0 }
 0x1cc   :  { %v2438_v14 = vpack.c.bf16 %v1846_v52, %v1845_v50 }
 0x1cd   :  { %v1709_v40 = vpop.f32.mrb[40].mxu0 }
 0x1ce   :  { %2518 = vst [vmem:[%s4020_s3 + $0x48] sm:$0xff] %v2438_v14   ;;  %v2755_v19 = vadd.f32 %v1709_v40, %v1246_v53  ;;  %v2624_v56 = vpop.f32.mrb[41].mxu0 }
 0x1cf   :  { %v1712_v44 = vpop.f32.mrb[42].mxu0 }
 0x1d0   :  { %v2757_v57 = vadd.f32 %v1712_v44, %v1249_v55  ;;  %v2625_v59 = vpop.f32.mrb[43].mxu0  ;;  %v1847_v12 = vmax.f32 %v2755_v19, 0.0 }
 0x1d2   :  { %v1848_v16 = vmax.f32 %v2757_v57, 0.0 }
 0x1d4   :  { %v2443_v21 = vpack.c.bf16 %v1848_v16, %v1847_v12 }
 0x1d5   :  { %v1717_v62 = vpop.f32.mrb[44].mxu0 }
 0x1d6   :  { %2519 = vst [vmem:[%s4020_s3 + $0x50] sm:$0xff] %v2443_v21   ;;  %v2759_v26 = vadd.f32 %v1717_v62, %v1254_v60  ;;  %v2628_v47 = vpop.f32.mrb[45].mxu0 }
 0x1d7   :  { %v1720_v1 = vpop.f32.mrb[46].mxu0 }
 0x1d8   :  { %v2761_v3 = vadd.f32 %v1720_v1, %v1257_v63  ;;  %v2629_v51 = vpop.f32.mrb[47].mxu0  ;;  %v1849_v4 = vmax.f32 %v2759_v26, 0.0 }
 0x1da   :  { %v1850_v18 = vmax.f32 %v2761_v3, 0.0 }
 0x1dc   :  { %v2448_v28 = vpack.c.bf16 %v1850_v18, %v1849_v4  ;;  %v1501_v7 = vpop.f32.mrb[52].mxu1 }
 0x1dd   :  { %v1725_v22 = vpop.f32.mrb[48].mxu0  ;;  %v1503_v8 = vpop.f32.mrb[53].mxu1  ;;  %v2766_v25 = vadd.f32 %v3865_v38, %v1501_v7 }
 0x1de   :  { %2520 = vst [vmem:[%s4020_s3 + $0x58] sm:$0xff] %v2448_v28   ;;  %v2763_v9 = vadd.f32 %v1725_v22, %v1262_v5  ;;  %v2632_v54 = vpop.f32.mrb[49].mxu0  ;;  %v1504_v11 = vpop.f32.mrb[54].mxu1 }
 0x1df   :  { %v1728_v13 = vpop.f32.mrb[50].mxu0  ;;  %v1506_v58 = vpop.f32.mrb[55].mxu1  ;;  %v2768_v35 = vadd.f32 %v3865_v38, %v1504_v11 }
 0x1e0   :  { %v2765_v15 = vadd.f32 %v1728_v13, %v1265_v31  ;;  %v2633_v0 = vpop.f32.mrb[51].mxu0  ;;  %v1851_v17 = vmax.f32 %v2763_v9, 0.0 }
 0x1e2   :  { %v1852_v34 = vmax.f32 %v2765_v15, 0.0 }
 0x1e4   :  { %v2453_v20 = vpack.c.bf16 %v1852_v34, %v1851_v17  ;;  %v1509_v23 = vpop.f32.mrb[56].mxu1 }
 0x1e5   :  { %v1733_v29 = vpop.f32.mrb[52].mxu0  ;;  %v1511_v61 = vpop.f32.mrb[57].mxu1  ;;  %v2770_v42 = vadd.f32 %v3865_v38, %v1509_v23 }
 0x1e6   :  { %2521 = vst [vmem:[%s4020_s3 + $0x60] sm:$0xff] %v2453_v20   ;;  %v2767_v24 = vadd.f32 %v2766_v25, %v1733_v29  ;;  %v2636_v27 = vpop.f32.mrb[53].mxu0  ;;  %v1512_v2 = vpop.f32.mrb[58].mxu1 }
 0x1e7   :  { %v1736_v30 = vpop.f32.mrb[54].mxu0  ;;  %v1514_v33 = vpop.f32.mrb[59].mxu1  ;;  %v2772_v45 = vadd.f32 %v3865_v38, %v1512_v2 }
 0x1e8   :  { %v2769_v39 = vadd.f32 %v2768_v35, %v1736_v30  ;;  %v2637_v37 = vpop.f32.mrb[55].mxu0  ;;  %v1853_v41 = vmax.f32 %v2767_v24, 0.0 }
 0x1ea   :  { %v1854_v32 = vmax.f32 %v2769_v39, 0.0 }
 0x1ec   :  { %v2458_v6 = vpack.c.bf16 %v1854_v32, %v1853_v41  ;;  %v1517_v43 = vpop.f32.mrb[60].mxu1 }
 0x1ed   :  { %v1741_v36 = vpop.f32.mrb[56].mxu0  ;;  %v1519_v10 = vpop.f32.mrb[61].mxu1  ;;  %v2774_v19 = vadd.f32 %v3865_v38, %v1517_v43 }
 0x1ee   :  { %2522 = vst [vmem:[%s4020_s3 + $0x68] sm:$0xff] %v2458_v6   ;;  %v2771_v46 = vadd.f32 %v2770_v42, %v1741_v36  ;;  %v2640_v48 = vpop.f32.mrb[57].mxu0  ;;  %v1520_v49 = vpop.f32.mrb[62].mxu1 }
 0x1ef   :  { %v1744_v50 = vpop.f32.mrb[58].mxu0  ;;  %v1522_v52 = vpop.f32.mrb[63].mxu1  ;;  %v2776_v12 = vadd.f32 %v3865_v38, %v1520_v49 }
 0x1f0   :  { %v2773_v53 = vadd.f32 %v2772_v45, %v1744_v50  ;;  %v2641_v14 = vpop.f32.mrb[59].mxu0  ;;  %v1855_v40 = vmax.f32 %v2771_v46, 0.0 }
 0x1f2   :  { %v1856_v55 = vmax.f32 %v2773_v53, 0.0 }
 0x1f4   :  { %v2463_v56 = vpack.c.bf16 %v1856_v55, %v1855_v40  ;;  %v1525_v44 = vpop.f32.mrb[64].mxu1 }
 0x1f5   :  { %v1749_v57 = vpop.f32.mrb[60].mxu0  ;;  %v1527_v59 = vpop.f32.mrb[65].mxu1  ;;  %v2778_v51 = vadd.f32 %v3865_v38, %v1525_v44 }
 0x1f6   :  { %2523 = vst [vmem:[%s4020_s3 + $0x70] sm:$0xff] %v2463_v56   ;;  %v2775_v16 = vadd.f32 %v2774_v19, %v1749_v57  ;;  %v2644_v60 = vpop.f32.mrb[61].mxu0  ;;  %v1528_v21 = vpop.f32.mrb[66].mxu1 }
 0x1f7   :  { %v1752_v62 = vpop.f32.mrb[62].mxu0  ;;  %v1530_v63 = vpop.f32.mrb[67].mxu1  ;;  %v2780_v7 = vadd.f32 %v3865_v38, %v1528_v21 }
 0x1f8   :  { %v2777_v26 = vadd.f32 %v2776_v12, %v1752_v62  ;;  %v2645_v47 = vpop.f32.mrb[63].mxu0  ;;  %v1857_v1 = vmax.f32 %v2775_v16, 0.0 }
 0x1fa   :  { %v1858_v3 = vmax.f32 %v2777_v26, 0.0 }
 0x1fc   :  { %v2468_v4 = vpack.c.bf16 %v1858_v3, %v1857_v1  ;;  %v1533_v18 = vpop.f32.mrb[68].mxu1 }
 0x1fd   :  { %v1757_v5 = vpop.f32.mrb[64].mxu0  ;;  %v1535_v28 = vpop.f32.mrb[69].mxu1  ;;  %v2782_v0 = vadd.f32 %v3865_v38, %v1533_v18 }
 0x1fe   :  { %2524 = vst [vmem:[%s4020_s3 + $0x78] sm:$0xff] %v2468_v4   ;;  %v2779_v22 = vadd.f32 %v2778_v51, %v1757_v5  ;;  %v2648_v8 = vpop.f32.mrb[65].mxu0  ;;  %v1536_v31 = vpop.f32.mrb[70].mxu1 }
 0x1ff   :  { %v1760_v9 = vpop.f32.mrb[66].mxu0  ;;  %v1538_v54 = vpop.f32.mrb[71].mxu1  ;;  %v2784_v23 = vadd.f32 %v3865_v38, %v1536_v31 }
 0x200   :  { %v2781_v11 = vadd.f32 %v2780_v7, %v1760_v9  ;;  %v2649_v13 = vpop.f32.mrb[67].mxu0  ;;  %v1859_v58 = vmax.f32 %v2779_v22, 0.0 }
 0x202   :  { %v1860_v15 = vmax.f32 %v2781_v11, 0.0 }
 0x204   :  { %v2473_v17 = vpack.c.bf16 %v1860_v15, %v1859_v58  ;;  %v1541_v34 = vpop.f32.mrb[72].mxu1 }
 0x205   :  { %v1765_v25 = vpop.f32.mrb[68].mxu0  ;;  %v1543_v20 = vpop.f32.mrb[73].mxu1  ;;  %v2786_v37 = vadd.f32 %v3865_v38, %v1541_v34 }
 0x206   :  { %2525 = vst [vmem:[%s4020_s3 + $0x80] sm:$0xff] %v2473_v17   ;;  %v2783_v29 = vadd.f32 %v2782_v0, %v1765_v25  ;;  %v2652_v61 = vpop.f32.mrb[69].mxu0  ;;  %v1544_v35 = vpop.f32.mrb[74].mxu1 }
 0x207   :  { %v1768_v24 = vpop.f32.mrb[70].mxu0  ;;  %v1546_v27 = vpop.f32.mrb[75].mxu1  ;;  %v2788_v43 = vadd.f32 %v3865_v38, %v1544_v35 }
 0x208   :  { %v2785_v2 = vadd.f32 %v2784_v23, %v1768_v24  ;;  %v2653_v30 = vpop.f32.mrb[71].mxu0  ;;  %v1861_v33 = vmax.f32 %v2783_v29, 0.0 }
 0x20a   :  { %v1862_v39 = vmax.f32 %v2785_v2, 0.0 }
 0x20c   :  { %v2478_v41 = vpack.c.bf16 %v1862_v39, %v1861_v33  ;;  %v1549_v32 = vpop.f32.mrb[76].mxu1 }
 0x20d   :  { %v1773_v42 = vpop.f32.mrb[72].mxu0  ;;  %v1551_v6 = vpop.f32.mrb[77].mxu1  ;;  %v2790_v14 = vadd.f32 %v3865_v38, %v1549_v32 }
 0x20e   :  { %2526 = vst [vmem:[%s4020_s3 + $0x88] sm:$0xff] %v2478_v41   ;;  %v2787_v36 = vadd.f32 %v2786_v37, %v1773_v42  ;;  %v2656_v10 = vpop.f32.mrb[73].mxu0  ;;  %v1552_v45 = vpop.f32.mrb[78].mxu1 }
 0x20f   :  { %v1776_v46 = vpop.f32.mrb[74].mxu0  ;;  %v1554_v48 = vpop.f32.mrb[79].mxu1  ;;  %v2792_v44 = vadd.f32 %v3865_v38, %v1552_v45 }
 0x210   :  { %v2789_v49 = vadd.f32 %v2788_v43, %v1776_v46  ;;  %v2657_v50 = vpop.f32.mrb[75].mxu0  ;;  %v1863_v52 = vmax.f32 %v2787_v36, 0.0 }
 0x212   :  { %v1864_v53 = vmax.f32 %v2789_v49, 0.0 }
 0x214   :  { %v2483_v40 = vpack.c.bf16 %v1864_v53, %v1863_v52  ;;  %v1557_v55 = vpop.f32.mrb[80].mxu1 }
 0x215   :  { %v1781_v19 = vpop.f32.mrb[76].mxu0  ;;  %v1559_v56 = vpop.f32.mrb[81].mxu1  ;;  %v2794_v47 = vadd.f32 %v3865_v38, %v1557_v55 }
 0x216   :  { %2527 = vst [vmem:[%s4020_s3 + $0x90] sm:$0xff] %v2483_v40   ;;  %v2791_v57 = vadd.f32 %v2790_v14, %v1781_v19  ;;  %v2660_v59 = vpop.f32.mrb[77].mxu0  ;;  %v1560_v12 = vpop.f32.mrb[82].mxu1 }
 0x217   :  { %v1784_v16 = vpop.f32.mrb[78].mxu0  ;;  %v1562_v60 = vpop.f32.mrb[83].mxu1  ;;  %v2796_v18 = vadd.f32 %v3865_v38, %v1560_v12 }
 0x218   :  { %v2793_v21 = vadd.f32 %v2792_v44, %v1784_v16  ;;  %v2661_v62 = vpop.f32.mrb[79].mxu0  ;;  %v1865_v63 = vmax.f32 %v2791_v57, 0.0 }
 0x21a   :  { %v1866_v26 = vmax.f32 %v2793_v21, 0.0 }
 0x21c   :  { %v2488_v1 = vpack.c.bf16 %v1866_v26, %v1865_v63  ;;  %v1565_v3 = vpop.f32.mrb[84].mxu1 }
 0x21d   :  { %v1789_v51 = vpop.f32.mrb[80].mxu0  ;;  %v1567_v4 = vpop.f32.mrb[85].mxu1  ;;  %v2798_v13 = vadd.f32 %v3865_v38, %v1565_v3 }
 0x21e   :  { %2528 = vst [vmem:[%s4020_s3 + $0x98] sm:$0xff] %v2488_v1   ;;  %v2795_v5 = vadd.f32 %v2794_v47, %v1789_v51  ;;  %v2664_v28 = vpop.f32.mrb[81].mxu0  ;;  %v1568_v7 = vpop.f32.mrb[86].mxu1 }
 0x21f   :  { %v1792_v22 = vpop.f32.mrb[82].mxu0  ;;  %v1570_v8 = vpop.f32.mrb[87].mxu1  ;;  %v2800_v34 = vadd.f32 %v3865_v38, %v1568_v7 }
 0x220   :  { %v2797_v31 = vadd.f32 %v2796_v18, %v1792_v22  ;;  %v2665_v9 = vpop.f32.mrb[83].mxu0  ;;  %v1867_v54 = vmax.f32 %v2795_v5, 0.0 }
 0x222   :  { %v1868_v11 = vmax.f32 %v2797_v31, 0.0 }
 0x224   :  { %v2493_v58 = vpack.c.bf16 %v1868_v11, %v1867_v54  ;;  %v1573_v15 = vpop.f32.mrb[88].mxu1 }
 0x225   :  { %v1797_v0 = vpop.f32.mrb[84].mxu0  ;;  %v1575_v17 = vpop.f32.mrb[89].mxu1  ;;  %v2802_v30 = vadd.f32 %v3865_v38, %v1573_v15 }
 0x226   :  { %2529 = vst [vmem:[%s4020_s3 + $0xa0] sm:$0xff] %v2493_v58   ;;  %v2799_v25 = vadd.f32 %v2798_v13, %v1797_v0  ;;  %v2668_v20 = vpop.f32.mrb[85].mxu0  ;;  %v1576_v23 = vpop.f32.mrb[90].mxu1 }
 0x227   :  { %v1800_v29 = vpop.f32.mrb[86].mxu0  ;;  %v1578_v61 = vpop.f32.mrb[91].mxu1  ;;  %v2804_v32 = vadd.f32 %v3865_v38, %v1576_v23 }
 0x228   :  { %v2801_v35 = vadd.f32 %v2800_v34, %v1800_v29  ;;  %v2669_v24 = vpop.f32.mrb[87].mxu0  ;;  %v1869_v27 = vmax.f32 %v2799_v25, 0.0 }
 0x22a   :  { %v1870_v2 = vmax.f32 %v2801_v35, 0.0 }
 0x22c   :  { %v2498_v33 = vpack.c.bf16 %v1870_v2, %v1869_v27  ;;  %v1581_v39 = vpop.f32.mrb[92].mxu1 }
 0x22d   :  { %v1805_v37 = vpop.f32.mrb[88].mxu0  ;;  %v1583_v41 = vpop.f32.mrb[93].mxu1  ;;  %v2806_v50 = vadd.f32 %v3865_v38, %v1581_v39 }
 0x22e   :  { %2530 = vst [vmem:[%s4020_s3 + $0xa8] sm:$0xff] %v2498_v33   ;;  %v2803_v42 = vadd.f32 %v2802_v30, %v1805_v37  ;;  %v2672_v6 = vpop.f32.mrb[89].mxu0  ;;  %v1584_v43 = vpop.f32.mrb[94].mxu1 }
 0x22f   :  { %v1808_v36 = vpop.f32.mrb[90].mxu0  ;;  %v1586_v10 = vpop.f32.mrb[95].mxu1  ;;  %v2808_v55 = vadd.f32 %v3865_v38, %v1584_v43 }
 0x230   :  { %v2805_v45 = vadd.f32 %v2804_v32, %v1808_v36  ;;  %v2673_v46 = vpop.f32.mrb[91].mxu0  ;;  %v1871_v48 = vmax.f32 %v2803_v42, 0.0 }
 0x232   :  { %v1872_v49 = vmax.f32 %v2805_v45, 0.0 }
 0x234   :  { %v2503_v52 = vpack.c.bf16 %v1872_v49, %v1871_v48  ;;  %v1589_v53 = vpop.f32.mrb[96].mxu1 }
 0x235   :  { %v1813_v14 = vpop.f32.mrb[92].mxu0  ;;  %v1591_v40 = vpop.f32.mrb[97].mxu1  ;;  %v2810_v62 = vadd.f32 %v3865_v38, %v1589_v53 }
 0x236   :  { %2531 = vst [vmem:[%s4020_s3 + $0xb0] sm:$0xff] %v2503_v52   ;;  %v2807_v19 = vadd.f32 %v2806_v50, %v1813_v14  ;;  %v2676_v56 = vpop.f32.mrb[93].mxu0  ;;  %v1592_v44 = vpop.f32.mrb[98].mxu1 }
 0x237   :  { %v1816_v57 = vpop.f32.mrb[94].mxu0  ;;  %v1593_v59 = vpop.f32.mrb[99].mxu1 }
 0x238   :  { %v2809_v12 = vadd.f32 %v2808_v55, %v1816_v57  ;;  %v2677_v16 = vpop.f32.mrb[95].mxu0  ;;  %v1873_v60 = vmax.f32 %v2807_v19, 0.0 }
 0x23a   :  { %v1874_v21 = vmax.f32 %v2809_v12, 0.0 }
 0x23c   :  { %v2508_v63 = vpack.c.bf16 %v1874_v21, %v1873_v60 }
 0x23d   :  { %v1821_v26 = vpop.f32.mrb[96].mxu0 }
 0x23e   :  { %2532 = vst [vmem:[%s4020_s3 + $0xb8] sm:$0xff] %v2508_v63   ;;  %v2811_v47 = vadd.f32 %v2810_v62, %v1821_v26  ;;  %v2680_v1 = vpop.f32.mrb[97].mxu0 }
 0x23f   :  { %v1824_v3 = vpop.f32.mrb[98].mxu0 }
 0x240   :  { %v1875_v51 = vmax.f32 %v2811_v47, 0.0  ;;  %v2681_v4 = vpop.f32.mrb[99].mxu0 }
 0x242   :  { %v2389_v18 = vpack.c.bf16 %v1875_v51, %v1875_v51 }
 0x244   :  { %2121 = vst [vmem:[%s4020_s3 + $0xc0] sm:$0xf] %v2389_v18 }

// kernel: _lambda_.7
= control target key start
LH: loop header
LB: loop body
LE: loop exit
PB: predicated region body
PF: predicated region fallthrough
CT: control target
= control target key end

     0   :  { %s1766_s18 = smov 0   ;;  %s1972_s0 = inlined_call_operand.vmem [shape: bf16[8,6272], index: 0, kind: input, shape index: {}]   ;;  %s1973_s1 = inlined_call_operand.vmem [shape: bf16[6272,256], index: 1, kind: input, shape index: {}]   ;;  %s1974_s2 = inlined_call_operand.vmem [shape: f32[1,256], index: 2, kind: input, shape index: {}]   ;;  %s1975_s3 = inlined_call_operand.vmem [shape: bf16[256,128], index: 3, kind: input, shape index: {}]   ;;  %s1976_s4 = inlined_call_operand.vmem [shape: f32[1,128], index: 4, kind: input, shape index: {}]   ;;  %s1977_s5 = inlined_call_operand.vmem [shape: f32[8,128], index: 5, kind: output, shape index: {}]  }
   0x1 LB: > { %s1772_s19 = sadd.s32 4294967295, %s1732_s18   ;;  %p1358_p0 = scmp.ge.s32.totalorder %s1732_s18, 1  ;;  %s1732_s18 = sphi %s1766_s18, %s15_s18  }
   0x2   : > { %p195_p1 = scmp.lt.s32.totalorder %s1732_s18, 8 }
   0x4   : > { %p196_p2 = pnand %p1358_p0, %p195_p1 }
   0x5   : > { %s224_s20 = smul.u32 (!%p196_p2), 7, %s1772_s19  ;;  %p1362_p5 = scmp.ne.s32.totalorder (!%p196_p2), %s1772_s19, 0 }
   0x6   : > { %199 = sbr.rel (%p196_p2) target bundleno = 604 (0x25c), region = 40 }
   0x7   : > { %s230_s21 = smul.u32 (!%p196_p2), 112, %s1772_s19  ;;  %p225_p3 = scmp.lt.s32.totalorder (!%p196_p2), %s224_s20, 48 }
   0x9   : > { %p231_p4 = scmp.lt.s32.totalorder (!%p196_p2), %s230_s21, 783 }
   0xd   : > { %s1979_s20 = smov (!%p225_p3, %s224_s20), 48  ;;  %s1981_s21 = smov (!%p231_p4, %s230_s21), 783 }
   0xe   : > { %s1359_s22 = sshll.u32 %s1979_s20, 2  ;;  %s1502_s26 = sshll.u32 %s1981_s21, 3  ;;  %v1734_v0 = vmov (!%p1362_p5), 0.0  }
   0xf   : > { %s1781_s25 = scalar_lea.vmem %s1972_s0, %s1359_s22  ;;  %s1786_s29 = scalar_lea.vmem %s1973_s1, %s1502_s26  ;;  %242 = vst [vmem:[#allocation2] sm:$0xff] (!%p1362_p5), %v1734_v0  ;;  %243 = vst [vmem:[#allocation2 + $0x8] sm:$0xff] (!%p1362_p5), %v1734_v0 }
  0x10   : > { %241 = sbr.rel (%p1362_p5) target bundleno = 23 (0x17), region = 44 }
  0x17 PF: > { %v1535_v1 = vld [vmem:[%s1786_s29 + $0x4] ss:$8 sps:$4 sm:$0xff]   ;;  %v1539_v3 = vld [vmem:[%s1786_s29] ss:$8 sps:$4 sm:$0xff]   ;;  %v1541_v5 = vld [vmem:[%s1786_s29 + $0x14] ss:$8 sps:$4 sm:$0xff]  }
  0x18   : > { %v1537_v2 = vld [vmem:[%s1786_s29 + $0x104] ss:$8 sps:$4 sm:$0xff]   ;;  %947 = vmatprep.subr.bf16.mxu0 %v1535_v1  ;;  %v1540_v4 = vld [vmem:[%s1786_s29 + $0x100] ss:$8 sps:$4 sm:$0xff]   ;;  %v1543_v6 = vld [vmem:[%s1786_s29 + $0x114] ss:$8 sps:$4 sm:$0xff]  }
  0x19   : > { %988 = vmatprep.subr.bf16.mxu1 %v1537_v2  ;;  %948 = vmatpush1.bf16.msra.mxu0 %v1539_v3  ;;  %v1545_v7 = vld [vmem:[%s1786_s29 + $0x10] ss:$8 sps:$4 sm:$0xff]   ;;  %v1547_v9 = vld [vmem:[%s1786_s29 + $0x24] ss:$8 sps:$4 sm:$0xff]   ;;  %v1551_v11 = vld [vmem:[%s1786_s29 + $0x20] ss:$8 sps:$4 sm:$0xff]  }
  0x1a   : > { %989 = vmatpush1.bf16.msra.mxu1 %v1540_v4  ;;  %949 = vmatprep.subr.bf16.mxu0 %v1541_v5  ;;  %v1546_v8 = vld [vmem:[%s1786_s29 + $0x110] ss:$8 sps:$4 sm:$0xff]   ;;  %v1549_v10 = vld [vmem:[%s1786_s29 + $0x124] ss:$8 sps:$4 sm:$0xff]   ;;  %v1552_v12 = vld [vmem:[%s1786_s29 + $0x120] ss:$8 sps:$4 sm:$0xff]  }
  0x1b   : > { %990 = vmatprep.subr.bf16.mxu1 %v1543_v6  ;;  %v1553_v13 = vld [vmem:[%s1786_s29 + $0x34] ss:$8 sps:$4 sm:$0xff]   ;;  %v1557_v15 = vld [vmem:[%s1786_s29 + $0x30] ss:$8 sps:$4 sm:$0xff]   ;;  %v1559_v17 = vld [vmem:[%s1786_s29 + $0x44] ss:$8 sps:$4 sm:$0xff]  }
  0x1c   : > { %v1555_v14 = vld [vmem:[%s1786_s29 + $0x134] ss:$8 sps:$4 sm:$0xff]   ;;  %v1558_v16 = vld [vmem:[%s1786_s29 + $0x130] ss:$8 sps:$4 sm:$0xff]   ;;  %v1561_v18 = vld [vmem:[%s1786_s29 + $0x144] ss:$8 sps:$4 sm:$0xff]  }
  0x1d   : > { %950 = vmatpush1.bf16.msra.mxu0 %v1545_v7  ;;  %v1563_v19 = vld [vmem:[%s1786_s29 + $0x40] ss:$8 sps:$4 sm:$0xff]   ;;  %v1565_v21 = vld [vmem:[%s1786_s29 + $0x54] ss:$8 sps:$4 sm:$0xff]   ;;  %v1569_v23 = vld [vmem:[%s1786_s29 + $0x50] ss:$8 sps:$4 sm:$0xff]  }
  0x1e   : > { %991 = vmatpush1.bf16.msra.mxu1 %v1546_v8  ;;  %951 = vmatprep.subr.bf16.mxu0 %v1547_v9  ;;  %v1564_v20 = vld [vmem:[%s1786_s29 + $0x140] ss:$8 sps:$4 sm:$0xff]   ;;  %v1567_v22 = vld [vmem:[%s1786_s29 + $0x154] ss:$8 sps:$4 sm:$0xff]   ;;  %v1570_v24 = vld [vmem:[%s1786_s29 + $0x150] ss:$8 sps:$4 sm:$0xff]  }
  0x1f   : > { %992 = vmatprep.subr.bf16.mxu1 %v1549_v10  ;;  %v1571_v25 = vld [vmem:[%s1786_s29 + $0x64] ss:$8 sps:$4 sm:$0xff]   ;;  %v1575_v27 = vld [vmem:[%s1786_s29 + $0x60] ss:$8 sps:$4 sm:$0xff]   ;;  %v1577_v29 = vld [vmem:[%s1786_s29 + $0x74] ss:$8 sps:$4 sm:$0xff]  }
  0x20   : > { %v1573_v26 = vld [vmem:[%s1786_s29 + $0x164] ss:$8 sps:$4 sm:$0xff]   ;;  %v1576_v28 = vld [vmem:[%s1786_s29 + $0x160] ss:$8 sps:$4 sm:$0xff]   ;;  %v1579_v30 = vld [vmem:[%s1786_s29 + $0x174] ss:$8 sps:$4 sm:$0xff]  }
  0x21   : > { %952 = vmatpush1.bf16.msra.mxu0 %v1551_v11  ;;  %v1581_v31 = vld [vmem:[%s1786_s29 + $0x70] ss:$8 sps:$4 sm:$0xff]   ;;  %v1583_v33 = vld [vmem:[%s1786_s29 + $0x84] ss:$8 sps:$4 sm:$0xff]   ;;  %v1587_v35 = vld [vmem:[%s1786_s29 + $0x80] ss:$8 sps:$4 sm:$0xff]  }
  0x22   : > { %993 = vmatpush1.bf16.msra.mxu1 %v1552_v12  ;;  %953 = vmatprep.subr.bf16.mxu0 %v1553_v13  ;;  %v1582_v32 = vld [vmem:[%s1786_s29 + $0x170] ss:$8 sps:$4 sm:$0xff]   ;;  %v1585_v34 = vld [vmem:[%s1786_s29 + $0x184] ss:$8 sps:$4 sm:$0xff]   ;;  %v1588_v36 = vld [vmem:[%s1786_s29 + $0x180] ss:$8 sps:$4 sm:$0xff]  }
  0x23   : > { %994 = vmatprep.subr.bf16.mxu1 %v1555_v14  ;;  %v1589_v37 = vld [vmem:[%s1786_s29 + $0x94] ss:$8 sps:$4 sm:$0xff]   ;;  %v1593_v39 = vld [vmem:[%s1786_s29 + $0x90] ss:$8 sps:$4 sm:$0xff]   ;;  %v1595_v41 = vld [vmem:[%s1786_s29 + $0xa4] ss:$8 sps:$4 sm:$0xff]  }
  0x24   : > { %v1591_v38 = vld [vmem:[%s1786_s29 + $0x194] ss:$8 sps:$4 sm:$0xff]   ;;  %v1594_v40 = vld [vmem:[%s1786_s29 + $0x190] ss:$8 sps:$4 sm:$0xff]   ;;  %v1597_v42 = vld [vmem:[%s1786_s29 + $0x1a4] ss:$8 sps:$4 sm:$0xff]  }
  0x25   : > { %954 = vmatpush1.bf16.msra.mxu0 %v1557_v15  ;;  %v1599_v43 = vld [vmem:[%s1786_s29 + $0xa0] ss:$8 sps:$4 sm:$0xff]   ;;  %v1601_v45 = vld [vmem:[%s1786_s29 + $0xb4] ss:$8 sps:$4 sm:$0xff]   ;;  %v1605_v50 = vld [vmem:[%s1786_s29 + $0xb0] ss:$8 sps:$4 sm:$0xff]  }
  0x26   : > { %995 = vmatpush1.bf16.msra.mxu1 %v1558_v16  ;;  %955 = vmatprep.subr.bf16.mxu0 %v1559_v17  ;;  %v1600_v44 = vld [vmem:[%s1786_s29 + $0x1a0] ss:$8 sps:$4 sm:$0xff]   ;;  %v1603_v46 = vld [vmem:[%s1786_s29 + $0x1b4] ss:$8 sps:$4 sm:$0xff]   ;;  %v1606_v51 = vld [vmem:[%s1786_s29 + $0x1b0] ss:$8 sps:$4 sm:$0xff]  }
  0x27   : > { %996 = vmatprep.subr.bf16.mxu1 %v1561_v18  ;;  %v246_v47 = vld [vmem:[%s1781_s25] sm:$0xff]  ;;  %v247_v49 = vld [vmem:[%s1781_s25 + $0x8] sm:$0xff]  ;;  %v1613_v57 = vld [vmem:[%s1786_s29 + $0xd4] ss:$8 sps:$4 sm:$0xff]   ;;  %v1735_v17 = vmov 0   ;;  %p1482_p6 = scmp.ne.s32.totalorder %s1772_s19, 6 }
  0x28   : > { %v1364_v48 = vcombine.high %v246_v47, %v246_v47  ;;  %v1366_v52 = vcombine.high %v247_v49, %v247_v49  ;;  %v1607_v53 = vld [vmem:[%s1786_s29 + $0xc4] ss:$8 sps:$4 sm:$0xff]   ;;  %v1611_v55 = vld [vmem:[%s1786_s29 + $0xc0] ss:$8 sps:$4 sm:$0xff]   ;;  %v1615_v58 = vld [vmem:[%s1786_s29 + $0x1d4] ss:$8 sps:$4 sm:$0xff]   ;;  %v1363_v7 = vcombine.low %v246_v47, %v246_v47  ;;  %v1365_v8 = vcombine.low %v247_v49, %v247_v49 }
  0x29   : > { %956 = vmatpush1.bf16.msra.mxu0 %v1563_v19  ;;  %v1609_v54 = vld [vmem:[%s1786_s29 + $0x1c4] ss:$8 sps:$4 sm:$0xff]   ;;  %v1612_v56 = vld [vmem:[%s1786_s29 + $0x1c0] ss:$8 sps:$4 sm:$0xff]   ;;  %v1617_v59 = vld [vmem:[%s1786_s29 + $0xd0] ss:$8 sps:$4 sm:$0xff]  }
  0x2a   : > { %997 = vmatpush1.bf16.msra.mxu1 %v1564_v20  ;;  %957 = vmatprep.subr.bf16.mxu0 %v1565_v21  ;;  %v1618_v60 = vld [vmem:[%s1786_s29 + $0x1d0] ss:$8 sps:$4 sm:$0xff]   ;;  %v1619_v61 = vld [vmem:[%s1786_s29 + $0xe4] ss:$8 sps:$4 sm:$0xff]   ;;  %v1623_v63 = vld [vmem:[%s1786_s29 + $0xe0] ss:$8 sps:$4 sm:$0xff]  }
  0x2b   : > { %998 = vmatprep.subr.bf16.mxu1 %v1567_v22  ;;  %979 = vmatprep.mubr.bf16.mxu0 %v1364_v48  ;;  %v1621_v62 = vld [vmem:[%s1786_s29 + $0x1e4] ss:$8 sps:$4 sm:$0xff]   ;;  %v1624_v0 = vld [vmem:[%s1786_s29 + $0x1e0] ss:$8 sps:$4 sm:$0xff]   ;;  %v1625_v1 = vld [vmem:[%s1786_s29 + $0xf4] ss:$8 sps:$4 sm:$0xff]  }
  0x2c   : > { %1020 = vmatprep.mubr.bf16.mxu1 %v1366_v52  ;;  %v1627_v2 = vld [vmem:[%s1786_s29 + $0x1f4] ss:$8 sps:$4 sm:$0xff]   ;;  %v1629_v3 = vld [vmem:[%s1786_s29 + $0xf0] ss:$8 sps:$4 sm:$0xff]   ;;  %v1637_v5 = vld [vmem:[%s1786_s29 + $0x204] ss:$8 sps:$4 sm:$0xff]  }
  0x2d   : > { %958 = vmatpush1.bf16.msra.mxu0 %v1569_v23  ;;  %v1630_v4 = vld [vmem:[%s1786_s29 + $0x1f0] ss:$8 sps:$4 sm:$0xff]   ;;  %v1661_v6 = vld [vmem:[%s1786_s29 + $0x304] ss:$8 sps:$4 sm:$0xff]   ;;  %v1635_v9 = vld [vmem:[%s1786_s29 + $0x200] ss:$8 sps:$4 sm:$0xff]  }
  0x2e   : > { %999 = vmatpush1.bf16.msra.mxu1 %v1570_v24  ;;  %959 = vmatprep.subr.bf16.mxu0 %v1571_v25  ;;  %v1659_v10 = vld [vmem:[%s1786_s29 + $0x300] ss:$8 sps:$4 sm:$0xff]   ;;  %v1640_v11 = vld [vmem:[%s1786_s29 + $0x214] ss:$8 sps:$4 sm:$0xff]   ;;  %v1638_v13 = vld [vmem:[%s1786_s29 + $0x210] ss:$8 sps:$4 sm:$0xff]  }
  0x2f   : > { %1000 = vmatprep.subr.bf16.mxu1 %v1573_v26  ;;  %v1667_v12 = vld [vmem:[%s1786_s29 + $0x314] ss:$8 sps:$4 sm:$0xff]   ;;  %v1665_v14 = vld [vmem:[%s1786_s29 + $0x310] ss:$8 sps:$4 sm:$0xff]   ;;  %v1643_v15 = vld [vmem:[%s1786_s29 + $0x224] ss:$8 sps:$4 sm:$0xff]  }
  0x30   : > { %v1673_v16 = vld [vmem:[%s1786_s29 + $0x324] ss:$8 sps:$4 sm:$0xff]   ;;  %v1641_v18 = vld [vmem:[%s1786_s29 + $0x220] ss:$8 sps:$4 sm:$0xff]   ;;  %v1646_v20 = vld [vmem:[%s1786_s29 + $0x234] ss:$8 sps:$4 sm:$0xff]  }
  0x31   : > { %960 = vmatpush1.bf16.msra.mxu0 %v1575_v27  ;;  %v1671_v19 = vld [vmem:[%s1786_s29 + $0x320] ss:$8 sps:$4 sm:$0xff]   ;;  %v1679_v21 = vld [vmem:[%s1786_s29 + $0x334] ss:$8 sps:$4 sm:$0xff]   ;;  %v1644_v23 = vld [vmem:[%s1786_s29 + $0x230] ss:$8 sps:$4 sm:$0xff]  }
  0x32   : > { %1001 = vmatpush1.bf16.msra.mxu1 %v1576_v28  ;;  %961 = vmatprep.subr.bf16.mxu0 %v1577_v29  ;;  %v1870_v22 = vld [vmem:[%s1781_s25 + $0x10] sm:$0xff]  ;;  %v1649_v26 = vld [vmem:[%s1786_s29 + $0x244] ss:$8 sps:$4 sm:$0xff]   ;;  %v1647_v28 = vld [vmem:[%s1786_s29 + $0x240] ss:$8 sps:$4 sm:$0xff]  }
  0x33   : > { %1002 = vmatprep.subr.bf16.mxu1 %v1579_v30  ;;  %v1677_v24 = vld [vmem:[%s1786_s29 + $0x330] ss:$8 sps:$4 sm:$0xff]   ;;  %v1368_v25 = vcombine.high %v1870_v22, %v1870_v22  ;;  %v1685_v27 = vld [vmem:[%s1786_s29 + $0x344] ss:$8 sps:$4 sm:$0xff]   ;;  %v1683_v29 = vld [vmem:[%s1786_s29 + $0x340] ss:$8 sps:$4 sm:$0xff]  }
  0x34   : > { %v1652_v30 = vld [vmem:[%s1786_s29 + $0x254] ss:$8 sps:$4 sm:$0xff]   ;;  %v1676_v47 = vld [vmem:[%s1786_s29 + $0x2a4] ss:$8 sps:$4 sm:$0xff]   ;;  %v1674_v48 = vld [vmem:[%s1786_s29 + $0x2a0] ss:$8 sps:$4 sm:$0xff]  }
  0x35   : > { %962 = vmatpush1.bf16.msra.mxu0 %v1581_v31  ;;  %v1691_v31 = vld [vmem:[%s1786_s29 + $0x354] ss:$8 sps:$4 sm:$0xff]   ;;  %v1686_v52 = vld [vmem:[%s1786_s29 + $0x2c0] ss:$8 sps:$4 sm:$0xff]  }
  0x36   : > { %1003 = vmatpush1.bf16.msra.mxu1 %v1582_v32  ;;  %963 = vmatprep.subr.bf16.mxu0 %v1583_v33  ;;  %v1650_v32 = vld [vmem:[%s1786_s29 + $0x250] ss:$8 sps:$4 sm:$0xff]   ;;  %v1682_v49 = vld [vmem:[%s1786_s29 + $0x2b4] ss:$8 sps:$4 sm:$0xff]  }
  0x37   : > { %1004 = vmatprep.subr.bf16.mxu1 %v1585_v34  ;;  %v1689_v33 = vld [vmem:[%s1786_s29 + $0x350] ss:$8 sps:$4 sm:$0xff]   ;;  %v1655_v34 = vld [vmem:[%s1786_s29 + $0x264] ss:$8 sps:$4 sm:$0xff]  }
  0x39   : > { %964 = vmatpush1.bf16.msra.mxu0 %v1587_v35  ;;  %v1697_v35 = vld [vmem:[%s1786_s29 + $0x364] ss:$8 sps:$4 sm:$0xff]  }
  0x3a   : > { %1005 = vmatpush1.bf16.msra.mxu1 %v1588_v36  ;;  %965 = vmatprep.subr.bf16.mxu0 %v1589_v37  ;;  %v1653_v36 = vld [vmem:[%s1786_s29 + $0x260] ss:$8 sps:$4 sm:$0xff]  }
  0x3b   : > { %1006 = vmatprep.subr.bf16.mxu1 %v1591_v38  ;;  %v1695_v37 = vld [vmem:[%s1786_s29 + $0x360] ss:$8 sps:$4 sm:$0xff]   ;;  %v1658_v38 = vld [vmem:[%s1786_s29 + $0x274] ss:$8 sps:$4 sm:$0xff]  }
  0x3d   : > { %966 = vmatpush1.bf16.msra.mxu0 %v1593_v39  ;;  %v1703_v39 = vld [vmem:[%s1786_s29 + $0x374] ss:$8 sps:$4 sm:$0xff]  }
  0x3e   : > { %1007 = vmatpush1.bf16.msra.mxu1 %v1594_v40  ;;  %967 = vmatprep.subr.bf16.mxu0 %v1595_v41  ;;  %v1656_v40 = vld [vmem:[%s1786_s29 + $0x270] ss:$8 sps:$4 sm:$0xff]  }
  0x3f   : > { %1008 = vmatprep.subr.bf16.mxu1 %v1597_v42  ;;  %v1701_v41 = vld [vmem:[%s1786_s29 + $0x370] ss:$8 sps:$4 sm:$0xff]   ;;  %v1664_v42 = vld [vmem:[%s1786_s29 + $0x284] ss:$8 sps:$4 sm:$0xff]  }
  0x41   : > { %968 = vmatpush1.bf16.msra.mxu0 %v1599_v43  ;;  %v1709_v43 = vld [vmem:[%s1781_s25 + $0x18] ss:$0 sps:$4 sm:$0xff]  }
  0x42   : > { %1009 = vmatpush1.bf16.msra.mxu1 %v1600_v44  ;;  %969 = vmatprep.subr.bf16.mxu0 %v1601_v45  ;;  %v1662_v44 = vld [vmem:[%s1786_s29 + $0x280] ss:$8 sps:$4 sm:$0xff]   ;;  %v1670_v45 = vld [vmem:[%s1786_s29 + $0x294] ss:$8 sps:$4 sm:$0xff]  }
  0x43   : > { %1010 = vmatprep.subr.bf16.mxu1 %v1603_v46  ;;  %v1668_v46 = vld [vmem:[%s1786_s29 + $0x290] ss:$8 sps:$4 sm:$0xff]  }
  0x45   : > { %970 = vmatpush1.bf16.msra.mxu0 %v1605_v50  ;;  %v1680_v50 = vld [vmem:[%s1786_s29 + $0x2b0] ss:$8 sps:$4 sm:$0xff]  }
  0x46   : > { %1011 = vmatpush1.bf16.msra.mxu1 %v1606_v51  ;;  %971 = vmatprep.subr.bf16.mxu0 %v1607_v53  ;;  %v1688_v51 = vld [vmem:[%s1786_s29 + $0x2c4] ss:$8 sps:$4 sm:$0xff]   ;;  %v1694_v53 = vld [vmem:[%s1786_s29 + $0x2d4] ss:$8 sps:$4 sm:$0xff]  }
  0x47   : > { %1012 = vmatprep.subr.bf16.mxu1 %v1609_v54  ;;  %v1692_v54 = vld [vmem:[%s1786_s29 + $0x2d0] ss:$8 sps:$4 sm:$0xff]  }
  0x49   : > { %972 = vmatpush1.bf16.msra.mxu0 %v1611_v55  ;;  %v1700_v55 = vld [vmem:[%s1786_s29 + $0x2e4] ss:$8 sps:$4 sm:$0xff]  }
  0x4a   : > { %1013 = vmatpush1.bf16.msra.mxu1 %v1612_v56  ;;  %973 = vmatprep.subr.bf16.mxu0 %v1613_v57  ;;  %v1698_v56 = vld [vmem:[%s1786_s29 + $0x2e0] ss:$8 sps:$4 sm:$0xff]   ;;  %v1706_v57 = vld [vmem:[%s1786_s29 + $0x2f4] ss:$8 sps:$4 sm:$0xff]  }
  0x4b   : > { %1014 = vmatprep.subr.bf16.mxu1 %v1615_v58  ;;  %v1704_v58 = vld [vmem:[%s1786_s29 + $0x2f0] ss:$8 sps:$4 sm:$0xff]  }
  0x4d   : > { %974 = vmatpush1.bf16.msra.mxu0 %v1617_v59  ;;  %v1367_v59 = vcombine.low %v1870_v22, %v1870_v22  ;;  %v1710_v22 = vld [vmem:[%s1975_s3 + $0x40] sm:$0xff] (!%p1482_p6)  }
  0x4e   : > { %1015 = vmatpush1.bf16.msra.mxu1 %v1618_v60  ;;  %975 = vmatprep.subr.bf16.mxu0 %v1619_v61 }
  0x4f   : > { %1016 = vmatprep.subr.bf16.mxu1 %v1621_v62 }
  0x51   : > { %976 = vmatpush1.bf16.msra.mxu0 %v1623_v63 }
  0x52   : > { %1017 = vmatpush1.bf16.msra.mxu1 %v1624_v0  ;;  %977 = vmatprep.subr.bf16.mxu0 %v1625_v1 }
  0x53   : > { %1018 = vmatprep.subr.bf16.mxu1 %v1627_v2 }
  0x55   : > { %978 = vmatpush1.bf16.msra.mxu0 %v1629_v3 }
  0x56   : > { %1019 = vmatpush1.bf16.msra.mxu1 %v1630_v4  ;;  %1029 = vmatprep.subr.bf16.mxu0 %v1637_v5 }
  0x57   : > { %1070 = vmatprep.subr.bf16.mxu1 %v1661_v6 }
  0x58   : > { %980 = vmatmul.mubr.bf16.vlgmr.msra.gmra.mrb[0].mxu0 %v1363_v7 }
  0x59   : > { %1021 = vmatmul.mubr.bf16.vlgmr.msra.gmra.mrb[0].mxu1 %v1365_v8  ;;  %1030 = vmatpush1.bf16.msra.mxu0 %v1635_v9 }
  0x5a   : > { %1071 = vmatpush1.bf16.msra.mxu1 %v1659_v10  ;;  %1031 = vmatprep.subr.bf16.mxu0 %v1640_v11 }
  0x5b   : > { %1072 = vmatprep.subr.bf16.mxu1 %v1667_v12  ;;  %1102 = vmatprep.mubr.bf16.mxu1 %v1735_v17  ;;  %v245_v17 = vld [vmem:[#allocation2 + $0x8] sm:$0xff] }
  0x5c   : > { %1061 = vmatprep.mubr.bf16.mxu0 %v1368_v25  ;;  %v1713_v25 = vld [vmem:[%s1975_s3 + $0x8] sm:$0xff] (!%p1482_p6)  }
  0x5d   : > { %1032 = vmatpush1.bf16.msra.mxu0 %v1638_v13  ;;  %v244_v13 = vld [vmem:[#allocation2] sm:$0xff] }
  0x5e   : > { %1073 = vmatpush1.bf16.msra.mxu1 %v1665_v14  ;;  %1033 = vmatprep.subr.bf16.mxu0 %v1643_v15 }
  0x5f   : > { %1074 = vmatprep.subr.bf16.mxu1 %v1673_v16 }
  0x61   : > { %1034 = vmatpush1.bf16.msra.mxu0 %v1641_v18 }
  0x62   : > { %1075 = vmatpush1.bf16.msra.mxu1 %v1671_v19  ;;  %1035 = vmatprep.subr.bf16.mxu0 %v1646_v20 }
  0x63   : > { %1076 = vmatprep.subr.bf16.mxu1 %v1679_v21 }
  0x65   : > { %1036 = vmatpush1.bf16.msra.mxu0 %v1644_v23  ;;  %v1711_v23 = vld [vmem:[%s1975_s3] sm:$0xff] (!%p1482_p6)  }
  0x66   : > { %1077 = vmatpush1.bf16.msra.mxu1 %v1677_v24  ;;  %1037 = vmatprep.subr.bf16.mxu0 %v1649_v26  ;;  %v1712_v24 = vld [vmem:[%s1975_s3 + $0x48] sm:$0xff] (!%p1482_p6)   ;;  %v1714_v26 = vld [vmem:[%s1975_s3 + $0x50] sm:$0xff] (!%p1482_p6)  }
  0x67   : > { %1078 = vmatprep.subr.bf16.mxu1 %v1685_v27  ;;  %v1123_v27 = vlaneseq (!%p1482_p6) }
  0x69   : > { %1038 = vmatpush1.bf16.msra.mxu0 %v1647_v28  ;;  %v1715_v28 = vld [vmem:[%s1975_s3 + $0x10] sm:$0xff] (!%p1482_p6)  }
  0x6a   : > { %1079 = vmatpush1.bf16.msra.mxu1 %v1683_v29  ;;  %1039 = vmatprep.subr.bf16.mxu0 %v1652_v30  ;;  %v1716_v29 = vld [vmem:[%s1975_s3 + $0x58] sm:$0xff] (!%p1482_p6)   ;;  %v1124_v30 = vshrl.u32 (!%p1482_p6), %v1123_v27, 7 }
  0x6b   : > { %1080 = vmatprep.subr.bf16.mxu1 %v1691_v31  ;;  %v1717_v31 = vld [vmem:[%s1975_s3 + $0x18] sm:$0xff] (!%p1482_p6)  }
  0x6d   : > { %1040 = vmatpush1.bf16.msra.mxu0 %v1650_v32  ;;  %v1718_v32 = vld [vmem:[%s1975_s3 + $0x60] sm:$0xff] (!%p1482_p6)  }
  0x6e   : > { %1081 = vmatpush1.bf16.msra.mxu1 %v1689_v33  ;;  %1041 = vmatprep.subr.bf16.mxu0 %v1655_v34  ;;  %v1129_v33 = vsub.s32 (!%p1482_p6), 1, %v1124_v30  ;;  %v1125_v34 = vsub.s32 (!%p1482_p6), 0, %v1124_v30 }
  0x6f   : > { %1082 = vmatprep.subr.bf16.mxu1 %v1697_v35  ;;  %v1719_v35 = vld [vmem:[%s1975_s3 + $0x20] sm:$0xff] (!%p1482_p6)  }
  0x71   : > { %1042 = vmatpush1.bf16.msra.mxu0 %v1653_v36  ;;  %v1720_v36 = vld [vmem:[%s1975_s3 + $0x68] sm:$0xff] (!%p1482_p6)  }
  0x72   : > { %1083 = vmatpush1.bf16.msra.mxu1 %v1695_v37  ;;  %1043 = vmatprep.subr.bf16.mxu0 %v1658_v38  ;;  %v1121_v38 = vld [vmem:[%s1974_s2] sm:$0x3] (!%p1482_p6) }
  0x73   : > { %1084 = vmatprep.subr.bf16.mxu1 %v1703_v39  ;;  %v1130_v39 = vrot.slane (!%p1482_p6), %v1121_v38, %v1129_v33 }
  0x75   : > { %1044 = vmatpush1.bf16.msra.mxu0 %v1656_v40  ;;  %v1126_v40 = vrot.slane (!%p1482_p6), %v1121_v38, %v1125_v34 }
  0x76   : > { %1085 = vmatpush1.bf16.msra.mxu1 %v1701_v41  ;;  %1045 = vmatprep.subr.bf16.mxu0 %v1664_v42  ;;  %v1721_v41 = vld [vmem:[%s1975_s3 + $0x28] sm:$0xff] (!%p1482_p6)  }
  0x79   : > { %1103 = vmatmul.mubr.bf16.vlgmr.msra.gmra.mrb[4].mxu1 %v1709_v43  ;;  %1046 = vmatpush1.bf16.msra.mxu0 %v1662_v44  ;;  %v1722_v44 = vld [vmem:[%s1975_s3 + $0x70] sm:$0xff] (!%p1482_p6)  }
  0x7a   : > { %1047 = vmatprep.subr.bf16.mxu0 %v1670_v45 }
  0x7d   : > { %1048 = vmatpush1.bf16.msra.mxu0 %v1668_v46 }
  0x7e   : > { %1049 = vmatprep.subr.bf16.mxu0 %v1676_v47  ;;  %v1723_v47 = vld [vmem:[%s1975_s3 + $0x30] sm:$0xff] (!%p1482_p6)  }
  0x81   : > { %1050 = vmatpush1.bf16.msra.mxu0 %v1674_v48 }
  0x82   : > { %1051 = vmatprep.subr.bf16.mxu0 %v1682_v49  ;;  %v1724_v49 = vld [vmem:[%s1975_s3 + $0x78] sm:$0xff] (!%p1482_p6)  }
  0x85   : > { %1052 = vmatpush1.bf16.msra.mxu0 %v1680_v50 }
  0x86   : > { %1053 = vmatprep.subr.bf16.mxu0 %v1688_v51  ;;  %v1725_v51 = vld [vmem:[%s1975_s3 + $0x38] sm:$0xff] (!%p1482_p6)  }
  0x89   : > { %1054 = vmatpush1.bf16.msra.mxu0 %v1686_v52 }
  0x8a   : > { %1055 = vmatprep.subr.bf16.mxu0 %v1694_v53 }
  0x8d   : > { %1056 = vmatpush1.bf16.msra.mxu0 %v1692_v54  ;;  %v1483_v54 = vld [vmem:[%s1976_s4] ss:$0 sm:$0xff] (!%p1482_p6) }
  0x8e   : > { %1057 = vmatprep.subr.bf16.mxu0 %v1700_v55 }
  0x91   : > { %1058 = vmatpush1.bf16.msra.mxu0 %v1698_v56 }
  0x92   : > { %1059 = vmatprep.subr.bf16.mxu0 %v1706_v57 }
  0x95   : > { %1060 = vmatpush1.bf16.msra.mxu0 %v1704_v58 }
  0x96   : > { %1503 = vmatprep.subr.bf16.mxu0 (!%p1482_p6), %v1710_v22 }
  0x98   : > { %1062 = vmatmul.mubr.bf16.vlgmr.msra.gmra.mrb[4].mxu0 %v1367_v59 }
  0x99   : > { %1504 = vmatpush3.bf16.msra.mxu0 (!%p1482_p6), %v1711_v23 }
  0x9a   : > { %1505 = vmatprep.subr.bf16.mxu0 (!%p1482_p6), %v1712_v24 }
  0x9d   : > { %1506 = vmatpush3.bf16.msra.mxu0 (!%p1482_p6), %v1713_v25 }
  0x9e   : > { %1507 = vmatprep.subr.bf16.mxu0 (!%p1482_p6), %v1714_v26 }
  0xa1   : > { %1508 = vmatpush3.bf16.msra.mxu0 (!%p1482_p6), %v1715_v28 }
  0xa2   : > { %1509 = vmatprep.subr.bf16.mxu0 (!%p1482_p6), %v1716_v29 }
  0xa5   : > { %1510 = vmatpush3.bf16.msra.mxu0 (!%p1482_p6), %v1717_v31 }
  0xa6   : > { %1511 = vmatprep.subr.bf16.mxu0 (!%p1482_p6), %v1718_v32 }
  0xa9   : > { %1512 = vmatpush3.bf16.msra.mxu0 (!%p1482_p6), %v1719_v35 }
  0xaa   : > { %1513 = vmatprep.subr.bf16.mxu0 (!%p1482_p6), %v1720_v36 }
  0xad   : > { %1514 = vmatpush3.bf16.msra.mxu0 (!%p1482_p6), %v1721_v41 }
  0xae   : > { %1515 = vmatprep.subr.bf16.mxu0 (!%p1482_p6), %v1722_v44 }
  0xb1   : > { %1516 = vmatpush3.bf16.msra.mxu0 (!%p1482_p6), %v1723_v47 }
  0xb2   : > { %1517 = vmatprep.subr.bf16.mxu0 (!%p1482_p6), %v1724_v49 }
  0xb5   : > { %1518 = vmatpush3.bf16.msra.mxu0 (!%p1482_p6), %v1725_v51 }
 0x12b   : > { %v981_v60 = vpop.f32.mrb[0].mxu0 }
 0x12c   : > { %v1022_v61 = vpop.f32.mrb[0].mxu1  ;;  %v983_v63 = vpop.f32.mrb[1].mxu0 }
 0x12d   : > { %v1023_v62 = vadd.f32 %v1022_v61, %v981_v60  ;;  %v1024_v0 = vpop.f32.mrb[1].mxu1  ;;  %v985_v2 = vpop.f32.mrb[2].mxu0 }
 0x12e   : > { %v1025_v1 = vadd.f32 %v1024_v0, %v983_v63  ;;  %v1026_v3 = vpop.f32.mrb[2].mxu1  ;;  %v986_v4 = vpop.f32.mrb[3].mxu0 }
 0x12f   : > { %v1027_v5 = vpop.f32.mrb[3].mxu1 }
 0x14c   : > { %v1104_v6 = vpop.f32.mrb[4].mxu1 }
 0x14d   : > { %v1106_v7 = vpop.f32.mrb[5].mxu1 }
 0x14e   : > { %v1108_v8 = vpop.f32.mrb[6].mxu1 }
 0x14f   : > { %v1109_v9 = vpop.f32.mrb[7].mxu1 }
 0x16b   : > { %v1063_v10 = vpop.f32.mrb[4].mxu0 }
 0x16c   : > { %v1064_v11 = vadd.f32 %v1063_v10, %v1023_v62  ;;  %v1065_v12 = vpop.f32.mrb[5].mxu0 }
 0x16d   : > { %v1066_v14 = vadd.f32 %v1065_v12, %v1025_v1  ;;  %v1067_v15 = vpop.f32.mrb[6].mxu0  ;;  %1118 = sbr.rel (%p1482_p6) target bundleno = 604 (0x25c), region = 48 }
 0x16e   : > { %v1105_v16 = vadd.f32 %v1104_v6, %v1064_v11  ;;  %v1068_v18 = vpop.f32.mrb[7].mxu0 }
 0x16f   : > { %v1107_v19 = vadd.f32 %v1106_v7, %v1066_v14 }
 0x170   : > { %v1111_v20 = vadd.f32 %v1105_v16, %v244_v13 }
 0x171   : > { %v1112_v21 = vadd.f32 %v1107_v19, %v245_v17 }
 0x172   : > { %1113 = vst [vmem:[#allocation2] sm:$0xff] %v1111_v20 }
 0x173   : > { %1114 = vst [vmem:[#allocation2 + $0x8] sm:$0xff] %v1112_v21 }
 0x179   : > { %v1119_v43 = vld [vmem:[#allocation2] sm:$0xff] }
 0x17a   : > { %v1120_v37 = vld [vmem:[#allocation2 + $0x8] sm:$0xff]  ;;  %v1133_v46 = vadd.f32 %v1126_v40, %v1119_v43 }
 0x17b   : > { %v1134_v42 = vadd.f32 %v1130_v39, %v1120_v37 }
 0x17c   : > { %v1135_v50 = vmax.f32 %v1133_v46, 0.0 }
 0x17d   : > { %v1136_v45 = vmax.f32 %v1134_v42, 0.0 }
 0x17e   : > { %v1137_v52 = vpack.c.bf16 %v1135_v50, %v1135_v50 }
 0x17f   : > { %v1138_v48 = vpack.c.bf16 %v1136_v45, %v1136_v45 }
 0x181   : > { %1306 = vmatprep.mubr.bf16.mxu0 %v1138_v48 }
 0x182   : > { %1307 = vmatmul.mubr.bf16.vlgmr.msra.gmra.mrb[0].mxu0 %v1137_v52 }
 0x255   : > { %v1519_v53 = vpop.f32.mrb[0].mxu0 }
 0x256   : > { %v1520_v55 = vpop.f32.mrb[1].mxu0 }
 0x257   : > { %v1521_v56 = vadd.f32 %v1520_v55, %v1519_v53  ;;  %v1522_v57 = vpop.f32.mrb[2].mxu0 }
 0x258   : > { %v1523_v58 = vpop.f32.mrb[3].mxu0 }
 0x259   : > { %v1309_v59 = vadd.f32 %v1521_v56, %v1483_v54 }
 0x25b   : > { %1314 = vst [vmem:[%s1977_s5] sm:$0xff] %v1309_v59 }
 0x25c PF: > { %s15_s18 = sadd.s32 1, %s1732_s18  }
 0x25d   : > { %p12_p7 = scmp.ge.s32.totalorder %s15_s18, 9  }
 0x25f   :  { %14 = sbr.rel (!%p12_p7) target bundleno = 1 (0x1), region = 77 }

</bundles_post_ra>
